<compile_context>
chip_gen: v7x
topology: tpu7x:2x2x1
jax: 0.10.0
libtpu: 0.0.40
codegen_flags: <defaults>
</compile_context>

<pallas_src>
import math
import functools

import jax
import jax.numpy as jnp
from jax.experimental import pallas as pl
from jax.experimental.pallas import tpu as pltpu

_HIGHEST = jax.lax.Precision.HIGHEST


# ---------------------------------------------------------------------------
# Fused decoder-block kernel (single invocation, everything VMEM-resident).
# ---------------------------------------------------------------------------
def _decoder_block_kernel(x_ref, enc_ref,
                          wqkv_s_ref, bqkv_s_ref, wo_s_ref, bo_s_ref,
                          wq_c_ref, bq_c_ref, wkv_c_ref, bkv_c_ref, wo_c_ref, bo_c_ref,
                          w1_ref, b1_ref, w2_ref, b2_ref,
                          alpha_ref, beta_ref,
                          o_ref, *, n_head, eps):
    x3 = x_ref[...]            # (B, St, D)
    enc3 = enc_ref[...]        # (B, Ss, D)
    B, St, D = x3.shape
    Ss = enc3.shape[1]
    d_k = D // n_head
    inv_sqrt_dk = 1.0 / math.sqrt(d_k)
    alpha = alpha_ref[0]       # scalar from SMEM
    beta = beta_ref[0]

    def mm(a, b):
        return jnp.dot(a, b, precision=_HIGHEST, preferred_element_type=jnp.float32)

    def res_ln(x, y):
        # x + LayerNorm(y) with the module's custom normalization.
        d = y.shape[-1]
        mean = jnp.mean(y, axis=-1, keepdims=True)
        var = jnp.sum((y - mean) ** 2, axis=-1, keepdims=True) * (1.0 / (d - 1))
        std = jnp.sqrt(var)                                    # unbiased sample std
        inv = pl.reciprocal(jnp.sqrt(std + eps))               # note: sqrt(std + eps), per spec
        return x + (y - mean) * inv * beta + alpha

    def attend(q3, k3, v3, wo_ref, bo_ref):
        # q3: (B, Sq, D); k3/v3: (B, Skv, D). Per-head softmax attention with a
        # single batched dot_general per head (batch dim = B), then one fused
        # output projection over all tokens.
        Sq = q3.shape[1]
        heads = []
        for h in range(n_head):                                # static, tiny -> unrolled
            lo = h * d_k
            qh = q3[:, :, lo:lo + d_k]
            kh = k3[:, :, lo:lo + d_k]
            vh = v3[:, :, lo:lo + d_k]
            s = jax.lax.dot_general(qh, kh, (((2,), (2,)), ((0,), (0,))),
                                    precision=_HIGHEST,
                                    preferred_element_type=jnp.float32) * inv_sqrt_dk
            s = s - jnp.max(s, axis=-1, keepdims=True)          # stable softmax
            p = jnp.exp(s)
            p = p * pl.reciprocal(jnp.sum(p, axis=-1, keepdims=True))
            # TODO(synk): attention dropout is identity in eval mode (not implemented).
            heads.append(jax.lax.dot_general(p, vh, (((2,), (1,)), ((0,), (0,))),
                                             precision=_HIGHEST,
                                             preferred_element_type=jnp.float32))
        ctx2 = jnp.concatenate(heads, axis=-1).reshape(B * Sq, D)
        out2 = mm(ctx2, wo_ref[...]) + bo_ref[...]              # single output projection
        return out2.reshape(B, Sq, D)

    # ---- sublayer 1: self-attention + residual + LN -----------------------
    x2 = x3.reshape(B * St, D)
    qkv = mm(x2, wqkv_s_ref[...]) + bqkv_s_ref[...]             # fused Q|K|V projection
    q3 = qkv[:, :D].reshape(B, St, D)
    k3 = qkv[:, D:2 * D].reshape(B, St, D)
    v3 = qkv[:, 2 * D:].reshape(B, St, D)
    x3 = res_ln(x3, attend(q3, k3, v3, wo_s_ref, bo_s_ref))

    # ---- sublayer 2: cross-attention + residual + LN ----------------------
    x2 = x3.reshape(B * St, D)
    e2 = enc3.reshape(B * Ss, D)
    q3 = (mm(x2, wq_c_ref[...]) + bq_c_ref[...]).reshape(B, St, D)
    kv = mm(e2, wkv_c_ref[...]) + bkv_c_ref[...]                # fused K|V projection
    k3 = kv[:, :D].reshape(B, Ss, D)
    v3 = kv[:, D:].reshape(B, Ss, D)
    x3 = res_ln(x3, attend(q3, k3, v3, wo_c_ref, bo_c_ref))

    # ---- sublayer 3: FFN (Linear -> Linear, no activation) + residual + LN -
    # TODO(synk): FFN dropout between the two linears is identity in eval mode.
    x2 = x3.reshape(B * St, D)
    h2 = mm(x2, w1_ref[...]) + b1_ref[...]                      # (B*St, F)
    y2 = mm(h2, w2_ref[...]) + b2_ref[...]                      # (B*St, D)
    o_ref[...] = res_ln(x3, y2.reshape(B, St, D))


# ---------------------------------------------------------------------------
# DecoderBlock forward (Pallas wrapper).
# ---------------------------------------------------------------------------
def decoder_block(x, encoder_output, src_mask, target_mask, params, *, n_head, eps=1e-6):
    # The reference module accepts masks but never forwards them into the
    # attention math, so they are ignored here as well.
    del src_mask, target_mask
    B, St, D = x.shape
    Ss = encoder_output.shape[1]
    assert D % n_head == 0

    sa, ca, ff, ln = params["self_attn"], params["cross_attn"], params["ffn"], params["ln"]

    # Pre-concatenate projection weights so the kernel issues one wide MXU
    # matmul per projection (fewer, bigger matmuls; fewer input windows).
    wqkv_s = jnp.concatenate([sa["wq"], sa["wk"], sa["wv"]], axis=1)   # (D, 3D)
    bqkv_s = jnp.concatenate([sa["bq"], sa["bk"], sa["bv"]], axis=1)   # (1, 3D)
    wkv_c = jnp.concatenate([ca["wk"], ca["wv"]], axis=1)              # (D, 2D)
    bkv_c = jnp.concatenate([ca["bk"], ca["bv"]], axis=1)              # (1, 2D)

    vmem = pl.BlockSpec(memory_space=pltpu.MemorySpace.VMEM)
    smem = pl.BlockSpec(memory_space=pltpu.MemorySpace.SMEM)

    return pl.pallas_call(
        functools.partial(_decoder_block_kernel, n_head=n_head, eps=eps),
        out_shape=jax.ShapeDtypeStruct((B, St, D), jnp.float32),
        in_specs=[vmem, vmem,                          # x, encoder_output
                  vmem, vmem, vmem, vmem,              # self-attn:  Wqkv, bqkv, Wo, bo
                  vmem, vmem, vmem, vmem, vmem, vmem,  # cross-attn: Wq, bq, Wkv, bkv, Wo, bo
                  vmem, vmem, vmem, vmem,              # ffn: W1, b1, W2, b2
                  smem, smem],                         # LayerNorm alpha, beta
        out_specs=vmem,
    )(x, encoder_output,
      wqkv_s, bqkv_s, sa["wo"], sa["bo"],
      ca["wq"], ca["bq"], wkv_c, bkv_c, ca["wo"], ca["bo"],
      ff["w1"], ff["b1"], ff["w2"], ff["b2"],
      ln["alpha"], ln["beta"])


# ---------------------------------------------------------------------------
# Pure-JAX reference (mirrors the PyTorch module exactly).
# ---------------------------------------------------------------------------
def _ref_res_ln(x, y, alpha, beta, eps):
    mean = jnp.mean(y, axis=-1, keepdims=True)
    std = jnp.std(y, axis=-1, keepdims=True, ddof=1)
    norm = (y - mean) / jnp.sqrt(std + eps)
    return x + norm * beta + alpha


def _ref_mha(x_q, x_kv, p, n_head):
    B, Sq, D = x_q.shape
    Skv = x_kv.shape[1]
    d_k = D // n_head
    q = jnp.matmul(x_q, p["wq"], precision=_HIGHEST) + p["bq"]
    k = jnp.matmul(x_kv, p["wk"], precision=_HIGHEST) + p["bk"]
    v = jnp.matmul(x_kv, p["wv"], precision=_HIGHEST) + p["bv"]
    split = lambda t, S: t.reshape(B, S, n_head, d_k).transpose(0, 2, 1, 3)
    qh, kh, vh = split(q, Sq), split(k, Skv), split(v, Skv)
    s = jnp.einsum("bhqd,bhkd->bhqk", qh, kh, precision=_HIGHEST) / math.sqrt(d_k)
    a = jax.nn.softmax(s, axis=-1)
    o = jnp.einsum("bhqk,bhkd->bhqd", a, vh, precision=_HIGHEST)
    o = o.transpose(0, 2, 1, 3).reshape(B, Sq, D)
    return jnp.matmul(o, p["wo"], precision=_HIGHEST) + p["bo"]


def _ref_decoder_block(x, encoder_output, params, *, n_head, eps):
    alpha = params["ln"]["alpha"][0]
    beta = params["ln"]["beta"][0]
    y = _ref_mha(x, x, params["self_attn"], n_head)
    x = _ref_res_ln(x, y, alpha, beta, eps)
    y = _ref_mha(x, encoder_output, params["cross_attn"], n_head)
    x = _ref_res_ln(x, y, alpha, beta, eps)
    f = params["ffn"]
    y = jnp.matmul(jnp.matmul(x, f["w1"], precision=_HIGHEST) + f["b1"],
                   f["w2"], precision=_HIGHEST) + f["b2"]
    return _ref_res_ln(x, y, alpha, beta, eps)


if __name__ == "__main__":
    B, S_TGT, S_SRC, D_MODEL, N_HEAD, D_FF = 2, 8, 8, 32, 4, 64
    EPS = 1e-6

    keys = iter(jax.random.split(jax.random.PRNGKey(0), 24))

    def linear(d_in, d_out):
        bound = 1.0 / math.sqrt(d_in)
        w = jax.random.uniform(next(keys), (d_in, d_out), jnp.float32, -bound, bound)
        b = jax.random.uniform(next(keys), (1, d_out), jnp.float32, -bound, bound)
        return w, b

    def attn_params():
        wq, bq = linear(D_MODEL, D_MODEL)
        wk, bk = linear(D_MODEL, D_MODEL)
        wv, bv = linear(D_MODEL, D_MODEL)
        wo, bo = linear(D_MODEL, D_MODEL)
        return dict(wq=wq, bq=bq, wk=wk, bk=bk, wv=wv, bv=bv, wo=wo, bo=bo)

    self_attn = attn_params()
    cross_attn = attn_params()
    w1, b1 = linear(D_MODEL, D_FF)
    w2, b2 = linear(D_FF, D_MODEL)

    params = {
        "self_attn": self_attn,
        "cross_attn": cross_attn,
        "ffn": dict(w1=w1, b1=b1, w2=w2, b2=b2),
        "ln": dict(alpha=jnp.zeros((1,), jnp.float32),   # torch init: zeros
                   beta=jnp.ones((1,), jnp.float32)),    # torch init: ones
    }

    x = jax.random.normal(next(keys), (B, S_TGT, D_MODEL), dtype=jnp.float32)
    enc = jax.random.normal(next(keys), (B, S_SRC, D_MODEL), dtype=jnp.float32)

    out = decoder_block(x, enc, None, None, params, n_head=N_HEAD, eps=EPS)
    out = jax.block_until_ready(out)

    ref = _ref_decoder_block(x, enc, params, n_head=N_HEAD, eps=EPS)

    assert out.shape == (B, S_TGT, D_MODEL)
    # Tolerance covers minor MXU/VPU rounding-order differences between Pallas and XLA.
    assert jnp.allclose(out, ref, atol=2e-3, rtol=2e-3), (
        f"max abs diff = {jnp.max(jnp.abs(out - ref))}")

    print("KERNEL_OK")
</pallas_src>

<mosaic_0001>
module attributes {stable_mosaic.version = 11 : i64} {
  func.func @_decoder_block_kernel(%arg0: memref<2x8x32xf32, #tpu.memory_space<vmem>>, %arg1: memref<2x8x32xf32, #tpu.memory_space<vmem>>, %arg2: memref<32x96xf32, #tpu.memory_space<vmem>>, %arg3: memref<1x96xf32, #tpu.memory_space<vmem>>, %arg4: memref<32x32xf32, #tpu.memory_space<vmem>>, %arg5: memref<1x32xf32, #tpu.memory_space<vmem>>, %arg6: memref<32x32xf32, #tpu.memory_space<vmem>>, %arg7: memref<1x32xf32, #tpu.memory_space<vmem>>, %arg8: memref<32x64xf32, #tpu.memory_space<vmem>>, %arg9: memref<1x64xf32, #tpu.memory_space<vmem>>, %arg10: memref<32x32xf32, #tpu.memory_space<vmem>>, %arg11: memref<1x32xf32, #tpu.memory_space<vmem>>, %arg12: memref<32x64xf32, #tpu.memory_space<vmem>>, %arg13: memref<1x64xf32, #tpu.memory_space<vmem>>, %arg14: memref<64x32xf32, #tpu.memory_space<vmem>>, %arg15: memref<1x32xf32, #tpu.memory_space<vmem>>, %arg16: memref<1xf32, #tpu.memory_space<smem>>, %arg17: memref<1xf32, #tpu.memory_space<smem>>, %arg18: memref<2x8x32xf32, #tpu.memory_space<vmem>>) attributes {dimension_semantics = [], scalar_prefetch = 0 : i64, scratch_operands = 0 : i64, tpu.core_type = #tpu.core_type<tc>} {
    %c0 = arith.constant 0 : index
    %c0_0 = arith.constant 0 : index
    %c0_1 = arith.constant 0 : index
    %0 = vector.load %arg0[%c0, %c0_0, %c0_1] : memref<2x8x32xf32, #tpu.memory_space<vmem>>, vector<2x8x32xf32>
    %c0_2 = arith.constant 0 : index
    %c0_3 = arith.constant 0 : index
    %c0_4 = arith.constant 0 : index
    %1 = vector.load %arg1[%c0_2, %c0_3, %c0_4] : memref<2x8x32xf32, #tpu.memory_space<vmem>>, vector<2x8x32xf32>
    %c0_5 = arith.constant 0 : index
    %2 = memref.load %arg16[%c0_5] : memref<1xf32, #tpu.memory_space<smem>>
    %c0_6 = arith.constant 0 : index
    %3 = memref.load %arg17[%c0_6] : memref<1xf32, #tpu.memory_space<smem>>
    %4 = vector.shape_cast %0 : vector<2x8x32xf32> to vector<16x32xf32>
    %c0_7 = arith.constant 0 : index
    %c0_8 = arith.constant 0 : index
    %5 = vector.load %arg2[%c0_7, %c0_8] : memref<32x96xf32, #tpu.memory_space<vmem>>, vector<32x96xf32>
    %cst = arith.constant dense<0.000000e+00> : vector<16x96xf32>
    %6 = tpu.matmul %4, %5, %cst {dimension_numbers = #tpu.dot_dimension_numbers<[1], [0], [0], [1], [0, 0, 1, 1], [], []>, precision = #tpu.contract_precision<fp32>} : vector<16x32xf32>, vector<32x96xf32>, vector<16x96xf32> -> vector<16x96xf32>
    %c0_9 = arith.constant 0 : index
    %c0_10 = arith.constant 0 : index
    %7 = vector.load %arg3[%c0_9, %c0_10] : memref<1x96xf32, #tpu.memory_space<vmem>>, vector<1x96xf32>
    %8 = vector.broadcast %7 : vector<1x96xf32> to vector<16x96xf32>
    %9 = arith.addf %6, %8 : vector<16x96xf32>
    %10 = vector.extract_strided_slice %9 {offsets = [0, 0], sizes = [16, 32], strides = [1, 1]} : vector<16x96xf32> to vector<16x32xf32>
    %11 = vector.shape_cast %10 : vector<16x32xf32> to vector<2x8x32xf32>
    %12 = vector.extract_strided_slice %9 {offsets = [0, 32], sizes = [16, 32], strides = [1, 1]} : vector<16x96xf32> to vector<16x32xf32>
    %13 = vector.shape_cast %12 : vector<16x32xf32> to vector<2x8x32xf32>
    %14 = vector.extract_strided_slice %9 {offsets = [0, 64], sizes = [16, 32], strides = [1, 1]} : vector<16x96xf32> to vector<16x32xf32>
    %15 = vector.shape_cast %14 : vector<16x32xf32> to vector<2x8x32xf32>
    %16 = vector.extract_strided_slice %11 {offsets = [0, 0, 0], sizes = [2, 8, 8], strides = [1, 1, 1]} : vector<2x8x32xf32> to vector<2x8x8xf32>
    %17 = vector.extract_strided_slice %13 {offsets = [0, 0, 0], sizes = [2, 8, 8], strides = [1, 1, 1]} : vector<2x8x32xf32> to vector<2x8x8xf32>
    %18 = vector.extract_strided_slice %15 {offsets = [0, 0, 0], sizes = [2, 8, 8], strides = [1, 1, 1]} : vector<2x8x32xf32> to vector<2x8x8xf32>
    %cst_11 = arith.constant dense<0.000000e+00> : vector<2x8x8xf32>
    %19 = tpu.matmul %16, %17, %cst_11 {dimension_numbers = #tpu.dot_dimension_numbers<[2], [2], [1], [1], [0, 0, 0, 1, 1, 1], [0], [0]>, precision = #tpu.contract_precision<fp32>} : vector<2x8x8xf32>, vector<2x8x8xf32>, vector<2x8x8xf32> -> vector<2x8x8xf32>
    %cst_12 = arith.constant 0.353553385 : f32
    %20 = vector.broadcast %cst_12 : f32 to vector<2x8x8xf32>
    %21 = arith.mulf %19, %20 : vector<2x8x8xf32>
    %cst_13 = arith.constant dense<0xFF800000> : vector<2x8xf32>
    %22 = vector.multi_reduction <maximumf>, %21, %cst_13 [2] : vector<2x8x8xf32> to vector<2x8xf32>
    %23 = vector.shape_cast %22 : vector<2x8xf32> to vector<2x8x1xf32>
    %24 = vector.broadcast %23 : vector<2x8x1xf32> to vector<2x8x8xf32>
    %25 = arith.subf %21, %24 : vector<2x8x8xf32>
    %26 = math.exp %25 : vector<2x8x8xf32>
    %cst_14 = arith.constant dense<0.000000e+00> : vector<2x8xf32>
    %27 = vector.multi_reduction <add>, %26, %cst_14 [2] : vector<2x8x8xf32> to vector<2x8xf32>
    %28 = vector.shape_cast %27 : vector<2x8xf32> to vector<2x8x1xf32>
    %29 = tpu.reciprocal %28 : vector<2x8x1xf32> -> vector<2x8x1xf32>
    %30 = vector.broadcast %29 : vector<2x8x1xf32> to vector<2x8x8xf32>
    %31 = arith.mulf %26, %30 : vector<2x8x8xf32>
    %cst_15 = arith.constant dense<0.000000e+00> : vector<2x8x8xf32>
    %32 = tpu.matmul %31, %18, %cst_15 {dimension_numbers = #tpu.dot_dimension_numbers<[2], [1], [1], [2], [0, 0, 0, 1, 1, 2], [0], [0]>, precision = #tpu.contract_precision<fp32>} : vector<2x8x8xf32>, vector<2x8x8xf32>, vector<2x8x8xf32> -> vector<2x8x8xf32>
    %33 = vector.extract_strided_slice %11 {offsets = [0, 0, 8], sizes = [2, 8, 8], strides = [1, 1, 1]} : vector<2x8x32xf32> to vector<2x8x8xf32>
    %34 = vector.extract_strided_slice %13 {offsets = [0, 0, 8], sizes = [2, 8, 8], strides = [1, 1, 1]} : vector<2x8x32xf32> to vector<2x8x8xf32>
    %35 = vector.extract_strided_slice %15 {offsets = [0, 0, 8], sizes = [2, 8, 8], strides = [1, 1, 1]} : vector<2x8x32xf32> to vector<2x8x8xf32>
    %cst_16 = arith.constant dense<0.000000e+00> : vector<2x8x8xf32>
    %36 = tpu.matmul %33, %34, %cst_16 {dimension_numbers = #tpu.dot_dimension_numbers<[2], [2], [1], [1], [0, 0, 0, 1, 1, 1], [0], [0]>, precision = #tpu.contract_precision<fp32>} : vector<2x8x8xf32>, vector<2x8x8xf32>, vector<2x8x8xf32> -> vector<2x8x8xf32>
    %cst_17 = arith.constant 0.353553385 : f32
    %37 = vector.broadcast %cst_17 : f32 to vector<2x8x8xf32>
    %38 = arith.mulf %36, %37 : vector<2x8x8xf32>
    %cst_18 = arith.constant dense<0xFF800000> : vector<2x8xf32>
    %39 = vector.multi_reduction <maximumf>, %38, %cst_18 [2] : vector<2x8x8xf32> to vector<2x8xf32>
    %40 = vector.shape_cast %39 : vector<2x8xf32> to vector<2x8x1xf32>
    %41 = vector.broadcast %40 : vector<2x8x1xf32> to vector<2x8x8xf32>
    %42 = arith.subf %38, %41 : vector<2x8x8xf32>
    %43 = math.exp %42 : vector<2x8x8xf32>
    %cst_19 = arith.constant dense<0.000000e+00> : vector<2x8xf32>
    %44 = vector.multi_reduction <add>, %43, %cst_19 [2] : vector<2x8x8xf32> to vector<2x8xf32>
    %45 = vector.shape_cast %44 : vector<2x8xf32> to vector<2x8x1xf32>
    %46 = tpu.reciprocal %45 : vector<2x8x1xf32> -> vector<2x8x1xf32>
    %47 = vector.broadcast %46 : vector<2x8x1xf32> to vector<2x8x8xf32>
    %48 = arith.mulf %43, %47 : vector<2x8x8xf32>
    %cst_20 = arith.constant dense<0.000000e+00> : vector<2x8x8xf32>
    %49 = tpu.matmul %48, %35, %cst_20 {dimension_numbers = #tpu.dot_dimension_numbers<[2], [1], [1], [2], [0, 0, 0, 1, 1, 2], [0], [0]>, precision = #tpu.contract_precision<fp32>} : vector<2x8x8xf32>, vector<2x8x8xf32>, vector<2x8x8xf32> -> vector<2x8x8xf32>
    %50 = vector.extract_strided_slice %11 {offsets = [0, 0, 16], sizes = [2, 8, 8], strides = [1, 1, 1]} : vector<2x8x32xf32> to vector<2x8x8xf32>
    %51 = vector.extract_strided_slice %13 {offsets = [0, 0, 16], sizes = [2, 8, 8], strides = [1, 1, 1]} : vector<2x8x32xf32> to vector<2x8x8xf32>
    %52 = vector.extract_strided_slice %15 {offsets = [0, 0, 16], sizes = [2, 8, 8], strides = [1, 1, 1]} : vector<2x8x32xf32> to vector<2x8x8xf32>
    %cst_21 = arith.constant dense<0.000000e+00> : vector<2x8x8xf32>
    %53 = tpu.matmul %50, %51, %cst_21 {dimension_numbers = #tpu.dot_dimension_numbers<[2], [2], [1], [1], [0, 0, 0, 1, 1, 1], [0], [0]>, precision = #tpu.contract_precision<fp32>} : vector<2x8x8xf32>, vector<2x8x8xf32>, vector<2x8x8xf32> -> vector<2x8x8xf32>
    %cst_22 = arith.constant 0.353553385 : f32
    %54 = vector.broadcast %cst_22 : f32 to vector<2x8x8xf32>
    %55 = arith.mulf %53, %54 : vector<2x8x8xf32>
    %cst_23 = arith.constant dense<0xFF800000> : vector<2x8xf32>
    %56 = vector.multi_reduction <maximumf>, %55, %cst_23 [2] : vector<2x8x8xf32> to vector<2x8xf32>
    %57 = vector.shape_cast %56 : vector<2x8xf32> to vector<2x8x1xf32>
    %58 = vector.broadcast %57 : vector<2x8x1xf32> to vector<2x8x8xf32>
    %59 = arith.subf %55, %58 : vector<2x8x8xf32>
    %60 = math.exp %59 : vector<2x8x8xf32>
    %cst_24 = arith.constant dense<0.000000e+00> : vector<2x8xf32>
    %61 = vector.multi_reduction <add>, %60, %cst_24 [2] : vector<2x8x8xf32> to vector<2x8xf32>
    %62 = vector.shape_cast %61 : vector<2x8xf32> to vector<2x8x1xf32>
    %63 = tpu.reciprocal %62 : vector<2x8x1xf32> -> vector<2x8x1xf32>
    %64 = vector.broadcast %63 : vector<2x8x1xf32> to vector<2x8x8xf32>
    %65 = arith.mulf %60, %64 : vector<2x8x8xf32>
    %cst_25 = arith.constant dense<0.000000e+00> : vector<2x8x8xf32>
    %66 = tpu.matmul %65, %52, %cst_25 {dimension_numbers = #tpu.dot_dimension_numbers<[2], [1], [1], [2], [0, 0, 0, 1, 1, 2], [0], [0]>, precision = #tpu.contract_precision<fp32>} : vector<2x8x8xf32>, vector<2x8x8xf32>, vector<2x8x8xf32> -> vector<2x8x8xf32>
    %67 = vector.extract_strided_slice %11 {offsets = [0, 0, 24], sizes = [2, 8, 8], strides = [1, 1, 1]} : vector<2x8x32xf32> to vector<2x8x8xf32>
    %68 = vector.extract_strided_slice %13 {offsets = [0, 0, 24], sizes = [2, 8, 8], strides = [1, 1, 1]} : vector<2x8x32xf32> to vector<2x8x8xf32>
    %69 = vector.extract_strided_slice %15 {offsets = [0, 0, 24], sizes = [2, 8, 8], strides = [1, 1, 1]} : vector<2x8x32xf32> to vector<2x8x8xf32>
    %cst_26 = arith.constant dense<0.000000e+00> : vector<2x8x8xf32>
    %70 = tpu.matmul %67, %68, %cst_26 {dimension_numbers = #tpu.dot_dimension_numbers<[2], [2], [1], [1], [0, 0, 0, 1, 1, 1], [0], [0]>, precision = #tpu.contract_precision<fp32>} : vector<2x8x8xf32>, vector<2x8x8xf32>, vector<2x8x8xf32> -> vector<2x8x8xf32>
    %cst_27 = arith.constant 0.353553385 : f32
    %71 = vector.broadcast %cst_27 : f32 to vector<2x8x8xf32>
    %72 = arith.mulf %70, %71 : vector<2x8x8xf32>
    %cst_28 = arith.constant dense<0xFF800000> : vector<2x8xf32>
    %73 = vector.multi_reduction <maximumf>, %72, %cst_28 [2] : vector<2x8x8xf32> to vector<2x8xf32>
    %74 = vector.shape_cast %73 : vector<2x8xf32> to vector<2x8x1xf32>
    %75 = vector.broadcast %74 : vector<2x8x1xf32> to vector<2x8x8xf32>
    %76 = arith.subf %72, %75 : vector<2x8x8xf32>
    %77 = math.exp %76 : vector<2x8x8xf32>
    %cst_29 = arith.constant dense<0.000000e+00> : vector<2x8xf32>
    %78 = vector.multi_reduction <add>, %77, %cst_29 [2] : vector<2x8x8xf32> to vector<2x8xf32>
    %79 = vector.shape_cast %78 : vector<2x8xf32> to vector<2x8x1xf32>
    %80 = tpu.reciprocal %79 : vector<2x8x1xf32> -> vector<2x8x1xf32>
    %81 = vector.broadcast %80 : vector<2x8x1xf32> to vector<2x8x8xf32>
    %82 = arith.mulf %77, %81 : vector<2x8x8xf32>
    %cst_30 = arith.constant dense<0.000000e+00> : vector<2x8x8xf32>
    %83 = tpu.matmul %82, %69, %cst_30 {dimension_numbers = #tpu.dot_dimension_numbers<[2], [1], [1], [2], [0, 0, 0, 1, 1, 2], [0], [0]>, precision = #tpu.contract_precision<fp32>} : vector<2x8x8xf32>, vector<2x8x8xf32>, vector<2x8x8xf32> -> vector<2x8x8xf32>
    %84 = tpu.concatenate %32, %49, %66, %83 in 2 : vector<2x8x8xf32>, vector<2x8x8xf32>, vector<2x8x8xf32>, vector<2x8x8xf32> -> vector<2x8x32xf32>
    %85 = vector.shape_cast %84 : vector<2x8x32xf32> to vector<16x32xf32>
    %c0_31 = arith.constant 0 : index
    %c0_32 = arith.constant 0 : index
    %86 = vector.load %arg4[%c0_31, %c0_32] : memref<32x32xf32, #tpu.memory_space<vmem>>, vector<32x32xf32>
    %cst_33 = arith.constant dense<0.000000e+00> : vector<16x32xf32>
    %87 = tpu.matmul %85, %86, %cst_33 {dimension_numbers = #tpu.dot_dimension_numbers<[1], [0], [0], [1], [0, 0, 1, 1], [], []>, precision = #tpu.contract_precision<fp32>} : vector<16x32xf32>, vector<32x32xf32>, vector<16x32xf32> -> vector<16x32xf32>
    %c0_34 = arith.constant 0 : index
    %c0_35 = arith.constant 0 : index
    %88 = vector.load %arg5[%c0_34, %c0_35] : memref<1x32xf32, #tpu.memory_space<vmem>>, vector<1x32xf32>
    %89 = vector.broadcast %88 : vector<1x32xf32> to vector<16x32xf32>
    %90 = arith.addf %87, %89 : vector<16x32xf32>
    %91 = vector.shape_cast %90 : vector<16x32xf32> to vector<2x8x32xf32>
    %cst_36 = arith.constant dense<0.000000e+00> : vector<2x8xf32>
    %92 = vector.multi_reduction <add>, %91, %cst_36 [2] : vector<2x8x32xf32> to vector<2x8xf32>
    %93 = vector.shape_cast %92 : vector<2x8xf32> to vector<2x8x1xf32>
    %cst_37 = arith.constant 3.200000e+01 : f32
    %94 = vector.broadcast %cst_37 : f32 to vector<2x8x1xf32>
    %95 = arith.divf %93, %94 : vector<2x8x1xf32>
    %96 = vector.broadcast %95 : vector<2x8x1xf32> to vector<2x8x32xf32>
    %97 = arith.subf %91, %96 : vector<2x8x32xf32>
    %98 = arith.mulf %97, %97 : vector<2x8x32xf32>
    %cst_38 = arith.constant dense<0.000000e+00> : vector<2x8xf32>
    %99 = vector.multi_reduction <add>, %98, %cst_38 [2] : vector<2x8x32xf32> to vector<2x8xf32>
    %100 = vector.shape_cast %99 : vector<2x8xf32> to vector<2x8x1xf32>
    %cst_39 = arith.constant 0.0322580636 : f32
    %101 = vector.broadcast %cst_39 : f32 to vector<2x8x1xf32>
    %102 = arith.mulf %100, %101 : vector<2x8x1xf32>
    %103 = math.sqrt %102 : vector<2x8x1xf32>
    %cst_40 = arith.constant 9.99999997E-7 : f32
    %104 = vector.broadcast %cst_40 : f32 to vector<2x8x1xf32>
    %105 = arith.addf %103, %104 : vector<2x8x1xf32>
    %106 = math.sqrt %105 : vector<2x8x1xf32>
    %107 = tpu.reciprocal %106 : vector<2x8x1xf32> -> vector<2x8x1xf32>
    %108 = vector.broadcast %95 : vector<2x8x1xf32> to vector<2x8x32xf32>
    %109 = arith.subf %91, %108 : vector<2x8x32xf32>
    %110 = vector.broadcast %107 : vector<2x8x1xf32> to vector<2x8x32xf32>
    %111 = arith.mulf %109, %110 : vector<2x8x32xf32>
    %112 = vector.broadcast %3 : f32 to vector<2x8x32xf32>
    %113 = arith.mulf %111, %112 : vector<2x8x32xf32>
    %114 = arith.addf %0, %113 : vector<2x8x32xf32>
    %115 = vector.broadcast %2 : f32 to vector<2x8x32xf32>
    %116 = arith.addf %114, %115 : vector<2x8x32xf32>
    %117 = vector.shape_cast %116 : vector<2x8x32xf32> to vector<16x32xf32>
    %118 = vector.shape_cast %1 : vector<2x8x32xf32> to vector<16x32xf32>
    %c0_41 = arith.constant 0 : index
    %c0_42 = arith.constant 0 : index
    %119 = vector.load %arg6[%c0_41, %c0_42] : memref<32x32xf32, #tpu.memory_space<vmem>>, vector<32x32xf32>
    %cst_43 = arith.constant dense<0.000000e+00> : vector<16x32xf32>
    %120 = tpu.matmul %117, %119, %cst_43 {dimension_numbers = #tpu.dot_dimension_numbers<[1], [0], [0], [1], [0, 0, 1, 1], [], []>, precision = #tpu.contract_precision<fp32>} : vector<16x32xf32>, vector<32x32xf32>, vector<16x32xf32> -> vector<16x32xf32>
    %c0_44 = arith.constant 0 : index
    %c0_45 = arith.constant 0 : index
    %121 = vector.load %arg7[%c0_44, %c0_45] : memref<1x32xf32, #tpu.memory_space<vmem>>, vector<1x32xf32>
    %122 = vector.broadcast %121 : vector<1x32xf32> to vector<16x32xf32>
    %123 = arith.addf %120, %122 : vector<16x32xf32>
    %124 = vector.shape_cast %123 : vector<16x32xf32> to vector<2x8x32xf32>
    %c0_46 = arith.constant 0 : index
    %c0_47 = arith.constant 0 : index
    %125 = vector.load %arg8[%c0_46, %c0_47] : memref<32x64xf32, #tpu.memory_space<vmem>>, vector<32x64xf32>
    %cst_48 = arith.constant dense<0.000000e+00> : vector<16x64xf32>
    %126 = tpu.matmul %118, %125, %cst_48 {dimension_numbers = #tpu.dot_dimension_numbers<[1], [0], [0], [1], [0, 0, 1, 1], [], []>, precision = #tpu.contract_precision<fp32>} : vector<16x32xf32>, vector<32x64xf32>, vector<16x64xf32> -> vector<16x64xf32>
    %c0_49 = arith.constant 0 : index
    %c0_50 = arith.constant 0 : index
    %127 = vector.load %arg9[%c0_49, %c0_50] : memref<1x64xf32, #tpu.memory_space<vmem>>, vector<1x64xf32>
    %128 = vector.broadcast %127 : vector<1x64xf32> to vector<16x64xf32>
    %129 = arith.addf %126, %128 : vector<16x64xf32>
    %130 = vector.extract_strided_slice %129 {offsets = [0, 0], sizes = [16, 32], strides = [1, 1]} : vector<16x64xf32> to vector<16x32xf32>
    %131 = vector.shape_cast %130 : vector<16x32xf32> to vector<2x8x32xf32>
    %132 = vector.extract_strided_slice %129 {offsets = [0, 32], sizes = [16, 32], strides = [1, 1]} : vector<16x64xf32> to vector<16x32xf32>
    %133 = vector.shape_cast %132 : vector<16x32xf32> to vector<2x8x32xf32>
    %134 = vector.extract_strided_slice %124 {offsets = [0, 0, 0], sizes = [2, 8, 8], strides = [1, 1, 1]} : vector<2x8x32xf32> to vector<2x8x8xf32>
    %135 = vector.extract_strided_slice %131 {offsets = [0, 0, 0], sizes = [2, 8, 8], strides = [1, 1, 1]} : vector<2x8x32xf32> to vector<2x8x8xf32>
    %136 = vector.extract_strided_slice %133 {offsets = [0, 0, 0], sizes = [2, 8, 8], strides = [1, 1, 1]} : vector<2x8x32xf32> to vector<2x8x8xf32>
    %cst_51 = arith.constant dense<0.000000e+00> : vector<2x8x8xf32>
    %137 = tpu.matmul %134, %135, %cst_51 {dimension_numbers = #tpu.dot_dimension_numbers<[2], [2], [1], [1], [0, 0, 0, 1, 1, 1], [0], [0]>, precision = #tpu.contract_precision<fp32>} : vector<2x8x8xf32>, vector<2x8x8xf32>, vector<2x8x8xf32> -> vector<2x8x8xf32>
    %cst_52 = arith.constant 0.353553385 : f32
    %138 = vector.broadcast %cst_52 : f32 to vector<2x8x8xf32>
    %139 = arith.mulf %137, %138 : vector<2x8x8xf32>
    %cst_53 = arith.constant dense<0xFF800000> : vector<2x8xf32>
    %140 = vector.multi_reduction <maximumf>, %139, %cst_53 [2] : vector<2x8x8xf32> to vector<2x8xf32>
    %141 = vector.shape_cast %140 : vector<2x8xf32> to vector<2x8x1xf32>
    %142 = vector.broadcast %141 : vector<2x8x1xf32> to vector<2x8x8xf32>
    %143 = arith.subf %139, %142 : vector<2x8x8xf32>
    %144 = math.exp %143 : vector<2x8x8xf32>
    %cst_54 = arith.constant dense<0.000000e+00> : vector<2x8xf32>
    %145 = vector.multi_reduction <add>, %144, %cst_54 [2] : vector<2x8x8xf32> to vector<2x8xf32>
    %146 = vector.shape_cast %145 : vector<2x8xf32> to vector<2x8x1xf32>
    %147 = tpu.reciprocal %146 : vector<2x8x1xf32> -> vector<2x8x1xf32>
    %148 = vector.broadcast %147 : vector<2x8x1xf32> to vector<2x8x8xf32>
    %149 = arith.mulf %144, %148 : vector<2x8x8xf32>
    %cst_55 = arith.constant dense<0.000000e+00> : vector<2x8x8xf32>
    %150 = tpu.matmul %149, %136, %cst_55 {dimension_numbers = #tpu.dot_dimension_numbers<[2], [1], [1], [2], [0, 0, 0, 1, 1, 2], [0], [0]>, precision = #tpu.contract_precision<fp32>} : vector<2x8x8xf32>, vector<2x8x8xf32>, vector<2x8x8xf32> -> vector<2x8x8xf32>
    %151 = vector.extract_strided_slice %124 {offsets = [0, 0, 8], sizes = [2, 8, 8], strides = [1, 1, 1]} : vector<2x8x32xf32> to vector<2x8x8xf32>
    %152 = vector.extract_strided_slice %131 {offsets = [0, 0, 8], sizes = [2, 8, 8], strides = [1, 1, 1]} : vector<2x8x32xf32> to vector<2x8x8xf32>
    %153 = vector.extract_strided_slice %133 {offsets = [0, 0, 8], sizes = [2, 8, 8], strides = [1, 1, 1]} : vector<2x8x32xf32> to vector<2x8x8xf32>
    %cst_56 = arith.constant dense<0.000000e+00> : vector<2x8x8xf32>
    %154 = tpu.matmul %151, %152, %cst_56 {dimension_numbers = #tpu.dot_dimension_numbers<[2], [2], [1], [1], [0, 0, 0, 1, 1, 1], [0], [0]>, precision = #tpu.contract_precision<fp32>} : vector<2x8x8xf32>, vector<2x8x8xf32>, vector<2x8x8xf32> -> vector<2x8x8xf32>
    %cst_57 = arith.constant 0.353553385 : f32
    %155 = vector.broadcast %cst_57 : f32 to vector<2x8x8xf32>
    %156 = arith.mulf %154, %155 : vector<2x8x8xf32>
    %cst_58 = arith.constant dense<0xFF800000> : vector<2x8xf32>
    %157 = vector.multi_reduction <maximumf>, %156, %cst_58 [2] : vector<2x8x8xf32> to vector<2x8xf32>
    %158 = vector.shape_cast %157 : vector<2x8xf32> to vector<2x8x1xf32>
    %159 = vector.broadcast %158 : vector<2x8x1xf32> to vector<2x8x8xf32>
    %160 = arith.subf %156, %159 : vector<2x8x8xf32>
    %161 = math.exp %160 : vector<2x8x8xf32>
    %cst_59 = arith.constant dense<0.000000e+00> : vector<2x8xf32>
    %162 = vector.multi_reduction <add>, %161, %cst_59 [2] : vector<2x8x8xf32> to vector<2x8xf32>
    %163 = vector.shape_cast %162 : vector<2x8xf32> to vector<2x8x1xf32>
    %164 = tpu.reciprocal %163 : vector<2x8x1xf32> -> vector<2x8x1xf32>
    %165 = vector.broadcast %164 : vector<2x8x1xf32> to vector<2x8x8xf32>
    %166 = arith.mulf %161, %165 : vector<2x8x8xf32>
    %cst_60 = arith.constant dense<0.000000e+00> : vector<2x8x8xf32>
    %167 = tpu.matmul %166, %153, %cst_60 {dimension_numbers = #tpu.dot_dimension_numbers<[2], [1], [1], [2], [0, 0, 0, 1, 1, 2], [0], [0]>, precision = #tpu.contract_precision<fp32>} : vector<2x8x8xf32>, vector<2x8x8xf32>, vector<2x8x8xf32> -> vector<2x8x8xf32>
    %168 = vector.extract_strided_slice %124 {offsets = [0, 0, 16], sizes = [2, 8, 8], strides = [1, 1, 1]} : vector<2x8x32xf32> to vector<2x8x8xf32>
    %169 = vector.extract_strided_slice %131 {offsets = [0, 0, 16], sizes = [2, 8, 8], strides = [1, 1, 1]} : vector<2x8x32xf32> to vector<2x8x8xf32>
    %170 = vector.extract_strided_slice %133 {offsets = [0, 0, 16], sizes = [2, 8, 8], strides = [1, 1, 1]} : vector<2x8x32xf32> to vector<2x8x8xf32>
    %cst_61 = arith.constant dense<0.000000e+00> : vector<2x8x8xf32>
    %171 = tpu.matmul %168, %169, %cst_61 {dimension_numbers = #tpu.dot_dimension_numbers<[2], [2], [1], [1], [0, 0, 0, 1, 1, 1], [0], [0]>, precision = #tpu.contract_precision<fp32>} : vector<2x8x8xf32>, vector<2x8x8xf32>, vector<2x8x8xf32> -> vector<2x8x8xf32>
    %cst_62 = arith.constant 0.353553385 : f32
    %172 = vector.broadcast %cst_62 : f32 to vector<2x8x8xf32>
    %173 = arith.mulf %171, %172 : vector<2x8x8xf32>
    %cst_63 = arith.constant dense<0xFF800000> : vector<2x8xf32>
    %174 = vector.multi_reduction <maximumf>, %173, %cst_63 [2] : vector<2x8x8xf32> to vector<2x8xf32>
    %175 = vector.shape_cast %174 : vector<2x8xf32> to vector<2x8x1xf32>
    %176 = vector.broadcast %175 : vector<2x8x1xf32> to vector<2x8x8xf32>
    %177 = arith.subf %173, %176 : vector<2x8x8xf32>
    %178 = math.exp %177 : vector<2x8x8xf32>
    %cst_64 = arith.constant dense<0.000000e+00> : vector<2x8xf32>
    %179 = vector.multi_reduction <add>, %178, %cst_64 [2] : vector<2x8x8xf32> to vector<2x8xf32>
    %180 = vector.shape_cast %179 : vector<2x8xf32> to vector<2x8x1xf32>
    %181 = tpu.reciprocal %180 : vector<2x8x1xf32> -> vector<2x8x1xf32>
    %182 = vector.broadcast %181 : vector<2x8x1xf32> to vector<2x8x8xf32>
    %183 = arith.mulf %178, %182 : vector<2x8x8xf32>
    %cst_65 = arith.constant dense<0.000000e+00> : vector<2x8x8xf32>
    %184 = tpu.matmul %183, %170, %cst_65 {dimension_numbers = #tpu.dot_dimension_numbers<[2], [1], [1], [2], [0, 0, 0, 1, 1, 2], [0], [0]>, precision = #tpu.contract_precision<fp32>} : vector<2x8x8xf32>, vector<2x8x8xf32>, vector<2x8x8xf32> -> vector<2x8x8xf32>
    %185 = vector.extract_strided_slice %124 {offsets = [0, 0, 24], sizes = [2, 8, 8], strides = [1, 1, 1]} : vector<2x8x32xf32> to vector<2x8x8xf32>
    %186 = vector.extract_strided_slice %131 {offsets = [0, 0, 24], sizes = [2, 8, 8], strides = [1, 1, 1]} : vector<2x8x32xf32> to vector<2x8x8xf32>
    %187 = vector.extract_strided_slice %133 {offsets = [0, 0, 24], sizes = [2, 8, 8], strides = [1, 1, 1]} : vector<2x8x32xf32> to vector<2x8x8xf32>
    %cst_66 = arith.constant dense<0.000000e+00> : vector<2x8x8xf32>
    %188 = tpu.matmul %185, %186, %cst_66 {dimension_numbers = #tpu.dot_dimension_numbers<[2], [2], [1], [1], [0, 0, 0, 1, 1, 1], [0], [0]>, precision = #tpu.contract_precision<fp32>} : vector<2x8x8xf32>, vector<2x8x8xf32>, vector<2x8x8xf32> -> vector<2x8x8xf32>
    %cst_67 = arith.constant 0.353553385 : f32
    %189 = vector.broadcast %cst_67 : f32 to vector<2x8x8xf32>
    %190 = arith.mulf %188, %189 : vector<2x8x8xf32>
    %cst_68 = arith.constant dense<0xFF800000> : vector<2x8xf32>
    %191 = vector.multi_reduction <maximumf>, %190, %cst_68 [2] : vector<2x8x8xf32> to vector<2x8xf32>
    %192 = vector.shape_cast %191 : vector<2x8xf32> to vector<2x8x1xf32>
    %193 = vector.broadcast %192 : vector<2x8x1xf32> to vector<2x8x8xf32>
    %194 = arith.subf %190, %193 : vector<2x8x8xf32>
    %195 = math.exp %194 : vector<2x8x8xf32>
    %cst_69 = arith.constant dense<0.000000e+00> : vector<2x8xf32>
    %196 = vector.multi_reduction <add>, %195, %cst_69 [2] : vector<2x8x8xf32> to vector<2x8xf32>
    %197 = vector.shape_cast %196 : vector<2x8xf32> to vector<2x8x1xf32>
    %198 = tpu.reciprocal %197 : vector<2x8x1xf32> -> vector<2x8x1xf32>
    %199 = vector.broadcast %198 : vector<2x8x1xf32> to vector<2x8x8xf32>
    %200 = arith.mulf %195, %199 : vector<2x8x8xf32>
    %cst_70 = arith.constant dense<0.000000e+00> : vector<2x8x8xf32>
    %201 = tpu.matmul %200, %187, %cst_70 {dimension_numbers = #tpu.dot_dimension_numbers<[2], [1], [1], [2], [0, 0, 0, 1, 1, 2], [0], [0]>, precision = #tpu.contract_precision<fp32>} : vector<2x8x8xf32>, vector<2x8x8xf32>, vector<2x8x8xf32> -> vector<2x8x8xf32>
    %202 = tpu.concatenate %150, %167, %184, %201 in 2 : vector<2x8x8xf32>, vector<2x8x8xf32>, vector<2x8x8xf32>, vector<2x8x8xf32> -> vector<2x8x32xf32>
    %203 = vector.shape_cast %202 : vector<2x8x32xf32> to vector<16x32xf32>
    %c0_71 = arith.constant 0 : index
    %c0_72 = arith.constant 0 : index
    %204 = vector.load %arg10[%c0_71, %c0_72] : memref<32x32xf32, #tpu.memory_space<vmem>>, vector<32x32xf32>
    %cst_73 = arith.constant dense<0.000000e+00> : vector<16x32xf32>
    %205 = tpu.matmul %203, %204, %cst_73 {dimension_numbers = #tpu.dot_dimension_numbers<[1], [0], [0], [1], [0, 0, 1, 1], [], []>, precision = #tpu.contract_precision<fp32>} : vector<16x32xf32>, vector<32x32xf32>, vector<16x32xf32> -> vector<16x32xf32>
    %c0_74 = arith.constant 0 : index
    %c0_75 = arith.constant 0 : index
    %206 = vector.load %arg11[%c0_74, %c0_75] : memref<1x32xf32, #tpu.memory_space<vmem>>, vector<1x32xf32>
    %207 = vector.broadcast %206 : vector<1x32xf32> to vector<16x32xf32>
    %208 = arith.addf %205, %207 : vector<16x32xf32>
    %209 = vector.shape_cast %208 : vector<16x32xf32> to vector<2x8x32xf32>
    %cst_76 = arith.constant dense<0.000000e+00> : vector<2x8xf32>
    %210 = vector.multi_reduction <add>, %209, %cst_76 [2] : vector<2x8x32xf32> to vector<2x8xf32>
    %211 = vector.shape_cast %210 : vector<2x8xf32> to vector<2x8x1xf32>
    %cst_77 = arith.constant 3.200000e+01 : f32
    %212 = vector.broadcast %cst_77 : f32 to vector<2x8x1xf32>
    %213 = arith.divf %211, %212 : vector<2x8x1xf32>
    %214 = vector.broadcast %213 : vector<2x8x1xf32> to vector<2x8x32xf32>
    %215 = arith.subf %209, %214 : vector<2x8x32xf32>
    %216 = arith.mulf %215, %215 : vector<2x8x32xf32>
    %cst_78 = arith.constant dense<0.000000e+00> : vector<2x8xf32>
    %217 = vector.multi_reduction <add>, %216, %cst_78 [2] : vector<2x8x32xf32> to vector<2x8xf32>
    %218 = vector.shape_cast %217 : vector<2x8xf32> to vector<2x8x1xf32>
    %cst_79 = arith.constant 0.0322580636 : f32
    %219 = vector.broadcast %cst_79 : f32 to vector<2x8x1xf32>
    %220 = arith.mulf %218, %219 : vector<2x8x1xf32>
    %221 = math.sqrt %220 : vector<2x8x1xf32>
    %cst_80 = arith.constant 9.99999997E-7 : f32
    %222 = vector.broadcast %cst_80 : f32 to vector<2x8x1xf32>
    %223 = arith.addf %221, %222 : vector<2x8x1xf32>
    %224 = math.sqrt %223 : vector<2x8x1xf32>
    %225 = tpu.reciprocal %224 : vector<2x8x1xf32> -> vector<2x8x1xf32>
    %226 = vector.broadcast %213 : vector<2x8x1xf32> to vector<2x8x32xf32>
    %227 = arith.subf %209, %226 : vector<2x8x32xf32>
    %228 = vector.broadcast %225 : vector<2x8x1xf32> to vector<2x8x32xf32>
    %229 = arith.mulf %227, %228 : vector<2x8x32xf32>
    %230 = vector.broadcast %3 : f32 to vector<2x8x32xf32>
    %231 = arith.mulf %229, %230 : vector<2x8x32xf32>
    %232 = arith.addf %116, %231 : vector<2x8x32xf32>
    %233 = vector.broadcast %2 : f32 to vector<2x8x32xf32>
    %234 = arith.addf %232, %233 : vector<2x8x32xf32>
    %235 = vector.shape_cast %234 : vector<2x8x32xf32> to vector<16x32xf32>
    %c0_81 = arith.constant 0 : index
    %c0_82 = arith.constant 0 : index
    %236 = vector.load %arg12[%c0_81, %c0_82] : memref<32x64xf32, #tpu.memory_space<vmem>>, vector<32x64xf32>
    %cst_83 = arith.constant dense<0.000000e+00> : vector<16x64xf32>
    %237 = tpu.matmul %235, %236, %cst_83 {dimension_numbers = #tpu.dot_dimension_numbers<[1], [0], [0], [1], [0, 0, 1, 1], [], []>, precision = #tpu.contract_precision<fp32>} : vector<16x32xf32>, vector<32x64xf32>, vector<16x64xf32> -> vector<16x64xf32>
    %c0_84 = arith.constant 0 : index
    %c0_85 = arith.constant 0 : index
    %238 = vector.load %arg13[%c0_84, %c0_85] : memref<1x64xf32, #tpu.memory_space<vmem>>, vector<1x64xf32>
    %239 = vector.broadcast %238 : vector<1x64xf32> to vector<16x64xf32>
    %240 = arith.addf %237, %239 : vector<16x64xf32>
    %c0_86 = arith.constant 0 : index
    %c0_87 = arith.constant 0 : index
    %241 = vector.load %arg14[%c0_86, %c0_87] : memref<64x32xf32, #tpu.memory_space<vmem>>, vector<64x32xf32>
    %cst_88 = arith.constant dense<0.000000e+00> : vector<16x32xf32>
    %242 = tpu.matmul %240, %241, %cst_88 {dimension_numbers = #tpu.dot_dimension_numbers<[1], [0], [0], [1], [0, 0, 1, 1], [], []>, precision = #tpu.contract_precision<fp32>} : vector<16x64xf32>, vector<64x32xf32>, vector<16x32xf32> -> vector<16x32xf32>
    %c0_89 = arith.constant 0 : index
    %c0_90 = arith.constant 0 : index
    %243 = vector.load %arg15[%c0_89, %c0_90] : memref<1x32xf32, #tpu.memory_space<vmem>>, vector<1x32xf32>
    %244 = vector.broadcast %243 : vector<1x32xf32> to vector<16x32xf32>
    %245 = arith.addf %242, %244 : vector<16x32xf32>
    %246 = vector.shape_cast %245 : vector<16x32xf32> to vector<2x8x32xf32>
    %cst_91 = arith.constant dense<0.000000e+00> : vector<2x8xf32>
    %247 = vector.multi_reduction <add>, %246, %cst_91 [2] : vector<2x8x32xf32> to vector<2x8xf32>
    %248 = vector.shape_cast %247 : vector<2x8xf32> to vector<2x8x1xf32>
    %cst_92 = arith.constant 3.200000e+01 : f32
    %249 = vector.broadcast %cst_92 : f32 to vector<2x8x1xf32>
    %250 = arith.divf %248, %249 : vector<2x8x1xf32>
    %251 = vector.broadcast %250 : vector<2x8x1xf32> to vector<2x8x32xf32>
    %252 = arith.subf %246, %251 : vector<2x8x32xf32>
    %253 = arith.mulf %252, %252 : vector<2x8x32xf32>
    %cst_93 = arith.constant dense<0.000000e+00> : vector<2x8xf32>
    %254 = vector.multi_reduction <add>, %253, %cst_93 [2] : vector<2x8x32xf32> to vector<2x8xf32>
    %255 = vector.shape_cast %254 : vector<2x8xf32> to vector<2x8x1xf32>
    %cst_94 = arith.constant 0.0322580636 : f32
    %256 = vector.broadcast %cst_94 : f32 to vector<2x8x1xf32>
    %257 = arith.mulf %255, %256 : vector<2x8x1xf32>
    %258 = math.sqrt %257 : vector<2x8x1xf32>
    %cst_95 = arith.constant 9.99999997E-7 : f32
    %259 = vector.broadcast %cst_95 : f32 to vector<2x8x1xf32>
    %260 = arith.addf %258, %259 : vector<2x8x1xf32>
    %261 = math.sqrt %260 : vector<2x8x1xf32>
    %262 = tpu.reciprocal %261 : vector<2x8x1xf32> -> vector<2x8x1xf32>
    %263 = vector.broadcast %250 : vector<2x8x1xf32> to vector<2x8x32xf32>
    %264 = arith.subf %246, %263 : vector<2x8x32xf32>
    %265 = vector.broadcast %262 : vector<2x8x1xf32> to vector<2x8x32xf32>
    %266 = arith.mulf %264, %265 : vector<2x8x32xf32>
    %267 = vector.broadcast %3 : f32 to vector<2x8x32xf32>
    %268 = arith.mulf %266, %267 : vector<2x8x32xf32>
    %269 = arith.addf %234, %268 : vector<2x8x32xf32>
    %270 = vector.broadcast %2 : f32 to vector<2x8x32xf32>
    %271 = arith.addf %269, %270 : vector<2x8x32xf32>
    %c0_96 = arith.constant 0 : index
    %c0_97 = arith.constant 0 : index
    %c0_98 = arith.constant 0 : index
    %272 = vector.load %arg18[%c0_96, %c0_97, %c0_98] : memref<2x8x32xf32, #tpu.memory_space<vmem>>, vector<2x8x32xf32>
    tpu.vector_store %arg18[%c0_96, %c0_97, %c0_98], %271 {strides = array<i32>} : memref<2x8x32xf32, #tpu.memory_space<vmem>>, vector<2x8x32xf32>,
    return
  }
}

</mosaic_0001>

<bundles_post_ra>
// kernel: tpu_custom_call.1
= control target key start
LH: loop header
LB: loop body
LE: loop exit
PB: predicated region body
PF: predicated region fallthrough
CT: control target
= control target key end

     0   :  { %s23767_s0 = inlined_call_operand.hbm [shape: f32[2,8,32], index: 0, kind: input, shape index: {}]   ;;  %s23768_s1 = inlined_call_operand.hbm [shape: f32[2,8,32], index: 1, kind: input, shape index: {}]   ;;  %s23769_s2 = inlined_call_operand.vmem [shape: f32[32,96], index: 2, kind: input, shape index: {}]   ;;  %s23770_s3 = inlined_call_operand.vmem [shape: f32[1,96], index: 3, kind: input, shape index: {}]   ;;  %s23771_s4 = inlined_call_operand.vmem [shape: f32[32,32], index: 4, kind: input, shape index: {}]   ;;  %s23772_s5 = inlined_call_operand.vmem [shape: f32[1,32], index: 5, kind: input, shape index: {}]   ;;  %s23773_s6 = inlined_call_operand.vmem [shape: f32[32,32], index: 6, kind: input, shape index: {}]   ;;  %s23774_s7 = inlined_call_operand.vmem [shape: f32[1,32], index: 7, kind: input, shape index: {}]   ;;  %s23775_s8 = inlined_call_operand.hbm [shape: f32[32,64], index: 8, kind: input, shape index: {}]   ;;  %s23776_s9 = inlined_call_operand.vmem [shape: f32[1,64], index: 9, kind: input, shape index: {}]   ;;  %s23777_s10 = inlined_call_operand.hbm [shape: f32[32,32], index: 10, kind: input, shape index: {}]   ;;  %s23778_s11 = inlined_call_operand.vmem [shape: f32[1,32], index: 11, kind: input, shape index: {}]   ;;  %s23779_s12 = inlined_call_operand.hbm [shape: f32[32,64], index: 12, kind: input, shape index: {}]   ;;  %s23780_s13 = inlined_call_operand.vmem [shape: f32[1,64], index: 13, kind: input, shape index: {}]   ;;  %s23781_s14 = inlined_call_operand.vmem [shape: f32[64,32], index: 14, kind: input, shape index: {}]   ;;  %s23782_s15 = inlined_call_operand.vmem [shape: f32[1,32], index: 15, kind: input, shape index: {}]   ;;  %s23783_s16 = inlined_call_operand.<no memory space> [shape: f32[1], index: 16, kind: input, shape index: {}]   ;;  %s23784_s17 = inlined_call_operand.<no memory space> [shape: f32[1], index: 17, kind: input, shape index: {}]   ;;  %s23785_s18 = inlined_call_operand.hbm [shape: f32[2,8,32], index: 18, kind: output, shape index: {}]  }
   0x1   :  { %23790 = sst [smem:[#allocation18_spill]] %s23767_s0 }
   0x2   :  { %23791 = sst [smem:[#allocation19_spill]] %s23768_s1 }
   0x3   :  { %23792 = sst [smem:[#allocation20_spill]] %s23769_s2 }
   0x4   :  { %23793 = sst [smem:[#allocation21_spill]] %s23782_s15 }
   0x5   :  { %23794 = sst [smem:[#allocation22_spill]] %s23785_s18 }
   0x6   :  { %25 = vsyncpa [#allocation5], 0 }
   0x7   :  { %26 = vsyncpa [#allocation8], 0 }
   0x8   :  { %27 = vsyncpa [#allocation11], 0 }
   0x9   :  { %28 = vsyncpa [#allocation6], 0  ;;  %s22148_s27 = smov [#allocation7]   ;;  %s22149_s29 = smov [#allocation10]  }
   0xa   :  { %s46_s28 = sshll.u32 %s22148_s27, 4  ;;  %s84_s30 = sshll.u32 %s22149_s29, 4  ;;  %s47_s28 = int_to_ptr.vmem [resolvable:$true] %s46_s28  ;;  %s22266_s30 = int_to_ptr.vmem [resolvable:$true] %s84_s30 }
   0xb   :  { %s23795_s1 = sld [smem:[#allocation19_spill]] }
  0x11   :  { %s22008_s20 = scalar_lea.hbm %s23795_s1, 256 }
  0x12   :  { %p22009_p0 = scmp.ne.s32.totalorder %s23795_s1, %s22008_s20  ;;  %p22012_p1 = scmp.lt.u32.totalorder %s22008_s20, %s23795_s1 }
  0x14   :  { %p22014_p2 = pnand %p22012_p1, %p22009_p0 }
  0x16   :  { %22017 = shalt.err (!%p22014_p2)
}
  0x17   :  { %s22018_s24 = scalar_lea.vmem %s47_s28, 256  ;;  %p22023_p4 = scmp.lt.s32.totalorder %s47_s28, %s47_s28 }
  0x18   :  { %p22019_p3 = scmp.ne.s32.totalorder %s47_s28, %s22018_s24  ;;  %p22024_p5 = scmp.lt.s32.totalorder %s22018_s24, %s22018_s24 }
  0x1a   :  { %p22025_p6 = por %p22024_p5, %p22023_p4 }
  0x1c   :  { %p22026_p7 = pnand %p22025_p6, %p22019_p3 }
  0x1e   :  { %22029 = shalt.err (!%p22026_p7)
}
  0x1f   :  { %s22150_s25 = smov 128   ;;  %s22151_s26 = smov 8  }
  0x20   :  { %52 = dma.hbm_to_vmem [thread:$0]  %s23795_s1, 256, %s47_s28, [#allocation8], %s22150_s25, %s22150_s25, %s22151_s26  }
  0x21   :  { %s22030_s20 = scalar_lea.hbm %s23777_s10, 512 }
  0x22   :  { %p22031_p8 = scmp.ne.s32.totalorder %s23777_s10, %s22030_s20  ;;  %p22034_p9 = scmp.lt.u32.totalorder %s22030_s20, %s23777_s10 }
  0x24   :  { %p22036_p10 = pnand %p22034_p9, %p22031_p8 }
  0x26   :  { %22039 = shalt.err (!%p22036_p10)
}
  0x27   :  { %s22040_s24 = scalar_lea.vmem %s22266_s30, 512  ;;  %p22045_p12 = scmp.lt.s32.totalorder %s22266_s30, %s22266_s30 }
  0x28   :  { %p22041_p11 = scmp.ne.s32.totalorder %s22266_s30, %s22040_s24  ;;  %p22046_p13 = scmp.lt.s32.totalorder %s22040_s24, %s22040_s24 }
  0x2a   :  { %p22047_p0 = por %p22046_p13, %p22045_p12 }
  0x2c   :  { %p22048_p1 = pnand %p22047_p0, %p22041_p11 }
  0x2e   :  { %22051 = shalt.err (!%p22048_p1)
}
  0x2f   :  { %90 = dma.hbm_to_vmem [thread:$0]  %s23777_s10, 512, %s22266_s30, [#allocation11], %s22150_s25, %s22150_s25, %s22151_s26  }
  0x30   :  { %s22152_s27 = smov [#allocation4]   ;;  %s22153_s0 = smov [#allocation9]  }
  0x31   :  { %s34_s29 = sshll.u32 %s22152_s27, 4  ;;  %s70_s19 = sshll.u32 %s22153_s0, 4  ;;  %s35_s29 = int_to_ptr.vmem [resolvable:$true] %s34_s29  ;;  %s22303_s19 = int_to_ptr.vmem [resolvable:$true] %s70_s19 }
  0x32   :  { %s23796_s22 = sld [smem:[#allocation18_spill]] }
  0x38   :  { %s22052_s2 = scalar_lea.hbm %s23796_s22, 256 }
  0x39   :  { %p22053_p2 = scmp.ne.s32.totalorder %s23796_s22, %s22052_s2  ;;  %p22056_p3 = scmp.lt.u32.totalorder %s22052_s2, %s23796_s22 }
  0x3b   :  { %p22058_p4 = pnand %p22056_p3, %p22053_p2 }
  0x3d   :  { %22061 = shalt.err (!%p22058_p4)
}
  0x3e   :  { %s22062_s10 = scalar_lea.vmem %s35_s29, 256  ;;  %p22067_p6 = scmp.lt.s32.totalorder %s35_s29, %s35_s29 }
  0x3f   :  { %p22063_p5 = scmp.ne.s32.totalorder %s35_s29, %s22062_s10  ;;  %p22068_p7 = scmp.lt.s32.totalorder %s22062_s10, %s22062_s10 }
  0x41   :  { %p22069_p8 = por %p22068_p7, %p22067_p6 }
  0x43   :  { %p22070_p9 = pnand %p22069_p8, %p22063_p5 }
  0x45   :  { %22073 = shalt.err (!%p22070_p9)
}
  0x46   :  { %40 = dma.hbm_to_vmem [thread:$0]  %s23796_s22, 256, %s35_s29, [#allocation5], %s22150_s25, %s22150_s25, %s22151_s26  }
  0x47   :  { %s22074_s15 = scalar_lea.hbm %s23775_s8, 512 }
  0x48   :  { %p22075_p10 = scmp.ne.s32.totalorder %s23775_s8, %s22074_s15  ;;  %p22078_p11 = scmp.lt.u32.totalorder %s22074_s15, %s23775_s8 }
  0x4a   :  { %p22080_p12 = pnand %p22078_p11, %p22075_p10 }
  0x4c   :  { %22083 = shalt.err (!%p22080_p12)
}
  0x4d   :  { %s22084_s2 = scalar_lea.vmem %s22303_s19, 512  ;;  %p22089_p0 = scmp.lt.s32.totalorder %s22303_s19, %s22303_s19 }
  0x4e   :  { %p22085_p13 = scmp.ne.s32.totalorder %s22303_s19, %s22084_s2  ;;  %p22090_p1 = scmp.lt.s32.totalorder %s22084_s2, %s22084_s2 }
  0x50   :  { %p22091_p2 = por %p22090_p1, %p22089_p0 }
  0x52   :  { %p22092_p3 = pnand %p22091_p2, %p22085_p13 }
  0x54   :  { %22095 = shalt.err (!%p22092_p3)
}
  0x55   :  { %76 = dma.hbm_to_vmem [thread:$0]  %s23775_s8, 512, %s22303_s19, [#allocation8], %s22150_s25, %s22150_s25, %s22151_s26  }
  0x56   :  { %s22154_s23 = smov [#allocation12]   ;;  %s22096_s28 = scalar_lea.hbm %s23779_s12, 512 }
  0x57   :  { %s98_s24 = sshll.u32 %s22154_s23, 4  ;;  %p22097_p4 = scmp.ne.s32.totalorder %s23779_s12, %s22096_s28  ;;  %s99_s24 = int_to_ptr.vmem [resolvable:$true] %s98_s24 }
  0x58   :  { %p22100_p5 = scmp.lt.u32.totalorder %s22096_s28, %s23779_s12 }
  0x5a   :  { %p22102_p6 = pnand %p22100_p5, %p22097_p4 }
  0x5c   :  { %22105 = shalt.err (!%p22102_p6)
}
  0x5d   :  { %s22106_s0 = scalar_lea.vmem %s99_s24, 512  ;;  %p22111_p8 = scmp.lt.s32.totalorder %s99_s24, %s99_s24 }
  0x5e   :  { %p22107_p7 = scmp.ne.s32.totalorder %s99_s24, %s22106_s0  ;;  %p22112_p9 = scmp.lt.s32.totalorder %s22106_s0, %s22106_s0 }
  0x60   :  { %p22113_p10 = por %p22112_p9, %p22111_p8 }
  0x62   :  { %p22114_p11 = pnand %p22113_p10, %p22107_p7 }
  0x64   :  { %22117 = shalt.err (!%p22114_p11)
}
  0x65   :  { %104 = dma.hbm_to_vmem [thread:$0]  %s23779_s12, 512, %s99_s24, [#allocation11], %s22150_s25, %s22150_s25, %s22151_s26  }
  0x66   :  { %22140 = dma.done.wait [#allocation5], 256  }
  0x67   :  { %22141 = vsyncadd [#allocation5], 4294967040 }
  0x68   :  { %22142 = dma.done.wait [#allocation8], 768  }
  0x69   :  { %22143 = vsyncadd [#allocation8], 4294966528 }
  0x6a   :  { %22144 = dma.done.wait [#allocation11], 1024  }
  0x6b   :  { %22145 = vsyncadd [#allocation11], 4294966272  ;;  %vm147_vm0 = vcmask 261120   ;;  %s23797_s2 = sld [smem:[#allocation20_spill]]  ;;  %v130_v7 = vld [vmem:[#allocation4] sm:$0xff]  ;;  %v131_v8 = vld [vmem:[#allocation4 + $0x8] sm:$0xff] }
  0x6c   :  { %v149_v10 = vsel %vm147_vm0, %v130_v7, 0  ;;  %v152_v11 = vsel %vm147_vm0, %v131_v8, 0  ;;  %v22155_v46 = vmov 0.0   ;;  %vm22156_vm1 = vmmov 0   ;;  %v18958_v47 = vld [vmem:[%s23770_s3] ss:$0 sm:$0xff] }
  0x6d   :  { %v22371_v13 = vand.u32 4294901760, %v149_v10  ;;  %v22373_v14 = vand.u32 4294901760, %v152_v11  ;;  %19691 = vmatprep.subr.mxu1 %v22155_v46  ;;  %19693 = vmatprep.mubr.msk.f32.mxu1 %vm22156_vm1, %v22155_v46  ;;  %s22157_s1 = smov 96   ;;  %vm685_vm2 = vcmask 64512   ;;  %s22158_s3 = smov 64   ;;  %vm8054_vm3 = vcmask 195584  }
  0x6e   :  { %s22159_s27 = smov 88   ;;  %s22160_s15 = smov 120   ;;  %vm8051_vm4 = vcmask 130048  }
  0x6f   :  { %v224_v20 = vsub.f32 %v149_v10, %v22371_v13  ;;  %v234_v21 = vsub.f32 %v152_v11, %v22373_v14  ;;  %s22161_s18 = smov 56   ;;  %s22162_s0 = smov 80  }
  0x70   :  { %s22163_s8 = smov 112   ;;  %s22164_s19 = smov 48  }
  0x71   :  { %v136_v0 = vld [vmem:[%s23797_s2] sm:$0xff]  ;;  %v137_v1 = vld [vmem:[%s23797_s2 + $0x8] sm:$0xff]  ;;  %v138_v2 = vld [vmem:[%s23797_s2 + $0x10] sm:$0xff]  ;;  %v225_v26 = vand.u32 4294901760, %v224_v20  ;;  %v235_v27 = vand.u32 4294901760, %v234_v21  ;;  %s22165_s20 = smov 104  }
  0x72   :  { %v155_v3 = vand.u32 4294901760, %v136_v0  ;;  %v158_v4 = vand.u32 4294901760, %v137_v1  ;;  %v139_v5 = vld [vmem:[%s23797_s2 + $0x18] sm:$0xff]  ;;  %v161_v6 = vand.u32 4294901760, %v138_v2  ;;  %s22166_s21 = smov 72   ;;  %s22167_s2 = smov 40  }
  0x73   :  { %v164_v9 = vand.u32 4294901760, %v139_v5  ;;  %v226_v32 = vsub.f32 %v224_v20, %v225_v26  ;;  %v236_v33 = vsub.f32 %v234_v21, %v235_v27  ;;  %s22168_s29 = smov 16   ;;  %s22169_s22 = smov 24  }
  0x74   :  { %v22369_v12 = vpack.c.bf16 %v158_v4, %v155_v3  ;;  %v245_v15 = vsub.f32 %v136_v0, %v155_v3  ;;  %v252_v17 = vsub.f32 %v137_v1, %v158_v4  ;;  %v259_v18 = vsub.f32 %v138_v2, %v161_v6 }
  0x75   :  { %v22375_v16 = vpack.c.bf16 %v164_v9, %v161_v6  ;;  %v266_v19 = vsub.f32 %v139_v5, %v164_v9  ;;  %v227_v38 = vand.u32 4294901760, %v226_v32  ;;  %v237_v39 = vand.u32 4294901760, %v236_v33 }
  0x76   :  { %21096 = vmatprep.subr.bf16.mxu0 %v22369_v12  ;;  %v246_v22 = vand.u32 4294901760, %v245_v15  ;;  %v253_v23 = vand.u32 4294901760, %v252_v17  ;;  %v260_v24 = vand.u32 4294901760, %v259_v18  ;;  %v21111_v42 = vpack.c.bf16 %v252_v17, %v245_v15 }
  0x77   :  { %21098 = vmatpush3.bf16.msra.mxu0 %v22369_v12  ;;  %v267_v25 = vand.u32 4294901760, %v266_v19  ;;  %19633 = vmatprep.mubr.f32.mxu0 %v227_v38  ;;  %v21115_v43 = vpack.c.bf16 %v266_v19, %v259_v18 }
  0x78   :  { %21100 = vmatprep.subr.bf16.mxu0 %v22375_v16  ;;  %v247_v28 = vsub.f32 %v245_v15, %v246_v22  ;;  %v254_v29 = vsub.f32 %v252_v17, %v253_v23  ;;  %v261_v30 = vsub.f32 %v259_v18, %v260_v24  ;;  %v21127_v44 = vpack.c.bf16 %v253_v23, %v246_v22 }
  0x79   :  { %v268_v31 = vsub.f32 %v266_v19, %v267_v25  ;;  %v21131_v45 = vpack.c.bf16 %v267_v25, %v260_v24 }
  0x7a   :  { %v248_v34 = vand.u32 4294901760, %v247_v28  ;;  %v255_v35 = vand.u32 4294901760, %v254_v29  ;;  %v262_v36 = vand.u32 4294901760, %v261_v30 }
  0x7b   :  { %21102 = vmatpush3.bf16.msra.mxu0 %v22375_v16  ;;  %v269_v37 = vand.u32 4294901760, %v268_v31 }
  0x7c   :  { %v21103_v40 = vpack.c.bf16 %v255_v35, %v248_v34 }
  0x7d   :  { %v21107_v41 = vpack.c.bf16 %v269_v37, %v262_v36 }
  0x7e   :  { %19634 = vmatmul.mubr.f32.vlgmr.msra.gmra.mrb[0].mxu0 %v237_v39  ;;  %21104 = vmatprep.subr.bf16.mxu0 %v21103_v40 }
  0x7f   :  { %21106 = vmatpush3.bf16.msra.mxu0 %v21103_v40  ;;  %19644 = vmatprep.mubr.f32.mxu0 %v22371_v13 }
  0x80   :  { %21108 = vmatprep.subr.bf16.mxu0 %v21107_v41 }
  0x83   :  { %21110 = vmatpush3.bf16.msra.mxu0 %v21107_v41 }
  0x84   :  { %21112 = vmatprep.subr.bf16.mxu0 %v21111_v42 }
  0x86   :  { %19645 = vmatmul.mubr.f32.vlgmr.msra.gmra.mrb[0].mxu0 %v22373_v14 }
  0x87   :  { %21114 = vmatpush3.bf16.msra.mxu0 %v21111_v42  ;;  %19655 = vmatprep.mubr.f32.mxu0 %v224_v20 }
  0x88   :  { %21116 = vmatprep.subr.bf16.mxu0 %v21115_v43 }
  0x8b   :  { %21118 = vmatpush3.bf16.msra.mxu0 %v21115_v43 }
  0x8c   :  { %21120 = vmatprep.subr.bf16.mxu0 %v22369_v12 }
  0x8e   :  { %19656 = vmatmul.mubr.f32.vlgmr.msra.gmra.mrb[0].mxu0 %v234_v21 }
  0x8f   :  { %21122 = vmatpush3.bf16.msra.mxu0 %v22369_v12  ;;  %19666 = vmatprep.mubr.f32.mxu0 %v225_v26 }
  0x90   :  { %21124 = vmatprep.subr.bf16.mxu0 %v22375_v16 }
  0x93   :  { %21126 = vmatpush3.bf16.msra.mxu0 %v22375_v16 }
  0x94   :  { %21128 = vmatprep.subr.bf16.mxu0 %v21127_v44 }
  0x96   :  { %19667 = vmatmul.mubr.f32.vlgmr.msra.gmra.mrb[0].mxu0 %v235_v27 }
  0x97   :  { %21130 = vmatpush3.bf16.msra.mxu0 %v21127_v44  ;;  %19677 = vmatprep.mubr.f32.mxu0 %v22371_v13 }
  0x98   :  { %21132 = vmatprep.subr.bf16.mxu0 %v21131_v45 }
  0x9b   :  { %21134 = vmatpush3.bf16.msra.mxu0 %v21131_v45 }
  0x9c   :  { %21136 = vmatprep.subr.bf16.mxu0 %v22369_v12 }
  0x9e   :  { %19678 = vmatmul.mubr.f32.vlgmr.msra.gmra.mrb[0].mxu0 %v22373_v14 }
  0x9f   :  { %21138 = vmatpush3.bf16.msra.mxu0 %v22369_v12  ;;  %19688 = vmatprep.mubr.f32.mxu0 %v22371_v13 }
  0xa0   :  { %21140 = vmatprep.subr.bf16.mxu0 %v22375_v16 }
  0xa3   :  { %21142 = vmatpush3.bf16.msra.mxu0 %v22375_v16 }
  0xa4   :  { %19751 = vmatprep.subr.mxu0 %v22155_v46 }
  0xa6   :  { %19689 = vmatmul.mubr.f32.vlgmr.msra.gmra.mrb[0].mxu0 %v22373_v14 }
  0xa7   :  { %19753 = vmatprep.mubr.msk.f32.mxu0 %vm22156_vm1, %v22155_v46 }
 0x179   :  { %v19690_v48 = vpop.f32.mrb[0].mxu0 }
 0x17a   :  { %v672_v49 = vpop.f32.mrb[1].mxu0  ;;  %v22410_v51 = vadd.f32 %v19690_v48, %v18958_v47 }
 0x17b   :  { %v22406_v50 = vadd.f32 %v18958_v47, %v672_v49 }
 0x17c   :  { %v1139_v2 = vsel %vm685_vm2, %v22410_v51, 0 }
 0x17d   :  { %683 = vrot.lane.b32.xlu0 %v22406_v50, %s22157_s1  ;;  %v686_v52 = vsel %vm685_vm2, %v22406_v50, 0  ;;  %v1209_v4 = vand.u32 4294901760, %v1139_v2 }
 0x17e   :  { %v756_v53 = vand.u32 4294901760, %v686_v52 }
 0x17f   :  { %v1210_v6 = vsub.f32 %v1139_v2, %v1209_v4 }
 0x180   :  { %v757_v54 = vsub.f32 %v686_v52, %v756_v53 }
 0x181   :  { %1137 = vrot.lane.b32.xlu0 %v22410_v51, %s22157_s1  ;;  %v1211_v8 = vand.u32 4294901760, %v1210_v6 }
 0x182   :  { %v758_v55 = vand.u32 4294901760, %v757_v54 }
 0x183   :  { %v1212_v10 = vsub.f32 %v1210_v6, %v1211_v8 }
 0x184   :  { %v759_v58 = vsub.f32 %v757_v54, %v758_v55 }
 0x185   :  { %v1213_v12 = vand.u32 4294901760, %v1212_v10 }
 0x186   :  { %v760_v61 = vand.u32 4294901760, %v759_v58 }
 0x1ef   :  { %v684_v56 = vpop.permute.xlu0 %683 }
 0x1f0   :  { %v688_v57 = vsel %vm685_vm2, %v684_v56, 0 }
 0x1f1   :  { %v691_v59 = vand.u32 4294901760, %v688_v57 }
 0x1f3   :  { %v768_v60 = vsub.f32 %v688_v57, %v691_v59  ;;  %19692 = vmatpush3.xpose.msra.mxu1 %v691_v59  ;;  %v1138_v1 = vpop.permute.xlu0 %1137 }
 0x1f4   :  { %19696 = vmatprep.subr.mxu1 %v22155_v46  ;;  %v1141_v3 = vsel %vm685_vm2, %v1138_v1, 0 }
 0x1f5   :  { %v769_v62 = vand.u32 4294901760, %v768_v60  ;;  %v1144_v5 = vand.u32 4294901760, %v1141_v3 }
 0x1f6   :  { %19694 = vmatmul.mubr.f32.vlgmr.msra.gmra.mrb[0].mxu1 %v760_v61 }
 0x1f7   :  { %v770_v63 = vsub.f32 %v768_v60, %v769_v62  ;;  %19698 = vmatprep.mubr.msk.f32.mxu1 %vm22156_vm1, %v22155_v46  ;;  %v1221_v7 = vsub.f32 %v1141_v3, %v1144_v5 }
 0x1f9   :  { %v771_v0 = vand.u32 4294901760, %v770_v63  ;;  %v1222_v9 = vand.u32 4294901760, %v1221_v7 }
 0x1fb   :  { %19697 = vmatpush3.xpose.msra.mxu1 %v771_v0  ;;  %v1223_v11 = vsub.f32 %v1221_v7, %v1222_v9 }
 0x1fc   :  { %19701 = vmatprep.subr.mxu1 %v22155_v46 }
 0x1fd   :  { %v1224_v13 = vand.u32 4294901760, %v1223_v11 }
 0x1fe   :  { %19699 = vmatmul.mubr.f32.vlgmr.msra.gmra.mrb[0].mxu1 %v756_v53 }
 0x1ff   :  { %19702 = vmatpush3.xpose.msra.mxu1 %v768_v60  ;;  %19703 = vmatprep.mubr.msk.f32.mxu1 %vm22156_vm1, %v22155_v46 }
 0x200   :  { %19706 = vmatprep.subr.mxu1 %v22155_v46 }
 0x206   :  { %19704 = vmatmul.mubr.f32.vlgmr.msra.gmra.mrb[0].mxu1 %v757_v54 }
 0x207   :  { %19707 = vmatpush3.xpose.msra.mxu1 %v691_v59  ;;  %19708 = vmatprep.mubr.msk.f32.mxu1 %vm22156_vm1, %v22155_v46 }
 0x208   :  { %19711 = vmatprep.subr.mxu1 %v22155_v46 }
 0x20e   :  { %19709 = vmatmul.mubr.f32.vlgmr.msra.gmra.mrb[0].mxu1 %v758_v55 }
 0x20f   :  { %19712 = vmatpush3.xpose.msra.mxu1 %v769_v62  ;;  %19713 = vmatprep.mubr.msk.f32.mxu1 %vm22156_vm1, %v22155_v46 }
 0x210   :  { %19716 = vmatprep.subr.mxu1 %v22155_v46 }
 0x216   :  { %19714 = vmatmul.mubr.f32.vlgmr.msra.gmra.mrb[0].mxu1 %v756_v53 }
 0x217   :  { %19717 = vmatpush3.xpose.msra.mxu1 %v691_v59  ;;  %19718 = vmatprep.mubr.msk.f32.mxu1 %vm22156_vm1, %v22155_v46 }
 0x218   :  { %19721 = vmatprep.subr.mxu1 %v22155_v46 }
 0x21e   :  { %19719 = vmatmul.mubr.f32.vlgmr.msra.gmra.mrb[0].mxu1 %v756_v53 }
 0x21f   :  { %19722 = vmatpush3.xpose.msra.mxu1 %v1144_v5  ;;  %19723 = vmatprep.mubr.msk.f32.mxu1 %vm22156_vm1, %v22155_v46 }
 0x220   :  { %19726 = vmatprep.subr.mxu1 %v22155_v46 }
 0x222   :  { %19724 = vmatmul.mubr.f32.vlgmr.msra.gmra.mrb[2].mxu1 %v1213_v12 }
 0x223   :  { %19727 = vmatpush3.xpose.msra.mxu1 %v1224_v13  ;;  %19728 = vmatprep.mubr.msk.f32.mxu1 %vm22156_vm1, %v22155_v46 }
 0x224   :  { %19731 = vmatprep.subr.mxu1 %v22155_v46 }
 0x22a   :  { %19729 = vmatmul.mubr.f32.vlgmr.msra.gmra.mrb[2].mxu1 %v1209_v4 }
 0x22b   :  { %19732 = vmatpush3.xpose.msra.mxu1 %v1221_v7  ;;  %19733 = vmatprep.mubr.msk.f32.mxu1 %vm22156_vm1, %v22155_v46 }
 0x22c   :  { %19736 = vmatprep.subr.mxu1 %v22155_v46 }
 0x232   :  { %19734 = vmatmul.mubr.f32.vlgmr.msra.gmra.mrb[2].mxu1 %v1210_v6 }
 0x233   :  { %19737 = vmatpush3.xpose.msra.mxu1 %v1144_v5  ;;  %19738 = vmatprep.mubr.msk.f32.mxu1 %vm22156_vm1, %v22155_v46 }
 0x234   :  { %19741 = vmatprep.subr.mxu1 %v22155_v46 }
 0x23a   :  { %19739 = vmatmul.mubr.f32.vlgmr.msra.gmra.mrb[2].mxu1 %v1211_v8 }
 0x23b   :  { %19742 = vmatpush3.xpose.msra.mxu1 %v1222_v9  ;;  %19743 = vmatprep.mubr.msk.f32.mxu1 %vm22156_vm1, %v22155_v46 }
 0x23c   :  { %19746 = vmatprep.subr.mxu1 %v22155_v46 }
 0x242   :  { %19744 = vmatmul.mubr.f32.vlgmr.msra.gmra.mrb[2].mxu1 %v1209_v4 }
 0x243   :  { %19747 = vmatpush3.xpose.msra.mxu1 %v1144_v5  ;;  %19748 = vmatprep.mubr.msk.f32.mxu1 %vm22156_vm1, %v22155_v46 }
 0x244   :  { %19781 = vmatprep.subr.mxu1 %v22155_v46 }
 0x24a   :  { %19749 = vmatmul.mubr.f32.vlgmr.msra.gmra.mrb[2].mxu1 %v1209_v4 }
 0x24b   :  { %19783 = vmatprep.mubr.msk.f32.mxu1 %vm22156_vm1, %v22155_v46 }
 0x2f1   :  { %v1132_v14 = vpop.f32.mrb[0].mxu1 }
 0x2f2   :  { %v1589_v15 = vmul.f32 0.35355338, %v1132_v14  ;;  %v19720_v16 = vpop.f32.mrb[1].mxu1 }
 0x2f4   :  { %v1591_v17 = vsel %vm685_vm2, %v1589_v15, -inf }
 0x2f5   :  { %1592 = vmax.xlane.f32.xlu1 %v1591_v17 }
 0x31d   :  { %v1585_v18 = vpop.f32.mrb[2].mxu1 }
 0x31e   :  { %v1590_v19 = vmul.f32 0.35355338, %v1585_v18  ;;  %v19750_v20 = vpop.f32.mrb[3].mxu1 }
 0x320   :  { %v1594_v21 = vsel %vm685_vm2, %v1590_v19, -inf }
 0x321   :  { %1595 = vmax.xlane.f32.xlu1 %v1594_v21 }
 0x332   :  { %1613 = vrot.lane.b32.xlu1 %v22406_v50, %s22158_s3 }
 0x382   :  { %v1593_v22 = vpop.xlane.xlu1 %1592 }
 0x383   :  { %v1597_v23 = vsub.f32 %v1589_v15, %v1593_v22 }
 0x385   :  { %v1599_v24 = vmul.f32 1.442695, %v1597_v23 }
 0x387   :  { %21906 = vpow2.f32 %v1599_v24 }
 0x391   :  { %v21907_v25 = vpop.eup %21906 }
 0x392   :  { %v1603_v26 = vsel %vm685_vm2, %v21907_v25, 0.0 }
 0x393   :  { %1604 = vadd.xlane.f32.xlu0 %v1603_v26 }
 0x3a9   :  { %2519 = vrot.lane.b32.xlu0 %v22406_v50, %s22159_s27 }
 0x3ae   :  { %v1596_v27 = vpop.xlane.xlu1 %1595 }
 0x3af   :  { %v1598_v28 = vsub.f32 %v1590_v19, %v1596_v27 }
 0x3b1   :  { %v1601_v29 = vmul.f32 1.442695, %v1598_v28 }
 0x3b2   :  { %v1614_v30 = vpop.permute.xlu1 %1613 }
 0x3b3   :  { %21908 = vpow2.f32 %v1601_v29  ;;  %v1620_v31 = vand.u32 4294901760, %v1614_v30 }
 0x3b5   :  { %19752 = vmatpush3.msra.mxu0 %v1620_v31  ;;  %v1697_v36 = vsub.f32 %v1614_v30, %v1620_v31 }
 0x3b6   :  { %19756 = vmatprep.subr.mxu0 %v22155_v46 }
 0x3b7   :  { %v1698_v40 = vand.u32 4294901760, %v1697_v36 }
 0x3b9   :  { %v1699_v43 = vsub.f32 %v1697_v36, %v1698_v40 }
 0x3bb   :  { %v1700_v47 = vand.u32 4294901760, %v1699_v43 }
 0x3bd   :  { %v21909_v32 = vpop.eup %21908 }
 0x3be   :  { %v1606_v33 = vsel %vm685_vm2, %v21909_v32, 0.0 }
 0x3bf   :  { %1607 = vadd.xlane.f32.xlu1 %v1606_v33 }
 0x3d0   :  { %2065 = vrot.lane.b32.xlu1 %v22410_v51, %s22158_s3  ;;  %s23798_s3 = sld [smem:[#allocation21_spill]] }
 0x3d4   :  { %2517 = vrot.lane.b32.xlu1 %v22406_v50, %s22160_s15 }
 0x3d8   :  { %2971 = vrot.lane.b32.xlu1 %v22410_v51, %s22160_s15 }
 0x3dc   :  { %2973 = vrot.lane.b32.xlu1 %v22410_v51, %s22159_s27 }
 0x420   :  { %v1605_v34 = vpop.xlane.xlu0 %1604 }
 0x421   :  { %21910 = vrcp.f32 %v1605_v34 }
 0x424   :  { %v2520_v49 = vpop.permute.xlu0 %2519 }
 0x425   :  { %v2523_v53 = vsel %vm685_vm2, %v2520_v49, 0 }
 0x426   :  { %v22488_v55 = vand.u32 4294901760, %v2523_v53 }
 0x428   :  { %v2603_v60 = vsub.f32 %v2523_v53, %v22488_v55 }
 0x42a   :  { %v2604_v3 = vand.u32 4294901760, %v2603_v60 }
 0x42b   :  { %v21911_v35 = vpop.eup %21910 }
 0x42c   :  { %v1611_v37 = vmul.f32 %v21911_v35, %v21907_v25  ;;  %v2605_v8 = vsub.f32 %v2603_v60, %v2604_v3 }
 0x42e   :  { %v1617_v38 = vsel %vm685_vm2, %v1611_v37, 0  ;;  %v2606_v13 = vand.u32 4294901760, %v2605_v8 }
 0x42f   :  { %v1685_v39 = vand.u32 4294901760, %v1617_v38 }
 0x431   :  { %v1686_v41 = vsub.f32 %v1617_v38, %v1685_v39 }
 0x433   :  { %v1687_v42 = vand.u32 4294901760, %v1686_v41 }
 0x435   :  { %v1688_v44 = vsub.f32 %v1686_v41, %v1687_v42 }
 0x437   :  { %v1689_v45 = vand.u32 4294901760, %v1688_v44 }
 0x439   :  { %19754 = vmatmul.mubr.f32.vlgmr.msra.gmra.mrb[2].mxu0 %v1689_v45 }
 0x43a   :  { %19757 = vmatpush3.msra.mxu0 %v1700_v47  ;;  %19758 = vmatprep.mubr.msk.f32.mxu0 %vm22156_vm1, %v22155_v46 }
 0x43b   :  { %19761 = vmatprep.subr.mxu0 %v22155_v46 }
 0x441   :  { %19759 = vmatmul.mubr.f32.vlgmr.msra.gmra.mrb[2].mxu0 %v1685_v39 }
 0x442   :  { %19762 = vmatpush3.msra.mxu0 %v1697_v36  ;;  %19763 = vmatprep.mubr.msk.f32.mxu0 %vm22156_vm1, %v22155_v46 }
 0x443   :  { %19766 = vmatprep.subr.mxu0 %v22155_v46 }
 0x449   :  { %19764 = vmatmul.mubr.f32.vlgmr.msra.gmra.mrb[2].mxu0 %v1686_v41 }
 0x44a   :  { %19767 = vmatpush3.msra.mxu0 %v1620_v31  ;;  %19768 = vmatprep.mubr.msk.f32.mxu0 %vm22156_vm1, %v22155_v46 }
 0x44b   :  { %19771 = vmatprep.subr.mxu0 %v22155_v46 }
 0x44c   :  { %v1608_v48 = vpop.xlane.xlu1 %1607 }
 0x44d   :  { %21912 = vrcp.f32 %v1608_v48 }
 0x450   :  { %v2066_v52 = vpop.permute.xlu1 %2065 }
 0x451   :  { %v22482_v54 = vand.u32 4294901760, %v2066_v52  ;;  %19769 = vmatmul.mubr.f32.vlgmr.msra.gmra.mrb[2].mxu0 %v1687_v42 }
 0x452   :  { %19772 = vmatpush3.msra.mxu0 %v1698_v40  ;;  %19773 = vmatprep.mubr.msk.f32.mxu0 %vm22156_vm1, %v22155_v46 }
 0x453   :  { %19782 = vmatpush3.msra.mxu1 %v22482_v54  ;;  %19776 = vmatprep.subr.mxu0 %v22155_v46  ;;  %v2149_v62 = vsub.f32 %v2066_v52, %v22482_v54 }
 0x454   :  { %v2518_v56 = vpop.permute.xlu1 %2517  ;;  %19786 = vmatprep.subr.mxu1 %v22155_v46 }
 0x455   :  { %v2521_v57 = vsel %vm685_vm2, %v2518_v56, 0  ;;  %v2150_v4 = vand.u32 4294901760, %v2149_v62 }
 0x456   :  { %v22492_v58 = vand.u32 4294901760, %v2521_v57 }
 0x457   :  { %v21913_v59 = vpop.eup %21912  ;;  %v2151_v9 = vsub.f32 %v2149_v62, %v2150_v4 }
 0x458   :  { %v1612_v61 = vmul.f32 %v21913_v59, %v21909_v32  ;;  %v2592_v63 = vsub.f32 %v2521_v57, %v22492_v58  ;;  %v2972_v15 = vpop.permute.xlu1 %2971 }
 0x459   :  { %19774 = vmatmul.mubr.f32.vlgmr.msra.gmra.mrb[2].mxu0 %v1685_v39  ;;  %v2152_v14 = vand.u32 4294901760, %v2151_v9  ;;  %v2975_v17 = vsel %vm685_vm2, %v2972_v15, 0 }
 0x45a   :  { %19777 = vmatpush3.msra.mxu0 %v1620_v31  ;;  %19778 = vmatprep.mubr.msk.f32.mxu0 %vm22156_vm1, %v22155_v46  ;;  %v2069_v0 = vsel %vm685_vm2, %v1612_v61, 0  ;;  %v2593_v1 = vand.u32 4294901760, %v2592_v63  ;;  %v3045_v19 = vand.u32 4294901760, %v2975_v17 }
 0x45b   :  { %19811 = vmatprep.subr.mxu0 %v22155_v46  ;;  %v22501_v2 = vand.u32 4294901760, %v2069_v0 }
 0x45c   :  { %v2594_v6 = vsub.f32 %v2592_v63, %v2593_v1  ;;  %v2974_v16 = vpop.permute.xlu1 %2973  ;;  %v3046_v21 = vsub.f32 %v2975_v17, %v3045_v19 }
 0x45d   :  { %v2138_v5 = vsub.f32 %v2069_v0, %v22501_v2  ;;  %v2977_v18 = vsel %vm685_vm2, %v2974_v16, 0 }
 0x45e   :  { %v2595_v11 = vand.u32 4294901760, %v2594_v6  ;;  %v2980_v20 = vand.u32 4294901760, %v2977_v18  ;;  %v3047_v23 = vand.u32 4294901760, %v3046_v21 }
 0x45f   :  { %v2139_v7 = vand.u32 4294901760, %v2138_v5 }
 0x460   :  { %v3057_v22 = vsub.f32 %v2977_v18, %v2980_v20  ;;  %v3048_v25 = vsub.f32 %v3046_v21, %v3047_v23 }
 0x461   :  { %19779 = vmatmul.mubr.f32.vlgmr.msra.gmra.mrb[2].mxu0 %v1685_v39  ;;  %v2140_v10 = vsub.f32 %v2138_v5, %v2139_v7 }
 0x462   :  { %19812 = vmatpush3.xpose.msra.mxu0 %v22488_v55  ;;  %19813 = vmatprep.mubr.msk.f32.mxu0 %vm22156_vm1, %v22155_v46  ;;  %v3058_v24 = vand.u32 4294901760, %v3057_v22  ;;  %v3049_v27 = vand.u32 4294901760, %v3048_v25 }
 0x463   :  { %19816 = vmatprep.subr.mxu0 %v22155_v46  ;;  %v2141_v12 = vand.u32 4294901760, %v2140_v10 }
 0x464   :  { %v3059_v26 = vsub.f32 %v3057_v22, %v3058_v24 }
 0x465   :  { %19784 = vmatmul.mubr.f32.vlgmr.msra.gmra.mrb[4].mxu1 %v2141_v12  ;;  %19814 = vmatmul.mubr.f32.vlgmr.msra.gmra.mrb[4].mxu0 %v2595_v11 }
 0x466   :  { %19787 = vmatpush3.msra.mxu1 %v2152_v14  ;;  %19817 = vmatpush3.xpose.msra.mxu0 %v2606_v13  ;;  %v3060_v28 = vand.u32 4294901760, %v3059_v26 }
 0x467   :  { %19788 = vmatprep.mubr.msk.f32.mxu1 %vm22156_vm1, %v22155_v46  ;;  %19791 = vmatprep.subr.mxu1 %v22155_v46 }
 0x468   :  { %19818 = vmatprep.mubr.msk.f32.mxu0 %vm22156_vm1, %v22155_v46  ;;  %19821 = vmatprep.subr.mxu0 %v22155_v46 }
 0x46d   :  { %19789 = vmatmul.mubr.f32.vlgmr.msra.gmra.mrb[4].mxu1 %v22501_v2  ;;  %19819 = vmatmul.mubr.f32.vlgmr.msra.gmra.mrb[4].mxu0 %v22492_v58 }
 0x46e   :  { %19792 = vmatpush3.msra.mxu1 %v2149_v62  ;;  %19822 = vmatpush3.xpose.msra.mxu0 %v2603_v60 }
 0x46f   :  { %19793 = vmatprep.mubr.msk.f32.mxu1 %vm22156_vm1, %v22155_v46  ;;  %19796 = vmatprep.subr.mxu1 %v22155_v46 }
 0x470   :  { %19823 = vmatprep.mubr.msk.f32.mxu0 %vm22156_vm1, %v22155_v46  ;;  %19826 = vmatprep.subr.mxu0 %v22155_v46 }
 0x475   :  { %19794 = vmatmul.mubr.f32.vlgmr.msra.gmra.mrb[4].mxu1 %v2138_v5  ;;  %19824 = vmatmul.mubr.f32.vlgmr.msra.gmra.mrb[4].mxu0 %v2592_v63 }
 0x476   :  { %19797 = vmatpush3.msra.mxu1 %v22482_v54  ;;  %19827 = vmatpush3.xpose.msra.mxu0 %v22488_v55 }
 0x477   :  { %19798 = vmatprep.mubr.msk.f32.mxu1 %vm22156_vm1, %v22155_v46  ;;  %19801 = vmatprep.subr.mxu1 %v22155_v46 }
 0x478   :  { %19828 = vmatprep.mubr.msk.f32.mxu0 %vm22156_vm1, %v22155_v46  ;;  %19831 = vmatprep.subr.mxu0 %v22155_v46 }
 0x47d   :  { %19799 = vmatmul.mubr.f32.vlgmr.msra.gmra.mrb[4].mxu1 %v2139_v7  ;;  %19829 = vmatmul.mubr.f32.vlgmr.msra.gmra.mrb[4].mxu0 %v2593_v1 }
 0x47e   :  { %19802 = vmatpush3.msra.mxu1 %v2150_v4  ;;  %19832 = vmatpush3.xpose.msra.mxu0 %v2604_v3 }
 0x47f   :  { %19803 = vmatprep.mubr.msk.f32.mxu1 %vm22156_vm1, %v22155_v46  ;;  %19806 = vmatprep.subr.mxu1 %v22155_v46 }
 0x480   :  { %19833 = vmatprep.mubr.msk.f32.mxu0 %vm22156_vm1, %v22155_v46  ;;  %19836 = vmatprep.subr.mxu0 %v22155_v46 }
 0x485   :  { %19804 = vmatmul.mubr.f32.vlgmr.msra.gmra.mrb[4].mxu1 %v22501_v2  ;;  %19834 = vmatmul.mubr.f32.vlgmr.msra.gmra.mrb[4].mxu0 %v22492_v58 }
 0x486   :  { %19807 = vmatpush3.msra.mxu1 %v22482_v54  ;;  %19837 = vmatpush3.xpose.msra.mxu0 %v22488_v55 }
 0x487   :  { %19808 = vmatprep.mubr.msk.f32.mxu1 %vm22156_vm1, %v22155_v46  ;;  %19838 = vmatprep.mubr.msk.f32.mxu0 %vm22156_vm1, %v22155_v46 }
 0x488   :  { %19841 = vmatprep.subr.mxu1 %v22155_v46  ;;  %19871 = vmatprep.subr.mxu0 %v22155_v46 }
 0x48d   :  { %19809 = vmatmul.mubr.f32.vlgmr.msra.gmra.mrb[4].mxu1 %v22501_v2  ;;  %19839 = vmatmul.mubr.f32.vlgmr.msra.gmra.mrb[4].mxu0 %v22492_v58 }
 0x48e   :  { %19842 = vmatpush3.xpose.msra.mxu1 %v2980_v20  ;;  %19843 = vmatprep.mubr.msk.f32.mxu1 %vm22156_vm1, %v22155_v46 }
 0x48f   :  { %19846 = vmatprep.subr.mxu1 %v22155_v46  ;;  %19873 = vmatprep.mubr.msk.f32.mxu0 %vm22156_vm1, %v22155_v46 }
 0x491   :  { %19844 = vmatmul.mubr.f32.vlgmr.msra.gmra.mrb[6].mxu1 %v3049_v27 }
 0x492   :  { %19847 = vmatpush3.xpose.msra.mxu1 %v3060_v28  ;;  %19848 = vmatprep.mubr.msk.f32.mxu1 %vm22156_vm1, %v22155_v46 }
 0x493   :  { %19851 = vmatprep.subr.mxu1 %v22155_v46 }
 0x499   :  { %19849 = vmatmul.mubr.f32.vlgmr.msra.gmra.mrb[6].mxu1 %v3045_v19 }
 0x49a   :  { %19852 = vmatpush3.xpose.msra.mxu1 %v3057_v22  ;;  %19853 = vmatprep.mubr.msk.f32.mxu1 %vm22156_vm1, %v22155_v46 }
 0x49b   :  { %19856 = vmatprep.subr.mxu1 %v22155_v46 }
 0x4a1   :  { %19854 = vmatmul.mubr.f32.vlgmr.msra.gmra.mrb[6].mxu1 %v3046_v21 }
 0x4a2   :  { %19857 = vmatpush3.xpose.msra.mxu1 %v2980_v20  ;;  %19858 = vmatprep.mubr.msk.f32.mxu1 %vm22156_vm1, %v22155_v46 }
 0x4a3   :  { %19861 = vmatprep.subr.mxu1 %v22155_v46 }
 0x4a9   :  { %19859 = vmatmul.mubr.f32.vlgmr.msra.gmra.mrb[6].mxu1 %v3047_v23 }
 0x4aa   :  { %19862 = vmatpush3.xpose.msra.mxu1 %v3058_v24  ;;  %19863 = vmatprep.mubr.msk.f32.mxu1 %vm22156_vm1, %v22155_v46 }
 0x4ab   :  { %19866 = vmatprep.subr.mxu1 %v22155_v46 }
 0x4b1   :  { %19864 = vmatmul.mubr.f32.vlgmr.msra.gmra.mrb[6].mxu1 %v3045_v19 }
 0x4b2   :  { %19867 = vmatpush3.xpose.msra.mxu1 %v2980_v20  ;;  %19868 = vmatprep.mubr.msk.f32.mxu1 %vm22156_vm1, %v22155_v46 }
 0x4b3   :  { %19901 = vmatprep.subr.mxu1 %v22155_v46 }
 0x4b9   :  { %19869 = vmatmul.mubr.f32.vlgmr.msra.gmra.mrb[6].mxu1 %v3045_v19 }
 0x4ba   :  { %19903 = vmatprep.mubr.msk.f32.mxu1 %vm22156_vm1, %v22155_v46 }
 0x534   :  { %v22572_v29 = vpop.f32.mrb[2].mxu0 }
 0x535   :  { %v19780_v30 = vpop.f32.mrb[3].mxu0 }
 0x560   :  { %v22574_v31 = vpop.f32.mrb[4].mxu1  ;;  %v2967_v32 = vpop.f32.mrb[4].mxu0 }
 0x561   :  { %v3425_v33 = vmul.f32 0.35355338, %v2967_v32  ;;  %v19810_v34 = vpop.f32.mrb[5].mxu1  ;;  %v19840_v35 = vpop.f32.mrb[5].mxu0 }
 0x563   :  { %v3427_v36 = vsel %vm685_vm2, %v3425_v33, -inf }
 0x564   :  { %3428 = vmax.xlane.f32.xlu1 %v3427_v36 }
 0x58c   :  { %v3421_v37 = vpop.f32.mrb[6].mxu1 }
 0x58d   :  { %v3426_v38 = vmul.f32 0.35355338, %v3421_v37  ;;  %v19870_v39 = vpop.f32.mrb[7].mxu1 }
 0x58f   :  { %v3430_v40 = vsel %vm685_vm2, %v3426_v38, -inf }
 0x590   :  { %3431 = vmax.xlane.f32.xlu0 %v3430_v40 }
 0x5a6   :  { %3901 = vrot.lane.b32.xlu0 %v22410_v51, %s22161_s18 }
 0x5aa   :  { %4355 = vrot.lane.b32.xlu0 %v22406_v50, %s22162_s0 }
 0x5f1   :  { %v3429_v41 = vpop.xlane.xlu1 %3428 }
 0x5f2   :  { %v3433_v42 = vsub.f32 %v3425_v33, %v3429_v41 }
 0x5f4   :  { %v3435_v43 = vmul.f32 1.442695, %v3433_v42 }
 0x5f6   :  { %21914 = vpow2.f32 %v3435_v43 }
 0x600   :  { %v21915_v44 = vpop.eup %21914 }
 0x601   :  { %v3439_v45 = vsel %vm685_vm2, %v21915_v44, 0.0 }
 0x602   :  { %3440 = vadd.xlane.f32.xlu1 %v3439_v45 }
 0x61d   :  { %v3432_v47 = vpop.xlane.xlu0 %3431 }
 0x61e   :  { %v3434_v48 = vsub.f32 %v3426_v38, %v3432_v47 }
 0x620   :  { %v3437_v49 = vmul.f32 1.442695, %v3434_v48 }
 0x621   :  { %v3902_v52 = vpop.permute.xlu0 %3901 }
 0x622   :  { %21916 = vpow2.f32 %v3437_v49  ;;  %v22582_v53 = vand.u32 4294901760, %v3902_v52 }
 0x624   :  { %19902 = vmatpush3.msra.mxu1 %v22582_v53  ;;  %v3985_v8 = vsub.f32 %v3902_v52, %v22582_v53 }
 0x625   :  { %19906 = vmatprep.subr.mxu1 %v22155_v46  ;;  %v4356_v21 = vpop.permute.xlu0 %4355 }
 0x626   :  { %v3986_v13 = vand.u32 4294901760, %v3985_v8  ;;  %v4359_v23 = vsel %vm685_vm2, %v4356_v21, 0 }
 0x627   :  { %v22624_v25 = vand.u32 4294901760, %v4359_v23 }
 0x628   :  { %v3987_v16 = vsub.f32 %v3985_v8, %v3986_v13 }
 0x629   :  { %v4439_v27 = vsub.f32 %v4359_v23, %v22624_v25 }
 0x62a   :  { %v3988_v19 = vand.u32 4294901760, %v3987_v16 }
 0x62b   :  { %v4440_v32 = vand.u32 4294901760, %v4439_v27 }
 0x62c   :  { %v21917_v54 = vpop.eup %21916 }
 0x62d   :  { %v3442_v55 = vsel %vm685_vm2, %v21917_v54, 0.0  ;;  %v4441_v35 = vsub.f32 %v4439_v27, %v4440_v32 }
 0x62e   :  { %3443 = vadd.xlane.f32.xlu1 %v3442_v55 }
 0x62f   :  { %v4442_v39 = vand.u32 4294901760, %v4441_v35 }
 0x63f   :  { %3449 = vrot.lane.b32.xlu1 %v22406_v50, %s22161_s18  ;;  %s22170_s18 = smov [#allocation13]  }
 0x643   :  { %4353 = vrot.lane.b32.xlu1 %v22406_v50, %s22163_s8 }
 0x647   :  { %4807 = vrot.lane.b32.xlu1 %v22410_v51, %s22163_s8 }
 0x64b   :  { %4809 = vrot.lane.b32.xlu1 %v22410_v51, %s22162_s0 }
 0x68f   :  { %v3441_v56 = vpop.xlane.xlu1 %3440 }
 0x690   :  { %21918 = vrcp.f32 %v3441_v56 }
 0x69a   :  { %v21919_v57 = vpop.eup %21918 }
 0x69b   :  { %v3447_v58 = vmul.f32 %v21919_v57, %v21915_v44 }
 0x69d   :  { %v3453_v59 = vsel %vm685_vm2, %v3447_v58, 0 }
 0x69e   :  { %v22595_v60 = vand.u32 4294901760, %v3453_v59 }
 0x6a0   :  { %v3522_v61 = vsub.f32 %v3453_v59, %v22595_v60 }
 0x6a2   :  { %v3523_v62 = vand.u32 4294901760, %v3522_v61 }
 0x6a4   :  { %v3524_v0 = vsub.f32 %v3522_v61, %v3523_v62 }
 0x6a6   :  { %v3525_v3 = vand.u32 4294901760, %v3524_v0 }
 0x6bb   :  { %v3444_v63 = vpop.xlane.xlu1 %3443 }
 0x6bc   :  { %21920 = vrcp.f32 %v3444_v63 }
 0x6bf   :  { %v3450_v1 = vpop.permute.xlu1 %3449 }
 0x6c0   :  { %v3456_v2 = vand.u32 4294901760, %v3450_v1 }
 0x6c2   :  { %v3533_v4 = vsub.f32 %v3450_v1, %v3456_v2  ;;  %19872 = vmatpush3.msra.mxu0 %v3456_v2 }
 0x6c3   :  { %19874 = vmatmul.mubr.f32.vlgmr.msra.gmra.mrb[6].mxu0 %v3525_v3  ;;  %19876 = vmatprep.subr.mxu0 %v22155_v46  ;;  %v4354_v20 = vpop.permute.xlu1 %4353 }
 0x6c4   :  { %v3534_v5 = vand.u32 4294901760, %v3533_v4  ;;  %19878 = vmatprep.mubr.msk.f32.mxu0 %vm22156_vm1, %v22155_v46  ;;  %v4357_v22 = vsel %vm685_vm2, %v4354_v20, 0 }
 0x6c5   :  { %v22620_v24 = vand.u32 4294901760, %v4357_v22 }
 0x6c6   :  { %v21921_v6 = vpop.eup %21920  ;;  %v3535_v7 = vsub.f32 %v3533_v4, %v3534_v5 }
 0x6c7   :  { %v3448_v9 = vmul.f32 %v21921_v6, %v21917_v54  ;;  %v4428_v26 = vsub.f32 %v4357_v22, %v22620_v24  ;;  %v4808_v28 = vpop.permute.xlu1 %4807 }
 0x6c8   :  { %v3536_v10 = vand.u32 4294901760, %v3535_v7  ;;  %v4811_v36 = vsel %vm685_vm2, %v4808_v28, 0 }
 0x6c9   :  { %v3905_v11 = vsel %vm685_vm2, %v3448_v9, 0  ;;  %v4429_v30 = vand.u32 4294901760, %v4428_v26  ;;  %v4881_v40 = vand.u32 4294901760, %v4811_v36 }
 0x6ca   :  { %19877 = vmatpush3.msra.mxu0 %v3536_v10  ;;  %v22603_v12 = vand.u32 4294901760, %v3905_v11 }
 0x6cb   :  { %19879 = vmatmul.mubr.f32.vlgmr.msra.gmra.mrb[6].mxu0 %v22595_v60  ;;  %19881 = vmatprep.subr.mxu0 %v22155_v46  ;;  %v4430_v33 = vsub.f32 %v4428_v26, %v4429_v30  ;;  %v4810_v34 = vpop.permute.xlu1 %4809  ;;  %v4882_v42 = vsub.f32 %v4811_v36, %v4881_v40 }
 0x6cc   :  { %19882 = vmatpush3.msra.mxu0 %v3533_v4  ;;  %19883 = vmatprep.mubr.msk.f32.mxu0 %vm22156_vm1, %v22155_v46  ;;  %v3974_v14 = vsub.f32 %v3905_v11, %v22603_v12  ;;  %v4813_v37 = vsel %vm685_vm2, %v4810_v34, 0 }
 0x6cd   :  { %19886 = vmatprep.subr.mxu0 %v22155_v46  ;;  %v4431_v38 = vand.u32 4294901760, %v4430_v33  ;;  %v4816_v41 = vand.u32 4294901760, %v4813_v37  ;;  %v4883_v44 = vand.u32 4294901760, %v4882_v42 }
 0x6ce   :  { %v3975_v15 = vand.u32 4294901760, %v3974_v14 }
 0x6cf   :  { %v4893_v43 = vsub.f32 %v4813_v37, %v4816_v41  ;;  %v4884_v47 = vsub.f32 %v4882_v42, %v4883_v44 }
 0x6d0   :  { %v3976_v17 = vsub.f32 %v3974_v14, %v3975_v15 }
 0x6d1   :  { %v4894_v45 = vand.u32 4294901760, %v4893_v43  ;;  %v4885_v49 = vand.u32 4294901760, %v4884_v47 }
 0x6d2   :  { %v3977_v18 = vand.u32 4294901760, %v3976_v17 }
 0x6d3   :  { %19884 = vmatmul.mubr.f32.vlgmr.msra.gmra.mrb[6].mxu0 %v3522_v61  ;;  %v4895_v48 = vsub.f32 %v4893_v43, %v4894_v45 }
 0x6d4   :  { %19887 = vmatpush3.msra.mxu0 %v3456_v2  ;;  %19904 = vmatmul.mubr.f32.vlgmr.msra.gmra.mrb[8].mxu1 %v3977_v18 }
 0x6d5   :  { %19907 = vmatpush3.msra.mxu1 %v3988_v19  ;;  %19888 = vmatprep.mubr.msk.f32.mxu0 %vm22156_vm1, %v22155_v46  ;;  %v4896_v52 = vand.u32 4294901760, %v4895_v48 }
 0x6d6   :  { %19891 = vmatprep.subr.mxu0 %v22155_v46  ;;  %19908 = vmatprep.mubr.msk.f32.mxu1 %vm22156_vm1, %v22155_v46 }
 0x6d7   :  { %19911 = vmatprep.subr.mxu1 %v22155_v46 }
 0x6db   :  { %19889 = vmatmul.mubr.f32.vlgmr.msra.gmra.mrb[6].mxu0 %v3523_v62 }
 0x6dc   :  { %19892 = vmatpush3.msra.mxu0 %v3534_v5  ;;  %19909 = vmatmul.mubr.f32.vlgmr.msra.gmra.mrb[8].mxu1 %v22603_v12 }
 0x6dd   :  { %19912 = vmatpush3.msra.mxu1 %v3985_v8  ;;  %19893 = vmatprep.mubr.msk.f32.mxu0 %vm22156_vm1, %v22155_v46 }
 0x6de   :  { %19896 = vmatprep.subr.mxu0 %v22155_v46  ;;  %19913 = vmatprep.mubr.msk.f32.mxu1 %vm22156_vm1, %v22155_v46 }
 0x6df   :  { %19916 = vmatprep.subr.mxu1 %v22155_v46 }
 0x6e3   :  { %19894 = vmatmul.mubr.f32.vlgmr.msra.gmra.mrb[6].mxu0 %v22595_v60 }
 0x6e4   :  { %19897 = vmatpush3.msra.mxu0 %v3456_v2  ;;  %19914 = vmatmul.mubr.f32.vlgmr.msra.gmra.mrb[8].mxu1 %v3974_v14 }
 0x6e5   :  { %19917 = vmatpush3.msra.mxu1 %v22582_v53  ;;  %19898 = vmatprep.mubr.msk.f32.mxu0 %vm22156_vm1, %v22155_v46 }
 0x6e6   :  { %19931 = vmatprep.subr.mxu0 %v22155_v46  ;;  %19918 = vmatprep.mubr.msk.f32.mxu1 %vm22156_vm1, %v22155_v46 }
 0x6e7   :  { %19921 = vmatprep.subr.mxu1 %v22155_v46 }
 0x6eb   :  { %19899 = vmatmul.mubr.f32.vlgmr.msra.gmra.mrb[6].mxu0 %v22595_v60 }
 0x6ec   :  { %19932 = vmatpush3.xpose.msra.mxu0 %v22624_v25  ;;  %19919 = vmatmul.mubr.f32.vlgmr.msra.gmra.mrb[8].mxu1 %v3975_v15 }
 0x6ed   :  { %19922 = vmatpush3.msra.mxu1 %v3986_v13  ;;  %19933 = vmatprep.mubr.msk.f32.mxu0 %vm22156_vm1, %v22155_v46 }
 0x6ee   :  { %19936 = vmatprep.subr.mxu0 %v22155_v46  ;;  %19923 = vmatprep.mubr.msk.f32.mxu1 %vm22156_vm1, %v22155_v46 }
 0x6ef   :  { %19934 = vmatmul.mubr.f32.vlgmr.msra.gmra.mrb[8].mxu0 %v4431_v38  ;;  %19926 = vmatprep.subr.mxu1 %v22155_v46 }
 0x6f0   :  { %19937 = vmatpush3.xpose.msra.mxu0 %v4442_v39  ;;  %19938 = vmatprep.mubr.msk.f32.mxu0 %vm22156_vm1, %v22155_v46 }
 0x6f1   :  { %19941 = vmatprep.subr.mxu0 %v22155_v46 }
 0x6f4   :  { %19924 = vmatmul.mubr.f32.vlgmr.msra.gmra.mrb[8].mxu1 %v22603_v12 }
 0x6f5   :  { %19927 = vmatpush3.msra.mxu1 %v22582_v53  ;;  %19928 = vmatprep.mubr.msk.f32.mxu1 %vm22156_vm1, %v22155_v46 }
 0x6f6   :  { %19961 = vmatprep.subr.mxu1 %v22155_v46 }
 0x6f7   :  { %19939 = vmatmul.mubr.f32.vlgmr.msra.gmra.mrb[8].mxu0 %v22620_v24 }
 0x6f8   :  { %19942 = vmatpush3.xpose.msra.mxu0 %v4439_v27  ;;  %19943 = vmatprep.mubr.msk.f32.mxu0 %vm22156_vm1, %v22155_v46 }
 0x6f9   :  { %19946 = vmatprep.subr.mxu0 %v22155_v46 }
 0x6fc   :  { %19929 = vmatmul.mubr.f32.vlgmr.msra.gmra.mrb[8].mxu1 %v22603_v12 }
 0x6fd   :  { %19962 = vmatpush3.xpose.msra.mxu1 %v4816_v41  ;;  %19963 = vmatprep.mubr.msk.f32.mxu1 %vm22156_vm1, %v22155_v46 }
 0x6fe   :  { %19966 = vmatprep.subr.mxu1 %v22155_v46 }
 0x6ff   :  { %19944 = vmatmul.mubr.f32.vlgmr.msra.gmra.mrb[8].mxu0 %v4428_v26 }
 0x700   :  { %19947 = vmatpush3.xpose.msra.mxu0 %v22624_v25  ;;  %19964 = vmatmul.mubr.f32.vlgmr.msra.gmra.mrb[10].mxu1 %v4885_v49 }
 0x701   :  { %19967 = vmatpush3.xpose.msra.mxu1 %v4896_v52  ;;  %19948 = vmatprep.mubr.msk.f32.mxu0 %vm22156_vm1, %v22155_v46 }
 0x702   :  { %19951 = vmatprep.subr.mxu0 %v22155_v46  ;;  %19968 = vmatprep.mubr.msk.f32.mxu1 %vm22156_vm1, %v22155_v46 }
 0x703   :  { %19971 = vmatprep.subr.mxu1 %v22155_v46 }
 0x707   :  { %19949 = vmatmul.mubr.f32.vlgmr.msra.gmra.mrb[8].mxu0 %v4429_v30 }
 0x708   :  { %19952 = vmatpush3.xpose.msra.mxu0 %v4440_v32  ;;  %19969 = vmatmul.mubr.f32.vlgmr.msra.gmra.mrb[10].mxu1 %v4881_v40 }
 0x709   :  { %19972 = vmatpush3.xpose.msra.mxu1 %v4893_v43  ;;  %19953 = vmatprep.mubr.msk.f32.mxu0 %vm22156_vm1, %v22155_v46 }
 0x70a   :  { %19956 = vmatprep.subr.mxu0 %v22155_v46  ;;  %19973 = vmatprep.mubr.msk.f32.mxu1 %vm22156_vm1, %v22155_v46 }
 0x70b   :  { %19976 = vmatprep.subr.mxu1 %v22155_v46 }
 0x70f   :  { %19954 = vmatmul.mubr.f32.vlgmr.msra.gmra.mrb[8].mxu0 %v22620_v24 }
 0x710   :  { %19957 = vmatpush3.xpose.msra.mxu0 %v22624_v25  ;;  %19974 = vmatmul.mubr.f32.vlgmr.msra.gmra.mrb[10].mxu1 %v4882_v42 }
 0x711   :  { %19977 = vmatpush3.xpose.msra.mxu1 %v4816_v41  ;;  %19958 = vmatprep.mubr.msk.f32.mxu0 %vm22156_vm1, %v22155_v46 }
 0x712   :  { %19978 = vmatprep.mubr.msk.f32.mxu1 %vm22156_vm1, %v22155_v46  ;;  %19981 = vmatprep.subr.mxu1 %v22155_v46 }
 0x713   :  { %19991 = vmatprep.subr.mxu0 %v22155_v46 }
 0x717   :  { %19959 = vmatmul.mubr.f32.vlgmr.msra.gmra.mrb[8].mxu0 %v22620_v24 }
 0x718   :  { %19979 = vmatmul.mubr.f32.vlgmr.msra.gmra.mrb[10].mxu1 %v4883_v44  ;;  %19993 = vmatprep.mubr.msk.f32.mxu0 %vm22156_vm1, %v22155_v46 }
 0x719   :  { %19982 = vmatpush3.xpose.msra.mxu1 %v4894_v45  ;;  %19983 = vmatprep.mubr.msk.f32.mxu1 %vm22156_vm1, %v22155_v46 }
 0x71a   :  { %19986 = vmatprep.subr.mxu1 %v22155_v46 }
 0x720   :  { %19984 = vmatmul.mubr.f32.vlgmr.msra.gmra.mrb[10].mxu1 %v4881_v40 }
 0x721   :  { %19987 = vmatpush3.xpose.msra.mxu1 %v4816_v41  ;;  %19988 = vmatprep.mubr.msk.f32.mxu1 %vm22156_vm1, %v22155_v46 }
 0x722   :  { %20021 = vmatprep.subr.mxu1 %v22155_v46 }
 0x728   :  { %19989 = vmatmul.mubr.f32.vlgmr.msra.gmra.mrb[10].mxu1 %v4881_v40 }
 0x729   :  { %20023 = vmatprep.mubr.msk.f32.mxu1 %vm22156_vm1, %v22155_v46 }
 0x7be   :  { %v22698_v53 = vpop.f32.mrb[6].mxu0 }
 0x7bf   :  { %v19900_v54 = vpop.f32.mrb[7].mxu0 }
 0x7cf   :  { %v22700_v55 = vpop.f32.mrb[8].mxu1 }
 0x7d0   :  { %v19930_v56 = vpop.f32.mrb[9].mxu1 }
 0x7ea   :  { %v4803_v57 = vpop.f32.mrb[8].mxu0 }
 0x7eb   :  { %v5261_v58 = vmul.f32 0.35355338, %v4803_v57  ;;  %v19960_v59 = vpop.f32.mrb[9].mxu0 }
 0x7ed   :  { %v5263_v60 = vsel %vm685_vm2, %v5261_v58, -inf }
 0x7ee   :  { %5264 = vmax.xlane.f32.xlu0 %v5263_v60 }
 0x7fb   :  { %v5257_v61 = vpop.f32.mrb[10].mxu1 }
 0x7fc   :  { %v5262_v62 = vmul.f32 0.35355338, %v5257_v61  ;;  %v19990_v63 = vpop.f32.mrb[11].mxu1 }
 0x7fe   :  { %v5266_v0 = vsel %vm685_vm2, %v5262_v62, -inf }
 0x7ff   :  { %5267 = vmax.xlane.f32.xlu1 %v5266_v0 }
 0x810   :  { %5285 = vrot.lane.b32.xlu1 %v22406_v50, %s22164_s19 }
 0x814   :  { %6189 = vrot.lane.b32.xlu1 %v22406_v50, %s22165_s20 }
 0x818   :  { %6643 = vrot.lane.b32.xlu1 %v22410_v51, %s22165_s20 }
 0x81c   :  { %6645 = vrot.lane.b32.xlu1 %v22410_v51, %s22166_s21 }
 0x87b   :  { %v5265_v1 = vpop.xlane.xlu0 %5264 }
 0x87c   :  { %v5269_v2 = vsub.f32 %v5261_v58, %v5265_v1 }
 0x87e   :  { %v5271_v3 = vmul.f32 1.442695, %v5269_v2 }
 0x880   :  { %21922 = vpow2.f32 %v5271_v3 }
 0x88a   :  { %v21923_v4 = vpop.eup %21922 }
 0x88b   :  { %v5275_v5 = vsel %vm685_vm2, %v21923_v4, 0.0 }
 0x88c   :  { %5276 = vadd.xlane.f32.xlu0 %v5275_v5  ;;  %v5268_v6 = vpop.xlane.xlu1 %5267 }
 0x88d   :  { %v5270_v7 = vsub.f32 %v5262_v62, %v5268_v6 }
 0x88f   :  { %v5273_v8 = vmul.f32 1.442695, %v5270_v7 }
 0x890   :  { %v5286_v9 = vpop.permute.xlu1 %5285 }
 0x891   :  { %21924 = vpow2.f32 %v5273_v8  ;;  %v22712_v10 = vand.u32 4294901760, %v5286_v9 }
 0x893   :  { %19992 = vmatpush3.msra.mxu0 %v22712_v10  ;;  %v5369_v15 = vsub.f32 %v5286_v9, %v22712_v10 }
 0x894   :  { %19996 = vmatprep.subr.mxu0 %v22155_v46  ;;  %v6190_v43 = vpop.permute.xlu1 %6189 }
 0x895   :  { %v5370_v19 = vand.u32 4294901760, %v5369_v15  ;;  %v6193_v45 = vsel %vm685_vm2, %v6190_v43, 0 }
 0x896   :  { %v22751_v48 = vand.u32 4294901760, %v6193_v45 }
 0x897   :  { %v5371_v23 = vsub.f32 %v5369_v15, %v5370_v19 }
 0x898   :  { %v6264_v52 = vsub.f32 %v6193_v45, %v22751_v48  ;;  %v6644_v56 = vpop.permute.xlu1 %6643 }
 0x899   :  { %v5372_v28 = vand.u32 4294901760, %v5371_v23  ;;  %v6647_v62 = vsel %vm685_vm2, %v6644_v56, 0 }
 0x89a   :  { %v6265_v57 = vand.u32 4294901760, %v6264_v52  ;;  %v22778_v1 = vand.u32 4294901760, %v6647_v62 }
 0x89b   :  { %v21925_v11 = vpop.eup %21924 }
 0x89c   :  { %v5278_v12 = vsel %vm685_vm2, %v21925_v11, 0.0  ;;  %v6266_v59 = vsub.f32 %v6264_v52, %v6265_v57  ;;  %v6646_v60 = vpop.permute.xlu1 %6645 }
 0x89d   :  { %5279 = vadd.xlane.f32.xlu0 %v5278_v12  ;;  %v6649_v63 = vsel %vm685_vm2, %v6646_v60, 0 }
 0x89e   :  { %v6267_v0 = vand.u32 4294901760, %v6266_v59  ;;  %v6652_v3 = vand.u32 4294901760, %v6649_v63 }
 0x8a0   :  { %v6729_v5 = vsub.f32 %v6649_v63, %v6652_v3 }
 0x8a2   :  { %v6730_v7 = vand.u32 4294901760, %v6729_v5 }
 0x8a4   :  { %v6731_v9 = vsub.f32 %v6729_v5, %v6730_v7 }
 0x8b3   :  { %5737 = vrot.lane.b32.xlu0 %v22410_v51, %s22164_s19 }
 0x8b7   :  { %6191 = vrot.lane.b32.xlu0 %v22406_v50, %s22166_s21 }
 0x919   :  { %v5277_v13 = vpop.xlane.xlu0 %5276 }
 0x91a   :  { %21926 = vrcp.f32 %v5277_v13 }
 0x924   :  { %v21927_v14 = vpop.eup %21926 }
 0x925   :  { %v5283_v16 = vmul.f32 %v21927_v14, %v21923_v4  ;;  %v6718_v4 = vsub.f32 %v6647_v62, %v22778_v1 }
 0x927   :  { %v5289_v17 = vsel %vm685_vm2, %v5283_v16, 0  ;;  %v6719_v6 = vand.u32 4294901760, %v6718_v4 }
 0x928   :  { %v22722_v18 = vand.u32 4294901760, %v5289_v17 }
 0x929   :  { %v6720_v8 = vsub.f32 %v6718_v4, %v6719_v6 }
 0x92a   :  { %v5280_v20 = vpop.xlane.xlu0 %5279  ;;  %v5358_v21 = vsub.f32 %v5289_v17, %v22722_v18 }
 0x92b   :  { %21928 = vrcp.f32 %v5280_v20 }
 0x92c   :  { %v5359_v22 = vand.u32 4294901760, %v5358_v21 }
 0x92e   :  { %v5738_v24 = vpop.permute.xlu0 %5737  ;;  %v5360_v25 = vsub.f32 %v5358_v21, %v5359_v22 }
 0x92f   :  { %v22725_v26 = vand.u32 4294901760, %v5738_v24 }
 0x930   :  { %v5361_v27 = vand.u32 4294901760, %v5360_v25 }
 0x931   :  { %20022 = vmatpush3.msra.mxu1 %v22725_v26  ;;  %v5821_v33 = vsub.f32 %v5738_v24, %v22725_v26 }
 0x932   :  { %19994 = vmatmul.mubr.f32.vlgmr.msra.gmra.mrb[10].mxu0 %v5361_v27  ;;  %20026 = vmatprep.subr.mxu1 %v22155_v46  ;;  %v6192_v44 = vpop.permute.xlu0 %6191 }
 0x933   :  { %19997 = vmatpush3.msra.mxu0 %v5372_v28  ;;  %19998 = vmatprep.mubr.msk.f32.mxu0 %vm22156_vm1, %v22155_v46  ;;  %v5822_v36 = vand.u32 4294901760, %v5821_v33  ;;  %v6195_v47 = vsel %vm685_vm2, %v6192_v44, 0 }
 0x934   :  { %20001 = vmatprep.subr.mxu0 %v22155_v46  ;;  %v22755_v49 = vand.u32 4294901760, %v6195_v47 }
 0x935   :  { %v21929_v30 = vpop.eup %21928  ;;  %v5823_v39 = vsub.f32 %v5821_v33, %v5822_v36 }
 0x936   :  { %v5284_v32 = vmul.f32 %v21929_v30, %v21925_v11  ;;  %v6275_v54 = vsub.f32 %v6195_v47, %v22755_v49  ;;  %v6732_v11 = vand.u32 4294901760, %v6731_v9 }
 0x937   :  { %v5824_v42 = vand.u32 4294901760, %v5823_v39 }
 0x938   :  { %v5741_v34 = vsel %vm685_vm2, %v5284_v32, 0  ;;  %v6276_v58 = vand.u32 4294901760, %v6275_v54 }
 0x939   :  { %v22734_v35 = vand.u32 4294901760, %v5741_v34 }
 0x93a   :  { %19999 = vmatmul.mubr.f32.vlgmr.msra.gmra.mrb[10].mxu0 %v22722_v18  ;;  %v6277_v61 = vsub.f32 %v6275_v54, %v6276_v58 }
 0x93b   :  { %20002 = vmatpush3.msra.mxu0 %v5369_v15  ;;  %20003 = vmatprep.mubr.msk.f32.mxu0 %vm22156_vm1, %v22155_v46  ;;  %v5810_v37 = vsub.f32 %v5741_v34, %v22734_v35 }
 0x93c   :  { %20006 = vmatprep.subr.mxu0 %v22155_v46  ;;  %v6278_v2 = vand.u32 4294901760, %v6277_v61 }
 0x93d   :  { %v5811_v38 = vand.u32 4294901760, %v5810_v37 }
 0x93f   :  { %v5812_v40 = vsub.f32 %v5810_v37, %v5811_v38 }
 0x941   :  { %v5813_v41 = vand.u32 4294901760, %v5812_v40 }
 0x942   :  { %20004 = vmatmul.mubr.f32.vlgmr.msra.gmra.mrb[10].mxu0 %v5358_v21 }
 0x943   :  { %20007 = vmatpush3.msra.mxu0 %v22712_v10  ;;  %20024 = vmatmul.mubr.f32.vlgmr.msra.gmra.mrb[12].mxu1 %v5813_v41 }
 0x944   :  { %20027 = vmatpush3.msra.mxu1 %v5824_v42  ;;  %20008 = vmatprep.mubr.msk.f32.mxu0 %vm22156_vm1, %v22155_v46 }
 0x945   :  { %20011 = vmatprep.subr.mxu0 %v22155_v46  ;;  %20028 = vmatprep.mubr.msk.f32.mxu1 %vm22156_vm1, %v22155_v46 }
 0x946   :  { %20031 = vmatprep.subr.mxu1 %v22155_v46 }
 0x94a   :  { %20009 = vmatmul.mubr.f32.vlgmr.msra.gmra.mrb[10].mxu0 %v5359_v22 }
 0x94b   :  { %20012 = vmatpush3.msra.mxu0 %v5370_v19  ;;  %20029 = vmatmul.mubr.f32.vlgmr.msra.gmra.mrb[12].mxu1 %v22734_v35 }
 0x94c   :  { %20032 = vmatpush3.msra.mxu1 %v5821_v33  ;;  %20013 = vmatprep.mubr.msk.f32.mxu0 %vm22156_vm1, %v22155_v46 }
 0x94d   :  { %20016 = vmatprep.subr.mxu0 %v22155_v46  ;;  %20033 = vmatprep.mubr.msk.f32.mxu1 %vm22156_vm1, %v22155_v46 }
 0x94e   :  { %20036 = vmatprep.subr.mxu1 %v22155_v46 }
 0x952   :  { %20014 = vmatmul.mubr.f32.vlgmr.msra.gmra.mrb[10].mxu0 %v22722_v18 }
 0x953   :  { %20017 = vmatpush3.msra.mxu0 %v22712_v10  ;;  %20034 = vmatmul.mubr.f32.vlgmr.msra.gmra.mrb[12].mxu1 %v5810_v37  ;;  %v6721_v10 = vand.u32 4294901760, %v6720_v8 }
 0x954   :  { %20037 = vmatpush3.msra.mxu1 %v22725_v26  ;;  %20018 = vmatprep.mubr.msk.f32.mxu0 %vm22156_vm1, %v22155_v46 }
 0x955   :  { %20051 = vmatprep.subr.mxu0 %v22155_v46  ;;  %20038 = vmatprep.mubr.msk.f32.mxu1 %vm22156_vm1, %v22155_v46 }
 0x956   :  { %20041 = vmatprep.subr.mxu1 %v22155_v46 }
 0x95a   :  { %20019 = vmatmul.mubr.f32.vlgmr.msra.gmra.mrb[10].mxu0 %v22722_v18 }
 0x95b   :  { %20052 = vmatpush3.xpose.msra.mxu0 %v22755_v49  ;;  %20039 = vmatmul.mubr.f32.vlgmr.msra.gmra.mrb[12].mxu1 %v5811_v38 }
 0x95c   :  { %20042 = vmatpush3.msra.mxu1 %v5822_v36  ;;  %20053 = vmatprep.mubr.msk.f32.mxu0 %vm22156_vm1, %v22155_v46 }
 0x95d   :  { %20056 = vmatprep.subr.mxu0 %v22155_v46  ;;  %20043 = vmatprep.mubr.msk.f32.mxu1 %vm22156_vm1, %v22155_v46 }
 0x95e   :  { %20054 = vmatmul.mubr.f32.vlgmr.msra.gmra.mrb[12].mxu0 %v6267_v0  ;;  %20046 = vmatprep.subr.mxu1 %v22155_v46 }
 0x95f   :  { %20057 = vmatpush3.xpose.msra.mxu0 %v6278_v2  ;;  %20058 = vmatprep.mubr.msk.f32.mxu0 %vm22156_vm1, %v22155_v46 }
 0x960   :  { %20061 = vmatprep.subr.mxu0 %v22155_v46 }
 0x963   :  { %20044 = vmatmul.mubr.f32.vlgmr.msra.gmra.mrb[12].mxu1 %v22734_v35 }
 0x964   :  { %20047 = vmatpush3.msra.mxu1 %v22725_v26  ;;  %20048 = vmatprep.mubr.msk.f32.mxu1 %vm22156_vm1, %v22155_v46 }
 0x965   :  { %20081 = vmatprep.subr.mxu1 %v22155_v46 }
 0x966   :  { %20059 = vmatmul.mubr.f32.vlgmr.msra.gmra.mrb[12].mxu0 %v22751_v48 }
 0x967   :  { %20062 = vmatpush3.xpose.msra.mxu0 %v6275_v54  ;;  %20063 = vmatprep.mubr.msk.f32.mxu0 %vm22156_vm1, %v22155_v46 }
 0x968   :  { %20066 = vmatprep.subr.mxu0 %v22155_v46 }
 0x96b   :  { %20049 = vmatmul.mubr.f32.vlgmr.msra.gmra.mrb[12].mxu1 %v22734_v35 }
 0x96c   :  { %20082 = vmatpush3.xpose.msra.mxu1 %v6652_v3  ;;  %20083 = vmatprep.mubr.msk.f32.mxu1 %vm22156_vm1, %v22155_v46 }
 0x96d   :  { %20086 = vmatprep.subr.mxu1 %v22155_v46 }
 0x96e   :  { %20064 = vmatmul.mubr.f32.vlgmr.msra.gmra.mrb[12].mxu0 %v6264_v52 }
 0x96f   :  { %20067 = vmatpush3.xpose.msra.mxu0 %v22755_v49  ;;  %20084 = vmatmul.mubr.f32.vlgmr.msra.gmra.mrb[14].mxu1 %v6721_v10 }
 0x970   :  { %20087 = vmatpush3.xpose.msra.mxu1 %v6732_v11  ;;  %20068 = vmatprep.mubr.msk.f32.mxu0 %vm22156_vm1, %v22155_v46 }
 0x971   :  { %20071 = vmatprep.subr.mxu0 %v22155_v46  ;;  %20088 = vmatprep.mubr.msk.f32.mxu1 %vm22156_vm1, %v22155_v46 }
 0x972   :  { %20091 = vmatprep.subr.mxu1 %v22155_v46 }
 0x976   :  { %20069 = vmatmul.mubr.f32.vlgmr.msra.gmra.mrb[12].mxu0 %v6265_v57 }
 0x977   :  { %20072 = vmatpush3.xpose.msra.mxu0 %v6276_v58  ;;  %20089 = vmatmul.mubr.f32.vlgmr.msra.gmra.mrb[14].mxu1 %v22778_v1 }
 0x978   :  { %20092 = vmatpush3.xpose.msra.mxu1 %v6729_v5  ;;  %20073 = vmatprep.mubr.msk.f32.mxu0 %vm22156_vm1, %v22155_v46  ;;  %v8057_v5 = vld [vmem:[%s23771_s4] sm:$0xff] }
 0x979   :  { %20076 = vmatprep.subr.mxu0 %v22155_v46  ;;  %20093 = vmatprep.mubr.msk.f32.mxu1 %vm22156_vm1, %v22155_v46 }
 0x97a   :  { %20096 = vmatprep.subr.mxu1 %v22155_v46 }
 0x97e   :  { %20074 = vmatmul.mubr.f32.vlgmr.msra.gmra.mrb[12].mxu0 %v22751_v48 }
 0x97f   :  { %20077 = vmatpush3.xpose.msra.mxu0 %v22755_v49  ;;  %20094 = vmatmul.mubr.f32.vlgmr.msra.gmra.mrb[14].mxu1 %v6718_v4 }
 0x980   :  { %20097 = vmatpush3.xpose.msra.mxu1 %v6652_v3  ;;  %20078 = vmatprep.mubr.msk.f32.mxu0 %vm22156_vm1, %v22155_v46 }
 0x981   :  { %20098 = vmatprep.mubr.msk.f32.mxu1 %vm22156_vm1, %v22155_v46  ;;  %20101 = vmatprep.subr.mxu1 %v22155_v46 }
 0x982   :  { %20111 = vmatprep.subr.mxu0 %v22155_v46 }
 0x986   :  { %20079 = vmatmul.mubr.f32.vlgmr.msra.gmra.mrb[12].mxu0 %v22751_v48 }
 0x987   :  { %20099 = vmatmul.mubr.f32.vlgmr.msra.gmra.mrb[14].mxu1 %v6719_v6  ;;  %20113 = vmatprep.mubr.msk.f32.mxu0 %vm22156_vm1, %v22155_v46  ;;  %v8058_v6 = vld [vmem:[%s23771_s4 + $0x8] sm:$0xff] }
 0x988   :  { %20102 = vmatpush3.xpose.msra.mxu1 %v6730_v7  ;;  %20103 = vmatprep.mubr.msk.f32.mxu1 %vm22156_vm1, %v22155_v46  ;;  %v8075_v7 = vand.u32 4294901760, %v8057_v5  ;;  %v8078_v8 = vand.u32 4294901760, %v8058_v6 }
 0x989   :  { %20106 = vmatprep.subr.mxu1 %v22155_v46 }
 0x98a   :  { %v22893_v9 = vpack.c.bf16 %v8078_v8, %v8075_v7  ;;  %v8165_v10 = vsub.f32 %v8057_v5, %v8075_v7  ;;  %v8172_v11 = vsub.f32 %v8058_v6, %v8078_v8 }
 0x98f   :  { %20104 = vmatmul.mubr.f32.vlgmr.msra.gmra.mrb[14].mxu1 %v22778_v1 }
 0x990   :  { %20107 = vmatpush3.xpose.msra.mxu1 %v6652_v3  ;;  %20108 = vmatprep.mubr.msk.f32.mxu1 %vm22156_vm1, %v22155_v46 }
 0x991   :  { %20141 = vmatprep.subr.mxu1 %v22155_v46 }
 0x997   :  { %20109 = vmatmul.mubr.f32.vlgmr.msra.gmra.mrb[14].mxu1 %v22778_v1 }
 0x998   :  { %20143 = vmatprep.mubr.msk.f32.mxu1 %vm22156_vm1, %v22155_v46 }
 0xa2d   :  { %v5733_v12 = vpop.f32.mrb[10].mxu0 }
 0xa2e   :  { %v20020_v13 = vpop.f32.mrb[11].mxu0 }
 0xa2f   :  { %v8060_v13 = vld [vmem:[%s23771_s4 + $0x18] sm:$0xff] }
 0xa3e   :  { %v6185_v14 = vpop.f32.mrb[12].mxu1 }
 0xa3f   :  { %v20050_v15 = vpop.f32.mrb[13].mxu1 }
 0xa40   :  { %v8084_v15 = vand.u32 4294901760, %v8060_v13 }
 0xa59   :  { %v6639_v16 = vpop.f32.mrb[12].mxu0 }
 0xa5a   :  { %v7097_v17 = vmul.f32 0.35355338, %v6639_v16  ;;  %v20080_v18 = vpop.f32.mrb[13].mxu0  ;;  %v8166_v16 = vand.u32 4294901760, %v8165_v10 }
 0xa5c   :  { %v7099_v19 = vsel %vm685_vm2, %v7097_v17, -inf }
 0xa5d   :  { %7100 = vmax.xlane.f32.xlu0 %v7099_v19  ;;  %v8167_v19 = vsub.f32 %v8165_v10, %v8166_v16 }
 0xa6a   :  { %v7093_v20 = vpop.f32.mrb[14].mxu1 }
 0xa6b   :  { %v7098_v21 = vmul.f32 0.35355338, %v7093_v20  ;;  %v20110_v22 = vpop.f32.mrb[15].mxu1 }
 0xa6c   :  { %v8186_v22 = vsub.f32 %v8060_v13, %v8084_v15 }
 0xa6d   :  { %v7102_v23 = vsel %vm685_vm2, %v7098_v21, -inf }
 0xa6e   :  { %7103 = vmax.xlane.f32.xlu1 %v7102_v23  ;;  %v8168_v23 = vand.u32 4294901760, %v8167_v19  ;;  %v132_v19 = vld [vmem:[#allocation7] sm:$0xff] }
 0xa7f   :  { %7121 = vrot.lane.b32.xlu1 %v22406_v50, %s22167_s2 }
 0xa83   :  { %8027 = vrot.lane.b32.xlu1 %v22698_v53, %s22151_s26 }
 0xa87   :  { %8029 = vrot.lane.b32.xlu1 %v22700_v55, %s22151_s26 }
 0xa8b   :  { %8037 = vrot.lane.b32.xlu1 %v6185_v14, %s22168_s29 }
 0xaea   :  { %v7101_v24 = vpop.xlane.xlu0 %7100 }
 0xaeb   :  { %v7105_v25 = vsub.f32 %v7097_v17, %v7101_v24  ;;  %v8173_v17 = vand.u32 4294901760, %v8172_v11 }
 0xaed   :  { %v7107_v26 = vmul.f32 1.442695, %v7105_v25  ;;  %v8174_v20 = vsub.f32 %v8172_v11, %v8173_v17 }
 0xaef   :  { %21930 = vpow2.f32 %v7107_v26  ;;  %v8175_v24 = vand.u32 4294901760, %v8174_v20  ;;  %v8187_v26 = vand.u32 4294901760, %v8186_v22 }
 0xaf9   :  { %v21931_v27 = vpop.eup %21930 }
 0xafa   :  { %v7111_v28 = vsel %vm685_vm2, %v21931_v27, 0.0 }
 0xafb   :  { %7112 = vadd.xlane.f32.xlu0 %v7111_v28  ;;  %v7104_v30 = vpop.xlane.xlu1 %7103 }
 0xafc   :  { %v7106_v32 = vsub.f32 %v7098_v21, %v7104_v30 }
 0xafe   :  { %v7109_v50 = vmul.f32 1.442695, %v7106_v32  ;;  %v8188_v32 = vsub.f32 %v8186_v22, %v8187_v26 }
 0xaff   :  { %v7122_v33 = vpop.permute.xlu1 %7121 }
 0xb00   :  { %21932 = vpow2.f32 %v7109_v50  ;;  %v22845_v53 = vand.u32 4294901760, %v7122_v33 }
 0xb02   :  { %20112 = vmatpush3.msra.mxu0 %v22845_v53  ;;  %v7205_v37 = vsub.f32 %v7122_v33, %v22845_v53 }
 0xb03   :  { %20116 = vmatprep.subr.mxu0 %v22155_v46 }
 0xb04   :  { %v7206_v41 = vand.u32 4294901760, %v7205_v37 }
 0xb06   :  { %v7207_v45 = vsub.f32 %v7205_v37, %v7206_v41 }
 0xb08   :  { %v7208_v52 = vand.u32 4294901760, %v7207_v45 }
 0xb0a   :  { %v21933_v55 = vpop.eup %21932 }
 0xb0b   :  { %v7114_v34 = vsel %vm685_vm2, %v21933_v55, 0.0 }
 0xb0c   :  { %7115 = vadd.xlane.f32.xlu0 %v7114_v34  ;;  %v21159_v34 = vpack.c.bf16 %v8172_v11, %v8165_v10 }
 0xb22   :  { %7573 = vrot.lane.b32.xlu0 %v22410_v51, %s22167_s2 }
 0xb26   :  { %8035 = vrot.lane.b32.xlu0 %v5733_v12, %s22168_s29  ;;  %v8059_v12 = vld [vmem:[%s23771_s4 + $0x10] sm:$0xff]  ;;  %s18944_s4 = sshll.u32 %s22170_s18, 4  ;;  %s18945_s4 = int_to_ptr.vmem [resolvable:$true] %s18944_s4 }
 0xb27   :  { %v8081_v14 = vand.u32 4294901760, %v8059_v12  ;;  %p22123_p13 = scmp.lt.s32.totalorder %s18945_s4, %s18945_s4 }
 0xb29   :  { %v22903_v18 = vpack.c.bf16 %v8084_v15, %v8081_v14  ;;  %v8179_v21 = vsub.f32 %v8059_v12, %v8081_v14 }
 0xb2b   :  { %v8180_v25 = vand.u32 4294901760, %v8179_v21 }
 0xb2d   :  { %v8181_v28 = vsub.f32 %v8179_v21, %v8180_v25 }
 0xb2f   :  { %v8182_v33 = vand.u32 4294901760, %v8181_v28 }
 0xb88   :  { %v7113_v35 = vpop.xlane.xlu0 %7112 }
 0xb89   :  { %21934 = vrcp.f32 %v7113_v35  ;;  %v21163_v35 = vpack.c.bf16 %v8186_v22, %v8179_v21  ;;  %v9222_v22 = vsel %vm147_vm0, %v132_v19, 0 }
 0xb93   :  { %v21935_v36 = vpop.eup %21934 }
 0xb94   :  { %v7119_v38 = vmul.f32 %v21935_v36, %v21931_v27  ;;  %v21151_v27 = vpack.c.bf16 %v8175_v24, %v8168_v23  ;;  %v21175_v36 = vpack.c.bf16 %v8173_v17, %v8166_v16  ;;  %v9210_v17 = vld [vmem:[#allocation9] sm:$0xff]  ;;  %v133_v23 = vld [vmem:[#allocation7 + $0x8] sm:$0xff]  ;;  %v22942_v24 = vand.u32 4294901760, %v9222_v22 }
 0xb95   :  { %v9228_v20 = vand.u32 4294901760, %v9210_v17 }
 0xb96   :  { %v7125_v39 = vsel %vm685_vm2, %v7119_v38, 0  ;;  %v8028_v38 = vpop.permute.xlu1 %8027 }
 0xb97   :  { %v7193_v40 = vand.u32 4294901760, %v7125_v39  ;;  %v22949_v28 = vsub.f32 %v9210_v17, %v9228_v20 }
 0xb99   :  { %v7116_v42 = vpop.xlane.xlu0 %7115  ;;  %v7194_v43 = vsub.f32 %v7125_v39, %v7193_v40 }
 0xb9a   :  { %21936 = vrcp.f32 %v7116_v42 }
 0xb9b   :  { %v7195_v44 = vand.u32 4294901760, %v7194_v43 }
 0xb9d   :  { %v7574_v47 = vpop.permute.xlu0 %7573  ;;  %v7196_v48 = vsub.f32 %v7194_v43, %v7195_v44 }
 0xb9e   :  { %v7580_v51 = vand.u32 4294901760, %v7574_v47 }
 0xb9f   :  { %v7197_v49 = vand.u32 4294901760, %v7196_v48  ;;  %v8030_v48 = vpop.permute.xlu1 %8029 }
 0xba0   :  { %20142 = vmatpush3.msra.mxu1 %v7580_v51  ;;  %v7657_v57 = vsub.f32 %v7574_v47, %v7580_v51 }
 0xba1   :  { %20114 = vmatmul.mubr.f32.vlgmr.msra.gmra.mrb[14].mxu0 %v7197_v49  ;;  %20146 = vmatprep.subr.mxu1 %v22155_v46  ;;  %v8036_v39 = vpop.permute.xlu0 %8035 }
 0xba2   :  { %20117 = vmatpush3.msra.mxu0 %v7208_v52  ;;  %20118 = vmatprep.mubr.msk.f32.mxu0 %vm22156_vm1, %v22155_v46  ;;  %v7658_v60 = vand.u32 4294901760, %v7657_v57 }
 0xba3   :  { %20121 = vmatprep.subr.mxu0 %v22155_v46 }
 0xba4   :  { %v21937_v54 = vpop.eup %21936  ;;  %v7659_v63 = vsub.f32 %v7657_v57, %v7658_v60 }
 0xba5   :  { %v7120_v56 = vmul.f32 %v21937_v54, %v21933_v55  ;;  %v8038_v54 = vpop.permute.xlu1 %8037 }
 0xba6   :  { %v7660_v2 = vand.u32 4294901760, %v7659_v63 }
 0xba7   :  { %v7577_v58 = vsel %vm685_vm2, %v7120_v56, 0  ;;  %v8050_v56 = vsel %vm685_vm2, %v22574_v31, %v8030_v48  ;;  %v18959_v31 = vld [vmem:[%s23772_s5] ss:$0 sm:$0xff] }
 0xba8   :  { %v7645_v59 = vand.u32 4294901760, %v7577_v58 }
 0xba9   :  { %20119 = vmatmul.mubr.f32.vlgmr.msra.gmra.mrb[14].mxu0 %v7193_v40 }
 0xbaa   :  { %20122 = vmatpush3.msra.mxu0 %v7205_v37  ;;  %20123 = vmatprep.mubr.msk.f32.mxu0 %vm22156_vm1, %v22155_v46  ;;  %v7646_v61 = vsub.f32 %v7577_v58, %v7645_v59  ;;  %v21179_v37 = vpack.c.bf16 %v8187_v26, %v8180_v25  ;;  %v9225_v25 = vsel %vm147_vm0, %v133_v23, 0 }
 0xbab   :  { %20126 = vmatprep.subr.mxu0 %v22155_v46 }
 0xbac   :  { %v7647_v62 = vand.u32 4294901760, %v7646_v61 }
 0xbae   :  { %v7648_v0 = vsub.f32 %v7646_v61, %v7647_v62 }
 0xbb0   :  { %v7649_v1 = vand.u32 4294901760, %v7648_v0 }
 0xbb1   :  { %20124 = vmatmul.mubr.f32.vlgmr.msra.gmra.mrb[14].mxu0 %v7194_v43 }
 0xbb2   :  { %20127 = vmatpush3.msra.mxu0 %v22845_v53  ;;  %20144 = vmatmul.mubr.f32.vlgmr.msra.gmra.mrb[16].mxu1 %v7649_v1 }
 0xbb3   :  { %20147 = vmatpush3.msra.mxu1 %v7660_v2  ;;  %20128 = vmatprep.mubr.msk.f32.mxu0 %vm22156_vm1, %v22155_v46 }
 0xbb4   :  { %20131 = vmatprep.subr.mxu0 %v22155_v46  ;;  %20148 = vmatprep.mubr.msk.f32.mxu1 %vm22156_vm1, %v22155_v46 }
 0xbb5   :  { %20151 = vmatprep.subr.mxu1 %v22155_v46 }
 0xbb9   :  { %20129 = vmatmul.mubr.f32.vlgmr.msra.gmra.mrb[14].mxu0 %v7195_v44 }
 0xbba   :  { %20132 = vmatpush3.msra.mxu0 %v7206_v41  ;;  %20149 = vmatmul.mubr.f32.vlgmr.msra.gmra.mrb[16].mxu1 %v7645_v59 }
 0xbbb   :  { %20152 = vmatpush3.msra.mxu1 %v7657_v57  ;;  %20133 = vmatprep.mubr.msk.f32.mxu0 %vm22156_vm1, %v22155_v46 }
 0xbbc   :  { %20136 = vmatprep.subr.mxu0 %v22155_v46  ;;  %20153 = vmatprep.mubr.msk.f32.mxu1 %vm22156_vm1, %v22155_v46 }
 0xbbd   :  { %20156 = vmatprep.subr.mxu1 %v22155_v46 }
 0xbc1   :  { %20134 = vmatmul.mubr.f32.vlgmr.msra.gmra.mrb[14].mxu0 %v7193_v40 }
 0xbc2   :  { %20137 = vmatpush3.msra.mxu0 %v22845_v53  ;;  %20154 = vmatmul.mubr.f32.vlgmr.msra.gmra.mrb[16].mxu1 %v7646_v61  ;;  %v8189_v53 = vand.u32 4294901760, %v8188_v32  ;;  %v9212_v32 = vld [vmem:[#allocation9 + $0x10] sm:$0xff] }
 0xbc3   :  { %20157 = vmatpush3.msra.mxu1 %v7580_v51  ;;  %20138 = vmatprep.mubr.msk.f32.mxu0 %vm22156_vm1, %v22155_v46 }
 0xbc4   :  { %20158 = vmatprep.mubr.msk.f32.mxu1 %vm22156_vm1, %v22155_v46  ;;  %20161 = vmatprep.subr.mxu1 %v22155_v46  ;;  %v21155_v55 = vpack.c.bf16 %v8189_v53, %v8182_v33  ;;  %v22954_v33 = vsub.f32 %v9222_v22, %v22942_v24  ;;  %v9234_v53 = vand.u32 4294901760, %v9212_v32 }
 0xbc5   :  { %21144 = vmatprep.subr.bf16.mxu0 %v22893_v9 }
 0xbc9   :  { %20139 = vmatmul.mubr.f32.vlgmr.msra.gmra.mrb[14].mxu0 %v7193_v40  ;;  %v8049_v40 = vsel %vm685_vm2, %v22572_v29, %v8028_v38  ;;  %v8053_v29 = vsel %vm8051_vm4, %v8050_v56, %v8038_v54 }
 0xbca   :  { %20159 = vmatmul.mubr.f32.vlgmr.msra.gmra.mrb[16].mxu1 %v7647_v62  ;;  %21146 = vmatpush3.bf16.msra.mxu0 %v22893_v9  ;;  %v8052_v41 = vsel %vm8051_vm4, %v8049_v40, %v8036_v39 }
 0xbcb   :  { %20162 = vmatpush3.msra.mxu1 %v7658_v60  ;;  %20163 = vmatprep.mubr.msk.f32.mxu1 %vm22156_vm1, %v22155_v46 }
 0xbcc   :  { %20166 = vmatprep.subr.mxu1 %v22155_v46  ;;  %21148 = vmatprep.subr.bf16.mxu0 %v22903_v18 }
 0xbce   :  { %21150 = vmatpush3.bf16.msra.mxu0 %v22903_v18 }
 0xbcf   :  { %21152 = vmatprep.subr.bf16.mxu0 %v21151_v27 }
 0xbd2   :  { %20164 = vmatmul.mubr.f32.vlgmr.msra.gmra.mrb[16].mxu1 %v7645_v59 }
 0xbd3   :  { %20167 = vmatpush3.msra.mxu1 %v7580_v51  ;;  %20168 = vmatprep.mubr.msk.f32.mxu1 %vm22156_vm1, %v22155_v46 }
 0xbda   :  { %20169 = vmatmul.mubr.f32.vlgmr.msra.gmra.mrb[16].mxu1 %v7645_v59 }
 0xc9c   :  { %v7569_v3 = vpop.f32.mrb[14].mxu0 }
 0xc9d   :  { %8043 = vrot.lane.b32.xlu0 %v7569_v3, %s22169_s22  ;;  %v20140_v4 = vpop.f32.mrb[15].mxu0 }
 0xcad   :  { %v8021_v30 = vpop.f32.mrb[16].mxu1 }
 0xcae   :  { %8045 = vrot.lane.b32.xlu1 %v8021_v30, %s22169_s22  ;;  %v20170_v50 = vpop.f32.mrb[17].mxu1 }
 0xcaf   :  { %v9213_v50 = vld [vmem:[#allocation9 + $0x18] sm:$0xff] }
 0xd0f   :  { %v8044_v42 = vpop.permute.xlu0 %8043 }
 0xd10   :  { %v8055_v43 = vsel %vm8054_vm3, %v8052_v41, %v8044_v42  ;;  %v9332_v41 = vsub.f32 %v9212_v32, %v9234_v53 }
 0xd11   :  { %v8069_v44 = vsel %vm147_vm0, %v8055_v43, 0 }
 0xd12   :  { %v8143_v45 = vand.u32 4294901760, %v8069_v44  ;;  %v9333_v48 = vand.u32 4294901760, %v9332_v41 }
 0xd14   :  { %v8144_v47 = vsub.f32 %v8069_v44, %v8143_v45  ;;  %v9334_v56 = vsub.f32 %v9332_v41, %v9333_v48 }
 0xd16   :  { %v8145_v51 = vand.u32 4294901760, %v8144_v47 }
 0xd18   :  { %v8146_v49 = vsub.f32 %v8144_v47, %v8145_v51 }
 0xd1a   :  { %v8147_v52 = vand.u32 4294901760, %v8146_v49 }
 0xd1c   :  { %20179 = vmatprep.mubr.f32.mxu0 %v8147_v52 }
 0xd20   :  { %v8046_v57 = vpop.permute.xlu1 %8045 }
 0xd21   :  { %v8056_v58 = vsel %vm8054_vm3, %v8053_v29, %v8046_v57 }
 0xd22   :  { %v8072_v59 = vsel %vm147_vm0, %v8056_v58, 0  ;;  %v9335_v58 = vand.u32 4294901760, %v9334_v56 }
 0xd23   :  { %v8153_v60 = vand.u32 4294901760, %v8072_v59 }
 0xd25   :  { %v8154_v61 = vsub.f32 %v8072_v59, %v8153_v60 }
 0xd27   :  { %v8155_v62 = vand.u32 4294901760, %v8154_v61 }
 0xd29   :  { %v8156_v63 = vsub.f32 %v8154_v61, %v8155_v62 }
 0xd2b   :  { %v8157_v0 = vand.u32 4294901760, %v8156_v63  ;;  %v8666_v63 = vld [vmem:[%s23773_s6 + $0x8] sm:$0xff] }
 0xd2d   :  { %20180 = vmatmul.mubr.f32.vlgmr.msra.gmra.mrb[16].mxu0 %v8157_v0  ;;  %v8667_v0 = vld [vmem:[%s23773_s6 + $0x10] sm:$0xff] }
 0xd2e   :  { %21154 = vmatpush3.bf16.msra.mxu0 %v21151_v27  ;;  %20190 = vmatprep.mubr.f32.mxu0 %v8143_v45  ;;  %v22947_v27 = vand.u32 4294901760, %v9225_v25 }
 0xd2f   :  { %21156 = vmatprep.subr.bf16.mxu0 %v21155_v55 }
 0xd32   :  { %21158 = vmatpush3.bf16.msra.mxu0 %v21155_v55  ;;  %v9237_v55 = vand.u32 4294901760, %v9213_v50 }
 0xd33   :  { %21160 = vmatprep.subr.bf16.mxu0 %v21159_v34 }
 0xd34   :  { %v22964_v38 = vpack.c.bf16 %v9237_v55, %v9234_v53  ;;  %v9339_v44 = vsub.f32 %v9213_v50, %v9237_v55 }
 0xd35   :  { %20191 = vmatmul.mubr.f32.vlgmr.msra.gmra.mrb[16].mxu0 %v8153_v60 }
 0xd36   :  { %21162 = vmatpush3.bf16.msra.mxu0 %v21159_v34  ;;  %20201 = vmatprep.mubr.f32.mxu0 %v8144_v47  ;;  %v22958_v34 = vsub.f32 %v9225_v25, %v22947_v27  ;;  %v9340_v52 = vand.u32 4294901760, %v9339_v44 }
 0xd37   :  { %21164 = vmatprep.subr.bf16.mxu0 %v21163_v35 }
 0xd38   :  { %v9308_v39 = vand.u32 4294901760, %v22958_v34  ;;  %v9341_v57 = vsub.f32 %v9339_v44, %v9340_v52 }
 0xd3a   :  { %21166 = vmatpush3.bf16.msra.mxu0 %v21163_v35  ;;  %v9319_v35 = vand.u32 4294901760, %v22949_v28  ;;  %v9342_v59 = vand.u32 4294901760, %v9341_v57 }
 0xd3b   :  { %21168 = vmatprep.subr.bf16.mxu0 %v22893_v9 }
 0xd3c   :  { %v9320_v40 = vsub.f32 %v22949_v28, %v9319_v35 }
 0xd3d   :  { %20202 = vmatmul.mubr.f32.vlgmr.msra.gmra.mrb[16].mxu0 %v8154_v61 }
 0xd3e   :  { %21170 = vmatpush3.bf16.msra.mxu0 %v22893_v9  ;;  %20212 = vmatprep.mubr.f32.mxu0 %v8145_v51  ;;  %v9321_v47 = vand.u32 4294901760, %v9320_v40 }
 0xd3f   :  { %21172 = vmatprep.subr.bf16.mxu0 %v22903_v18 }
 0xd42   :  { %21174 = vmatpush3.bf16.msra.mxu0 %v22903_v18 }
 0xd43   :  { %21176 = vmatprep.subr.bf16.mxu0 %v21175_v36 }
 0xd45   :  { %20213 = vmatmul.mubr.f32.vlgmr.msra.gmra.mrb[16].mxu0 %v8155_v62  ;;  %v8665_v62 = vld [vmem:[%s23773_s6] sm:$0xff] }
 0xd46   :  { %21178 = vmatpush3.bf16.msra.mxu0 %v21175_v36  ;;  %20223 = vmatprep.mubr.f32.mxu0 %v8143_v45  ;;  %v9298_v36 = vand.u32 4294901760, %v22954_v33 }
 0xd47   :  { %21180 = vmatprep.subr.bf16.mxu0 %v21179_v37 }
 0xd48   :  { %v9299_v42 = vsub.f32 %v22954_v33, %v9298_v36 }
 0xd4a   :  { %21182 = vmatpush3.bf16.msra.mxu0 %v21179_v37  ;;  %v9300_v51 = vand.u32 4294901760, %v9299_v42 }
 0xd4b   :  { %21184 = vmatprep.subr.bf16.mxu0 %v22893_v9 }
 0xd4d   :  { %20224 = vmatmul.mubr.f32.vlgmr.msra.gmra.mrb[16].mxu0 %v8153_v60 }
 0xd4e   :  { %21186 = vmatpush3.bf16.msra.mxu0 %v22893_v9  ;;  %20234 = vmatprep.mubr.f32.mxu0 %v8143_v45  ;;  %v9309_v45 = vsub.f32 %v22958_v34, %v9308_v39 }
 0xd4f   :  { %21188 = vmatprep.subr.bf16.mxu0 %v22903_v18 }
 0xd50   :  { %v9310_v54 = vand.u32 4294901760, %v9309_v45 }
 0xd52   :  { %21190 = vmatpush3.bf16.msra.mxu0 %v22903_v18  ;;  %v9211_v18 = vld [vmem:[#allocation9 + $0x8] sm:$0xff] }
 0xd53   :  { %v9231_v21 = vand.u32 4294901760, %v9211_v18 }
 0xd55   :  { %20235 = vmatmul.mubr.f32.vlgmr.msra.gmra.mrb[16].mxu0 %v8153_v60  ;;  %v22945_v26 = vpack.c.bf16 %v9231_v21, %v9228_v20  ;;  %v22951_v30 = vsub.f32 %v9211_v18, %v9231_v21  ;;  %v21251_v60 = vpack.c.bf16 %v9342_v59, %v9335_v58 }
 0xd56   :  { %20311 = vmatprep.mubr.f32.mxu0 %v9300_v51 }
 0xd57   :  { %21240 = vmatprep.subr.bf16.mxu0 %v22945_v26  ;;  %v9326_v37 = vand.u32 4294901760, %v22951_v30  ;;  %v21255_v61 = vpack.c.bf16 %v22951_v30, %v22949_v28 }
 0xd58   :  { %21242 = vmatpush3.bf16.msra.mxu0 %v22945_v26 }
 0xd59   :  { %v9327_v43 = vsub.f32 %v22951_v30, %v9326_v37  ;;  %21244 = vmatprep.subr.bf16.mxu0 %v22964_v38 }
 0xd5b   :  { %v9328_v49 = vand.u32 4294901760, %v9327_v43 }
 0xd5c   :  { %21246 = vmatpush3.bf16.msra.mxu0 %v22964_v38 }
 0xd5d   :  { %v21247_v29 = vpack.c.bf16 %v9328_v49, %v9321_v47 }
 0xd5f   :  { %20312 = vmatmul.mubr.f32.vlgmr.msra.gmra.mrb[18].mxu0 %v9310_v54  ;;  %21248 = vmatprep.subr.bf16.mxu0 %v21247_v29 }
 0xd60   :  { %20322 = vmatprep.mubr.f32.mxu0 %v22942_v24  ;;  %21250 = vmatpush3.bf16.msra.mxu0 %v21247_v29 }
 0xd61   :  { %21252 = vmatprep.subr.bf16.mxu0 %v21251_v60 }
 0xd64   :  { %21254 = vmatpush3.bf16.msra.mxu0 %v21251_v60 }
 0xd65   :  { %21256 = vmatprep.subr.bf16.mxu0 %v21255_v61 }
 0xd67   :  { %20323 = vmatmul.mubr.f32.vlgmr.msra.gmra.mrb[18].mxu0 %v22947_v27 }
 0xd68   :  { %21258 = vmatpush3.bf16.msra.mxu0 %v21255_v61  ;;  %20333 = vmatprep.mubr.f32.mxu0 %v22954_v33 }
 0xe28   :  { %v20236_v1 = vpop.f32.mrb[16].mxu0 }
 0xe29   :  { %v21481_v2 = vadd.f32 %v20236_v1, %v18959_v31  ;;  %v8592_v3 = vpop.f32.mrb[17].mxu0  ;;  %v8686_v1 = vand.u32 4294901760, %v8666_v63 }
 0xe2a   :  { %v21482_v4 = vadd.f32 %v18959_v31, %v8592_v3  ;;  %v8683_v31 = vand.u32 4294901760, %v8665_v62  ;;  %v8689_v3 = vand.u32 4294901760, %v8667_v0 }
 0xe2b   :  { %v8605_v5 = vsel %vm147_vm0, %v21481_v2, 0.0 }
 0xe2c   :  { %8606 = vadd.xlane.f32.xlu1 %v8605_v5  ;;  %v8602_v6 = vsel %vm147_vm0, %v21482_v4, 0.0  ;;  %v8787_v18 = vsub.f32 %v8667_v0, %v8689_v3 }
 0xe2d   :  { %8603 = vadd.xlane.f32.xlu0 %v8602_v6  ;;  %v22988_v6 = vpack.c.bf16 %v8686_v1, %v8683_v31 }
 0xe2e   :  { %v8788_v22 = vand.u32 4294901760, %v8787_v18 }
 0xe2f   :  { %21192 = vmatprep.subr.bf16.mxu1 %v22988_v6 }
 0xe30   :  { %21194 = vmatpush3.bf16.msra.mxu1 %v22988_v6  ;;  %v8789_v28 = vsub.f32 %v8787_v18, %v8788_v22 }
 0xeb9   :  { %v8607_v7 = vpop.xlane.xlu1 %8606 }
 0xeba   :  { %v8610_v8 = vmul.f32 0.03125, %v8607_v7  ;;  %v8604_v9 = vpop.xlane.xlu0 %8603 }
 0xebb   :  { %v8609_v10 = vmul.f32 0.03125, %v8604_v9  ;;  %v21275_v9 = vpack.c.bf16 %v9340_v52, %v9333_v48 }
 0xebc   :  { %v22931_v11 = vsub.f32 %v21481_v2, %v8610_v8  ;;  %v8668_v2 = vld [vmem:[%s23773_s6 + $0x18] sm:$0xff]  ;;  %v21271_v8 = vpack.c.bf16 %v9326_v37, %v9319_v35 }
 0xebd   :  { %v22933_v12 = vsub.f32 %v21482_v4, %v8609_v10  ;;  %v21259_v4 = vpack.c.bf16 %v9339_v44, %v9332_v41  ;;  %v8692_v5 = vand.u32 4294901760, %v8668_v2  ;;  %v8773_v10 = vsub.f32 %v8665_v62, %v8683_v31 }
 0xebe   :  { %v8614_v15 = vmul.f32 %v22931_v11, %v22931_v11 }
 0xebf   :  { %v8613_v13 = vmul.f32 %v22933_v12, %v22933_v12  ;;  %v22991_v7 = vpack.c.bf16 %v8692_v5, %v8689_v3  ;;  %21260 = vmatprep.subr.bf16.mxu0 %v21259_v4  ;;  %v8794_v19 = vsub.f32 %v8668_v2, %v8692_v5  ;;  %v23037_v2 = vstv %s23783_s16  ;;  %v22006_v3 = vld [vmem:[#allocation4] sm:$0xff]  ;;  %s22118_s16 = scalar_lea.vmem %s18945_s4, 256 }
 0xec0   :  { %v8618_v16 = vsel %vm147_vm0, %v8614_v15, 0.0  ;;  %21262 = vmatpush3.bf16.msra.mxu0 %v21259_v4  ;;  %p22119_p12 = scmp.ne.s32.totalorder %s18945_s4, %s22118_s16  ;;  %p22124_p0 = scmp.lt.s32.totalorder %s22118_s16, %s22118_s16 }
 0xec1   :  { %v8615_v14 = vsel %vm147_vm0, %v8613_v13, 0.0  ;;  %21196 = vmatprep.subr.bf16.mxu1 %v22991_v7  ;;  %21264 = vmatprep.subr.bf16.mxu0 %v22945_v26  ;;  %v8780_v13 = vsub.f32 %v8666_v63, %v8686_v1  ;;  %v8795_v23 = vand.u32 4294901760, %v8794_v19  ;;  %v23021_v33 = vpack.c.bf16 %v8794_v19, %v8787_v18 }
 0xec2   :  { %8616 = vadd.xlane.f32.xlu0 %v8615_v14  ;;  %21198 = vmatpush3.bf16.msra.mxu1 %v22991_v7  ;;  %v8774_v14 = vand.u32 4294901760, %v8773_v10  ;;  %v23030_v63 = vstv %s23784_s17  ;;  %p22125_p1 = por %p22124_p0, %p22123_p13 }
 0xec3   :  { %20334 = vmatmul.mubr.f32.vlgmr.msra.gmra.mrb[18].mxu0 %v22958_v34  ;;  %v8781_v15 = vand.u32 4294901760, %v8780_v13  ;;  %v8796_v30 = vsub.f32 %v8794_v19, %v8795_v23  ;;  %v23019_v50 = vpack.c.bf16 %v8780_v13, %v8773_v10  ;;  %v23025_v55 = vpack.c.bf16 %v8795_v23, %v8788_v22 }
 0xec4   :  { %21266 = vmatpush3.bf16.msra.mxu0 %v22945_v26  ;;  %20344 = vmatprep.mubr.f32.mxu0 %v9298_v36  ;;  %p22126_p2 = pnand %p22125_p1, %p22119_p12 }
 0xec5   :  { %21268 = vmatprep.subr.bf16.mxu0 %v22964_v38  ;;  %v8782_v17 = vsub.f32 %v8780_v13, %v8781_v15  ;;  %v23023_v53 = vpack.c.bf16 %v8781_v15, %v8774_v14 }
 0xec6   :  { %8619 = vadd.xlane.f32.xlu0 %v8618_v16  ;;  %v8775_v16 = vsub.f32 %v8773_v10, %v8774_v14  ;;  %v22007_v10 = vld [vmem:[#allocation4 + $0x8] sm:$0xff] }
 0xec7   :  { %v8783_v21 = vand.u32 4294901760, %v8782_v17 }
 0xec8   :  { %21270 = vmatpush3.bf16.msra.mxu0 %v22964_v38  ;;  %v8776_v20 = vand.u32 4294901760, %v8775_v16 }
 0xec9   :  { %21272 = vmatprep.subr.bf16.mxu0 %v21271_v8 }
 0xeca   :  { %v23010_v25 = vpack.c.bf16 %v8783_v21, %v8776_v20 }
 0xecb   :  { %20345 = vmatmul.mubr.f32.vlgmr.msra.gmra.mrb[18].mxu0 %v9308_v39 }
 0xecc   :  { %21274 = vmatpush3.bf16.msra.mxu0 %v21271_v8  ;;  %20355 = vmatprep.mubr.f32.mxu0 %v22942_v24 }
 0xecd   :  { %21276 = vmatprep.subr.bf16.mxu0 %v21275_v9  ;;  %21200 = vmatprep.subr.bf16.mxu1 %v23010_v25 }
 0xed0   :  { %21278 = vmatpush3.bf16.msra.mxu0 %v21275_v9 }
 0xed1   :  { %21280 = vmatprep.subr.bf16.mxu0 %v22945_v26 }
 0xed3   :  { %20356 = vmatmul.mubr.f32.vlgmr.msra.gmra.mrb[18].mxu0 %v22947_v27 }
 0xed4   :  { %21282 = vmatpush3.bf16.msra.mxu0 %v22945_v26  ;;  %20366 = vmatprep.mubr.f32.mxu0 %v22942_v24  ;;  %v8790_v24 = vand.u32 4294901760, %v8789_v28  ;;  %v8797_v26 = vand.u32 4294901760, %v8796_v30 }
 0xed5   :  { %21284 = vmatprep.subr.bf16.mxu0 %v22964_v38 }
 0xed6   :  { %v23017_v32 = vpack.c.bf16 %v8797_v26, %v8790_v24 }
 0xed8   :  { %21286 = vmatpush3.bf16.msra.mxu0 %v22964_v38 }
 0xed9   :  { %20429 = vmatprep.subr.mxu0 %v22155_v46 }
 0xedb   :  { %20367 = vmatmul.mubr.f32.vlgmr.msra.gmra.mrb[18].mxu0 %v22947_v27 }
 0xedc   :  { %20431 = vmatprep.mubr.msk.f32.mxu0 %vm22156_vm1, %v22155_v46 }
 0xf4f   :  { %v8617_v34 = vpop.xlane.xlu0 %8616 }
 0xf50   :  { %v8621_v35 = vmul.f32 0.032258064, %v8617_v34 }
 0xf52   :  { %21938 = vrsqrt.f32 %v8621_v35  ;;  %vm8625_vm5 = vcmp.eq.f32.partialorder %v8621_v35, inf  ;;  %v8628_v39 = vand.u32 2147483648, %v8621_v35  ;;  %vm8627_vm6 = vcmp.eq.f32.partialorder %v8621_v35, 0.0 }
 0xf53   :  { %v8620_v36 = vpop.xlane.xlu0 %8619 }
 0xf54   :  { %v8622_v37 = vmul.f32 0.032258064, %v8620_v36 }
 0xf56   :  { %21940 = vrsqrt.f32 %v8622_v37  ;;  %vm8632_vm7 = vcmp.eq.f32.partialorder %v8622_v37, inf  ;;  %v8635_v45 = vand.u32 2147483648, %v8622_v37  ;;  %vm8634_vm8 = vcmp.eq.f32.partialorder %v8622_v37, 0.0 }
 0xf5c   :  { %v21939_v27 = vpop.eup %21938 }
 0xf5d   :  { %v8624_v38 = vmul.f32 %v21939_v27, %v8621_v35 }
 0xf5f   :  { %v8626_v40 = vsel %vm8625_vm5, %v8621_v35, %v8624_v38 }
 0xf60   :  { %v21941_v41 = vpop.eup %21940  ;;  %v8629_v42 = vsel %vm8627_vm6, %v8628_v39, %v8626_v40  ;;  %vm18290_vm6 = vcmask 523264  }
 0xf61   :  { %v8637_v43 = vadd.f32 1e-06, %v8629_v42  ;;  %v8631_v44 = vmul.f32 %v21941_v41, %v8622_v37 }
 0xf63   :  { %21942 = vrsqrt.f32 %v8637_v43  ;;  %v8633_v47 = vsel %vm8632_vm7, %v8622_v37, %v8631_v44  ;;  %vm8641_vm9 = vcmp.eq.f32.partialorder %v8637_v43, inf  ;;  %v8644_v54 = vand.u32 2147483648, %v8637_v43 }
 0xf64   :  { %v8636_v48 = vsel %vm8634_vm8, %v8635_v45, %v8633_v47  ;;  %vm8643_vm10 = vcmp.eq.f32.partialorder %v8637_v43, 0.0 }
 0xf65   :  { %v8638_v51 = vadd.f32 1e-06, %v8636_v48 }
 0xf67   :  { %21944 = vrsqrt.f32 %v8638_v51  ;;  %vm8648_vm11 = vcmp.eq.f32.partialorder %v8638_v51, inf  ;;  %v8651_v59 = vand.u32 2147483648, %v8638_v51  ;;  %vm8650_vm12 = vcmp.eq.f32.partialorder %v8638_v51, 0.0 }
 0xf6d   :  { %v21943_v49 = vpop.eup %21942 }
 0xf6e   :  { %v8640_v52 = vmul.f32 %v21943_v49, %v8637_v43 }
 0xf70   :  { %v8642_v56 = vsel %vm8641_vm9, %v8637_v43, %v8640_v52 }
 0xf71   :  { %v21945_v29 = vpop.eup %21944  ;;  %v8645_v57 = vsel %vm8643_vm10, %v8644_v54, %v8642_v56 }
 0xf72   :  { %v8647_v58 = vmul.f32 %v21945_v29, %v8638_v51  ;;  %21946 = vrcp.f32 %v8645_v57 }
 0xf74   :  { %v8649_v60 = vsel %vm8648_vm11, %v8638_v51, %v8647_v58 }
 0xf75   :  { %v8652_v61 = vsel %vm8650_vm12, %v8651_v59, %v8649_v60 }
 0xf76   :  { %21948 = vrcp.f32 %v8652_v61 }
 0xf7c   :  { %v21947_v62 = vpop.eup %21946 }
 0xf7d   :  { %v8655_v0 = vmul.f32 %v21947_v62, %v22933_v12 }
 0xf7f   :  { %v8658_v31 = vmul.f32 %v23030_v63, %v8655_v0 }
 0xf80   :  { %v21949_v1 = vpop.eup %21948 }
 0xf81   :  { %v8660_v4 = vadd.f32 %v22006_v3, %v8658_v31  ;;  %v8656_v5 = vmul.f32 %v21949_v1, %v22931_v11 }
 0xf83   :  { %v23041_v8 = vadd.f32 %v23037_v2, %v8660_v4  ;;  %v8659_v9 = vmul.f32 %v23030_v63, %v8656_v5 }
 0xf85   :  { %v8677_v12 = vsel %vm147_vm0, %v23041_v8, 0  ;;  %v8661_v13 = vadd.f32 %v22007_v10, %v8659_v9 }
 0xf86   :  { %v8751_v14 = vand.u32 4294901760, %v8677_v12 }
 0xf87   :  { %v23047_v15 = vadd.f32 %v23037_v2, %v8661_v13 }
 0xf88   :  { %v8752_v16 = vsub.f32 %v8677_v12, %v8751_v14 }
 0xf89   :  { %v8680_v17 = vsel %vm147_vm0, %v23047_v15, 0 }
 0xf8a   :  { %v8753_v18 = vand.u32 4294901760, %v8752_v16  ;;  %v8761_v11 = vand.u32 4294901760, %v8680_v17 }
 0xf8c   :  { %v8754_v19 = vsub.f32 %v8752_v16, %v8753_v18  ;;  %v8762_v20 = vsub.f32 %v8680_v17, %v8761_v11 }
 0xf8e   :  { %v8755_v21 = vand.u32 4294901760, %v8754_v19  ;;  %v8763_v22 = vand.u32 4294901760, %v8762_v20 }
 0xf90   :  { %20245 = vmatprep.mubr.f32.mxu1 %v8755_v21  ;;  %v8764_v23 = vsub.f32 %v8762_v20, %v8763_v22 }
 0xf92   :  { %v8765_v28 = vand.u32 4294901760, %v8764_v23 }
 0xf94   :  { %20246 = vmatmul.mubr.f32.vlgmr.msra.gmra.mrb[18].mxu1 %v8765_v28 }
 0xf95   :  { %21202 = vmatpush3.bf16.msra.mxu1 %v23010_v25  ;;  %20256 = vmatprep.mubr.f32.mxu1 %v8751_v14  ;;  %v18961_v25 = vld [vmem:[%s23776_s9] ss:$0 sm:$0xff] }
 0xf96   :  { %21204 = vmatprep.subr.bf16.mxu1 %v23017_v32 }
 0xf99   :  { %21206 = vmatpush3.bf16.msra.mxu1 %v23017_v32 }
 0xf9a   :  { %21208 = vmatprep.subr.bf16.mxu1 %v23019_v50 }
 0xf9c   :  { %20257 = vmatmul.mubr.f32.vlgmr.msra.gmra.mrb[18].mxu1 %v8761_v11 }
 0xf9d   :  { %21210 = vmatpush3.bf16.msra.mxu1 %v23019_v50  ;;  %20267 = vmatprep.mubr.f32.mxu1 %v8752_v16  ;;  %v18960_v50 = vld [vmem:[%s23774_s7] ss:$0 sm:$0xff] }
 0xf9e   :  { %21212 = vmatprep.subr.bf16.mxu1 %v23021_v33 }
 0xfa1   :  { %21214 = vmatpush3.bf16.msra.mxu1 %v23021_v33 }
 0xfa2   :  { %21216 = vmatprep.subr.bf16.mxu1 %v22988_v6 }
 0xfa4   :  { %20268 = vmatmul.mubr.f32.vlgmr.msra.gmra.mrb[18].mxu1 %v8762_v20 }
 0xfa5   :  { %21218 = vmatpush3.bf16.msra.mxu1 %v22988_v6  ;;  %20278 = vmatprep.mubr.f32.mxu1 %v8753_v18 }
 0xfa6   :  { %21220 = vmatprep.subr.bf16.mxu1 %v22991_v7 }
 0xfa9   :  { %21222 = vmatpush3.bf16.msra.mxu1 %v22991_v7 }
 0xfaa   :  { %21224 = vmatprep.subr.bf16.mxu1 %v23023_v53 }
 0xfac   :  { %20279 = vmatmul.mubr.f32.vlgmr.msra.gmra.mrb[18].mxu1 %v8763_v22 }
 0xfad   :  { %21226 = vmatpush3.bf16.msra.mxu1 %v23023_v53  ;;  %20289 = vmatprep.mubr.f32.mxu1 %v8751_v14 }
 0xfae   :  { %21228 = vmatprep.subr.bf16.mxu1 %v23025_v55  ;;  %v20368_v30 = vpop.f32.mrb[18].mxu0 }
 0xfaf   :  { %v23076_v24 = vadd.f32 %v20368_v30, %v18961_v25  ;;  %v9745_v26 = vpop.f32.mrb[19].mxu0 }
 0xfb1   :  { %21230 = vmatpush3.bf16.msra.mxu1 %v23025_v55  ;;  %v10211_v45 = vsel %vm685_vm2, %v23076_v24, 0 }
 0xfb2   :  { %21232 = vmatprep.subr.bf16.mxu1 %v22988_v6  ;;  %v10214_v48 = vand.u32 4294901760, %v10211_v45 }
 0xfb4   :  { %20290 = vmatmul.mubr.f32.vlgmr.msra.gmra.mrb[18].mxu1 %v8761_v11  ;;  %v10291_v49 = vsub.f32 %v10211_v45, %v10214_v48 }
 0xfb5   :  { %21234 = vmatpush3.bf16.msra.mxu1 %v22988_v6  ;;  %20300 = vmatprep.mubr.f32.mxu1 %v8751_v14  ;;  %v23078_v6 = vadd.f32 %v18961_v25, %v9745_v26 }
 0xfb6   :  { %21236 = vmatprep.subr.bf16.mxu1 %v22991_v7  ;;  %v10292_v54 = vand.u32 4294901760, %v10291_v49 }
 0xfb7   :  { %v9759_v32 = vsel %vm685_vm2, %v23078_v6, 0 }
 0xfb8   :  { %v10293_v29 = vsub.f32 %v10291_v49, %v10292_v54 }
 0xfb9   :  { %21238 = vmatpush3.bf16.msra.mxu1 %v22991_v7  ;;  %v9762_v7 = vand.u32 4294901760, %v9759_v32 }
 0xfba   :  { %20369 = vmatprep.subr.mxu1 %v22155_v46  ;;  %v10294_v58 = vand.u32 4294901760, %v10293_v29 }
 0xfbb   :  { %v9839_v55 = vsub.f32 %v9759_v32, %v9762_v7 }
 0xfbc   :  { %20301 = vmatmul.mubr.f32.vlgmr.msra.gmra.mrb[18].mxu1 %v8761_v11 }
 0xfbd   :  { %20371 = vmatprep.mubr.msk.f32.mxu1 %vm22156_vm1, %v22155_v46  ;;  %v9840_v37 = vand.u32 4294901760, %v9839_v55 }
 0xfbf   :  { %v9841_v39 = vsub.f32 %v9839_v55, %v9840_v37 }
 0xfc1   :  { %v9842_v42 = vand.u32 4294901760, %v9841_v39 }
 0xfc2   :  { %20370 = vmatpush3.xpose.msra.mxu1 %v9762_v7 }
 0xfc3   :  { %20374 = vmatprep.subr.mxu1 %v22155_v46 }
0x108f   :  { %v20302_v33 = vpop.f32.mrb[18].mxu1 }
0x1090   :  { %v9200_v53 = vpop.f32.mrb[19].mxu1  ;;  %v23099_v43 = vadd.f32 %v20302_v33, %v18960_v50 }
0x1091   :  { %v23086_v34 = vadd.f32 %v18960_v50, %v9200_v53 }
0x1092   :  { %v10208_v44 = vsel %vm685_vm2, %v23099_v43, 0 }
0x1093   :  { %v9756_v35 = vsel %vm685_vm2, %v23086_v34, 0  ;;  %v10279_v47 = vand.u32 4294901760, %v10208_v44 }
0x1094   :  { %v9827_v36 = vand.u32 4294901760, %v9756_v35 }
0x1095   :  { %v10280_v51 = vsub.f32 %v10208_v44, %v10279_v47 }
0x1096   :  { %v9828_v27 = vsub.f32 %v9756_v35, %v9827_v36 }
0x1097   :  { %v10281_v52 = vand.u32 4294901760, %v10280_v51 }
0x1098   :  { %v9829_v38 = vand.u32 4294901760, %v9828_v27 }
0x1099   :  { %v10282_v56 = vsub.f32 %v10280_v51, %v10281_v52 }
0x109a   :  { %v9830_v40 = vsub.f32 %v9828_v27, %v9829_v38 }
0x109b   :  { %v10283_v57 = vand.u32 4294901760, %v10282_v56 }
0x109c   :  { %v9831_v41 = vand.u32 4294901760, %v9830_v40 }
0x109e   :  { %20372 = vmatmul.mubr.f32.vlgmr.msra.gmra.mrb[20].mxu1 %v9831_v41 }
0x109f   :  { %20375 = vmatpush3.xpose.msra.mxu1 %v9842_v42  ;;  %20376 = vmatprep.mubr.msk.f32.mxu1 %vm22156_vm1, %v22155_v46 }
0x10a0   :  { %20379 = vmatprep.subr.mxu1 %v22155_v46 }
0x10a6   :  { %20377 = vmatmul.mubr.f32.vlgmr.msra.gmra.mrb[20].mxu1 %v9827_v36 }
0x10a7   :  { %20380 = vmatpush3.xpose.msra.mxu1 %v9839_v55  ;;  %20381 = vmatprep.mubr.msk.f32.mxu1 %vm22156_vm1, %v22155_v46 }
0x10a8   :  { %20384 = vmatprep.subr.mxu1 %v22155_v46 }
0x10ae   :  { %20382 = vmatmul.mubr.f32.vlgmr.msra.gmra.mrb[20].mxu1 %v9828_v27 }
0x10af   :  { %20385 = vmatpush3.xpose.msra.mxu1 %v9762_v7  ;;  %20386 = vmatprep.mubr.msk.f32.mxu1 %vm22156_vm1, %v22155_v46 }
0x10b0   :  { %20389 = vmatprep.subr.mxu1 %v22155_v46 }
0x10b6   :  { %20387 = vmatmul.mubr.f32.vlgmr.msra.gmra.mrb[20].mxu1 %v9829_v38 }
0x10b7   :  { %20390 = vmatpush3.xpose.msra.mxu1 %v9840_v37  ;;  %20391 = vmatprep.mubr.msk.f32.mxu1 %vm22156_vm1, %v22155_v46 }
0x10b8   :  { %20394 = vmatprep.subr.mxu1 %v22155_v46 }
0x10be   :  { %20392 = vmatmul.mubr.f32.vlgmr.msra.gmra.mrb[20].mxu1 %v9827_v36 }
0x10bf   :  { %20395 = vmatpush3.xpose.msra.mxu1 %v9762_v7  ;;  %20396 = vmatprep.mubr.msk.f32.mxu1 %vm22156_vm1, %v22155_v46 }
0x10c0   :  { %20399 = vmatprep.subr.mxu1 %v22155_v46 }
0x10c6   :  { %20397 = vmatmul.mubr.f32.vlgmr.msra.gmra.mrb[20].mxu1 %v9827_v36 }
0x10c7   :  { %20400 = vmatpush3.xpose.msra.mxu1 %v10214_v48  ;;  %20401 = vmatprep.mubr.msk.f32.mxu1 %vm22156_vm1, %v22155_v46 }
0x10c8   :  { %20404 = vmatprep.subr.mxu1 %v22155_v46 }
0x10ca   :  { %20402 = vmatmul.mubr.f32.vlgmr.msra.gmra.mrb[22].mxu1 %v10283_v57 }
0x10cb   :  { %20405 = vmatpush3.xpose.msra.mxu1 %v10294_v58  ;;  %20406 = vmatprep.mubr.msk.f32.mxu1 %vm22156_vm1, %v22155_v46 }
0x10cc   :  { %20409 = vmatprep.subr.mxu1 %v22155_v46 }
0x10d2   :  { %20407 = vmatmul.mubr.f32.vlgmr.msra.gmra.mrb[22].mxu1 %v10279_v47 }
0x10d3   :  { %20410 = vmatpush3.xpose.msra.mxu1 %v10291_v49  ;;  %20411 = vmatprep.mubr.msk.f32.mxu1 %vm22156_vm1, %v22155_v46 }
0x10d4   :  { %20414 = vmatprep.subr.mxu1 %v22155_v46 }
0x10da   :  { %20412 = vmatmul.mubr.f32.vlgmr.msra.gmra.mrb[22].mxu1 %v10280_v51 }
0x10db   :  { %20415 = vmatpush3.xpose.msra.mxu1 %v10214_v48  ;;  %20416 = vmatprep.mubr.msk.f32.mxu1 %vm22156_vm1, %v22155_v46 }
0x10dc   :  { %20419 = vmatprep.subr.mxu1 %v22155_v46 }
0x10e2   :  { %20417 = vmatmul.mubr.f32.vlgmr.msra.gmra.mrb[22].mxu1 %v10281_v52 }
0x10e3   :  { %20420 = vmatpush3.xpose.msra.mxu1 %v10292_v54  ;;  %20421 = vmatprep.mubr.msk.f32.mxu1 %vm22156_vm1, %v22155_v46 }
0x10e4   :  { %20424 = vmatprep.subr.mxu1 %v22155_v46 }
0x10ea   :  { %20422 = vmatmul.mubr.f32.vlgmr.msra.gmra.mrb[22].mxu1 %v10279_v47 }
0x10eb   :  { %20425 = vmatpush3.xpose.msra.mxu1 %v10214_v48  ;;  %20426 = vmatprep.mubr.msk.f32.mxu1 %vm22156_vm1, %v22155_v46 }
0x10ec   :  { %20459 = vmatprep.subr.mxu1 %v22155_v46 }
0x10f2   :  { %20427 = vmatmul.mubr.f32.vlgmr.msra.gmra.mrb[22].mxu1 %v10279_v47 }
0x10f3   :  { %20461 = vmatprep.mubr.msk.f32.mxu1 %vm22156_vm1, %v22155_v46 }
0x1199   :  { %v10203_v59 = vpop.f32.mrb[20].mxu1 }
0x119a   :  { %v10659_v60 = vmul.f32 0.35355338, %v10203_v59  ;;  %v20398_v61 = vpop.f32.mrb[21].mxu1 }
0x119c   :  { %v10661_v62 = vsel %vm685_vm2, %v10659_v60, -inf }
0x119d   :  { %10662 = vmax.xlane.f32.xlu1 %v10661_v62 }
0x11c5   :  { %v10655_v0 = vpop.f32.mrb[22].mxu1 }
0x11c6   :  { %v10660_v31 = vmul.f32 0.35355338, %v10655_v0  ;;  %v20428_v1 = vpop.f32.mrb[23].mxu1 }
0x11c8   :  { %v10664_v3 = vsel %vm685_vm2, %v10660_v31, -inf }
0x11c9   :  { %10665 = vmax.xlane.f32.xlu0 %v10664_v3 }
0x122a   :  { %v10663_v4 = vpop.xlane.xlu1 %10662 }
0x122b   :  { %v10667_v5 = vsub.f32 %v10659_v60, %v10663_v4 }
0x122d   :  { %v10669_v9 = vmul.f32 1.442695, %v10667_v5 }
0x122f   :  { %21950 = vpow2.f32 %v10669_v9 }
0x1239   :  { %v21951_v12 = vpop.eup %21950 }
0x123a   :  { %v10673_v10 = vsel %vm685_vm2, %v21951_v12, 0.0 }
0x123b   :  { %10674 = vadd.xlane.f32.xlu1 %v10673_v10 }
0x124c   :  { %10683 = vrot.lane.b32.xlu1 %v23078_v6, %s22157_s1 }
0x1250   :  { %11587 = vrot.lane.b32.xlu1 %v23086_v34, %s22160_s15 }
0x1254   :  { %12041 = vrot.lane.b32.xlu1 %v23099_v43, %s22160_s15 }
0x1256   :  { %v10666_v13 = vpop.xlane.xlu0 %10665 }
0x1257   :  { %v10668_v14 = vsub.f32 %v10660_v31, %v10666_v13 }
0x1258   :  { %12043 = vrot.lane.b32.xlu1 %v23076_v24, %s22160_s15 }
0x1259   :  { %v10671_v16 = vmul.f32 1.442695, %v10668_v14 }
0x125b   :  { %21952 = vpow2.f32 %v10671_v16 }
0x1265   :  { %v21953_v17 = vpop.eup %21952 }
0x1266   :  { %v10676_v18 = vsel %vm685_vm2, %v21953_v17, 0.0 }
0x1267   :  { %10677 = vadd.xlane.f32.xlu0 %v10676_v18 }
0x127d   :  { %11135 = vrot.lane.b32.xlu0 %v23076_v24, %s22157_s1 }
0x1281   :  { %11589 = vrot.lane.b32.xlu0 %v23078_v6, %s22160_s15 }
0x12c8   :  { %v10675_v11 = vpop.xlane.xlu1 %10674 }
0x12c9   :  { %21954 = vrcp.f32 %v10675_v11 }
0x12cc   :  { %v10684_v19 = vpop.permute.xlu1 %10683 }
0x12cd   :  { %v10690_v20 = vand.u32 4294901760, %v10684_v19 }
0x12cf   :  { %20430 = vmatpush3.msra.mxu0 %v10690_v20  ;;  %v10767_v23 = vsub.f32 %v10684_v19, %v10690_v20 }
0x12d0   :  { %20434 = vmatprep.subr.mxu0 %v22155_v46  ;;  %v11588_v35 = vpop.permute.xlu1 %11587 }
0x12d1   :  { %v10768_v30 = vand.u32 4294901760, %v10767_v23  ;;  %v11591_v36 = vsel %vm685_vm2, %v11588_v35, 0 }
0x12d2   :  { %v23163_v38 = vand.u32 4294901760, %v11591_v36 }
0x12d3   :  { %v21955_v21 = vpop.eup %21954  ;;  %v10769_v7 = vsub.f32 %v10767_v23, %v10768_v30 }
0x12d4   :  { %v10681_v22 = vmul.f32 %v21955_v21, %v21951_v12  ;;  %v11662_v44 = vsub.f32 %v11591_v36, %v23163_v38  ;;  %v12042_v3 = vpop.permute.xlu1 %12041 }
0x12d5   :  { %v10770_v53 = vand.u32 4294901760, %v10769_v7  ;;  %v12045_v5 = vsel %vm685_vm2, %v12042_v3, 0 }
0x12d6   :  { %v10687_v28 = vsel %vm685_vm2, %v10681_v22, 0  ;;  %v11663_v49 = vand.u32 4294901760, %v11662_v44  ;;  %v12115_v12 = vand.u32 4294901760, %v12045_v5 }
0x12d7   :  { %v10755_v25 = vand.u32 4294901760, %v10687_v28 }
0x12d8   :  { %v11664_v57 = vsub.f32 %v11662_v44, %v11663_v49  ;;  %v12044_v4 = vpop.permute.xlu1 %12043  ;;  %v12116_v13 = vsub.f32 %v12045_v5, %v12115_v12 }
0x12d9   :  { %v10756_v26 = vsub.f32 %v10687_v28, %v10755_v25  ;;  %v12047_v9 = vsel %vm685_vm2, %v12044_v4, 0 }
0x12da   :  { %v11665_v62 = vand.u32 4294901760, %v11664_v57  ;;  %v12050_v10 = vand.u32 4294901760, %v12047_v9  ;;  %v12117_v16 = vand.u32 4294901760, %v12116_v13 }
0x12db   :  { %v10757_v32 = vand.u32 4294901760, %v10756_v26 }
0x12dc   :  { %v12127_v14 = vsub.f32 %v12047_v9, %v12050_v10  ;;  %v12118_v18 = vsub.f32 %v12116_v13, %v12117_v16 }
0x12dd   :  { %v10758_v50 = vsub.f32 %v10756_v26, %v10757_v32 }
0x12de   :  { %v12119_v19 = vand.u32 4294901760, %v12118_v18 }
0x12df   :  { %v10759_v33 = vand.u32 4294901760, %v10758_v50 }
0x12e1   :  { %20432 = vmatmul.mubr.f32.vlgmr.msra.gmra.mrb[20].mxu0 %v10759_v33 }
0x12e2   :  { %20435 = vmatpush3.msra.mxu0 %v10770_v53  ;;  %20436 = vmatprep.mubr.msk.f32.mxu0 %vm22156_vm1, %v22155_v46 }
0x12e3   :  { %20439 = vmatprep.subr.mxu0 %v22155_v46 }
0x12e9   :  { %20437 = vmatmul.mubr.f32.vlgmr.msra.gmra.mrb[20].mxu0 %v10755_v25 }
0x12ea   :  { %20440 = vmatpush3.msra.mxu0 %v10767_v23  ;;  %20441 = vmatprep.mubr.msk.f32.mxu0 %vm22156_vm1, %v22155_v46 }
0x12eb   :  { %20444 = vmatprep.subr.mxu0 %v22155_v46 }
0x12f1   :  { %20442 = vmatmul.mubr.f32.vlgmr.msra.gmra.mrb[20].mxu0 %v10756_v26 }
0x12f2   :  { %20445 = vmatpush3.msra.mxu0 %v10690_v20  ;;  %20446 = vmatprep.mubr.msk.f32.mxu0 %vm22156_vm1, %v22155_v46 }
0x12f3   :  { %20449 = vmatprep.subr.mxu0 %v22155_v46 }
0x12f4   :  { %v10678_v55 = vpop.xlane.xlu0 %10677 }
0x12f5   :  { %21956 = vrcp.f32 %v10678_v55 }
0x12f8   :  { %v11136_v37 = vpop.permute.xlu0 %11135 }
0x12f9   :  { %v23159_v27 = vand.u32 4294901760, %v11136_v37  ;;  %20447 = vmatmul.mubr.f32.vlgmr.msra.gmra.mrb[20].mxu0 %v10757_v32 }
0x12fa   :  { %20450 = vmatpush3.msra.mxu0 %v10768_v30  ;;  %20451 = vmatprep.mubr.msk.f32.mxu0 %vm22156_vm1, %v22155_v46 }
0x12fb   :  { %20460 = vmatpush3.msra.mxu1 %v23159_v27  ;;  %20454 = vmatprep.subr.mxu0 %v22155_v46  ;;  %v11219_v47 = vsub.f32 %v11136_v37, %v23159_v27 }
0x12fc   :  { %v11590_v39 = vpop.permute.xlu0 %11589  ;;  %20464 = vmatprep.subr.mxu1 %v22155_v46 }
0x12fd   :  { %v11593_v40 = vsel %vm685_vm2, %v11590_v39, 0  ;;  %v11220_v54 = vand.u32 4294901760, %v11219_v47 }
0x12fe   :  { %v23169_v41 = vand.u32 4294901760, %v11593_v40 }
0x12ff   :  { %v21957_v42 = vpop.eup %21956  ;;  %v11221_v59 = vsub.f32 %v11219_v47, %v11220_v54 }
0x1300   :  { %v10682_v45 = vmul.f32 %v21957_v42, %v21953_v17  ;;  %v11673_v48 = vsub.f32 %v11593_v40, %v23169_v41  ;;  %v12128_v17 = vand.u32 4294901760, %v12127_v14 }
0x1301   :  { %20452 = vmatmul.mubr.f32.vlgmr.msra.gmra.mrb[20].mxu0 %v10755_v25  ;;  %v11222_v31 = vand.u32 4294901760, %v11221_v59 }
0x1302   :  { %20455 = vmatpush3.msra.mxu0 %v10690_v20  ;;  %20456 = vmatprep.mubr.msk.f32.mxu0 %vm22156_vm1, %v22155_v46  ;;  %v11139_v51 = vsel %vm685_vm2, %v10682_v45, 0  ;;  %v11674_v56 = vand.u32 4294901760, %v11673_v48  ;;  %v12129_v11 = vsub.f32 %v12127_v14, %v12128_v17 }
0x1303   :  { %20489 = vmatprep.subr.mxu0 %v22155_v46  ;;  %v23178_v52 = vand.u32 4294901760, %v11139_v51 }
0x1304   :  { %v11675_v60 = vsub.f32 %v11673_v48, %v11674_v56  ;;  %v12130_v20 = vand.u32 4294901760, %v12129_v11 }
0x1305   :  { %v11208_v29 = vsub.f32 %v11139_v51, %v23178_v52 }
0x1306   :  { %v11676_v1 = vand.u32 4294901760, %v11675_v60 }
0x1307   :  { %v11209_v58 = vand.u32 4294901760, %v11208_v29 }
0x1309   :  { %20457 = vmatmul.mubr.f32.vlgmr.msra.gmra.mrb[20].mxu0 %v10755_v25  ;;  %v11210_v61 = vsub.f32 %v11208_v29, %v11209_v58 }
0x130a   :  { %20490 = vmatpush3.xpose.msra.mxu0 %v23169_v41  ;;  %20491 = vmatprep.mubr.msk.f32.mxu0 %vm22156_vm1, %v22155_v46 }
0x130b   :  { %20494 = vmatprep.subr.mxu0 %v22155_v46  ;;  %v11211_v0 = vand.u32 4294901760, %v11210_v61 }
0x130d   :  { %20462 = vmatmul.mubr.f32.vlgmr.msra.gmra.mrb[24].mxu1 %v11211_v0  ;;  %20492 = vmatmul.mubr.f32.vlgmr.msra.gmra.mrb[22].mxu0 %v11665_v62 }
0x130e   :  { %20465 = vmatpush3.msra.mxu1 %v11222_v31  ;;  %20495 = vmatpush3.xpose.msra.mxu0 %v11676_v1 }
0x130f   :  { %20466 = vmatprep.mubr.msk.f32.mxu1 %vm22156_vm1, %v22155_v46  ;;  %20469 = vmatprep.subr.mxu1 %v22155_v46 }
0x1310   :  { %20496 = vmatprep.mubr.msk.f32.mxu0 %vm22156_vm1, %v22155_v46  ;;  %20499 = vmatprep.subr.mxu0 %v22155_v46 }
0x1315   :  { %20467 = vmatmul.mubr.f32.vlgmr.msra.gmra.mrb[24].mxu1 %v23178_v52  ;;  %20497 = vmatmul.mubr.f32.vlgmr.msra.gmra.mrb[22].mxu0 %v23163_v38 }
0x1316   :  { %20470 = vmatpush3.msra.mxu1 %v11219_v47  ;;  %20500 = vmatpush3.xpose.msra.mxu0 %v11673_v48 }
0x1317   :  { %20471 = vmatprep.mubr.msk.f32.mxu1 %vm22156_vm1, %v22155_v46  ;;  %20474 = vmatprep.subr.mxu1 %v22155_v46 }
0x1318   :  { %20501 = vmatprep.mubr.msk.f32.mxu0 %vm22156_vm1, %v22155_v46  ;;  %20504 = vmatprep.subr.mxu0 %v22155_v46 }
0x131d   :  { %20472 = vmatmul.mubr.f32.vlgmr.msra.gmra.mrb[24].mxu1 %v11208_v29  ;;  %20502 = vmatmul.mubr.f32.vlgmr.msra.gmra.mrb[22].mxu0 %v11662_v44 }
0x131e   :  { %20475 = vmatpush3.msra.mxu1 %v23159_v27  ;;  %20505 = vmatpush3.xpose.msra.mxu0 %v23169_v41 }
0x131f   :  { %20476 = vmatprep.mubr.msk.f32.mxu1 %vm22156_vm1, %v22155_v46  ;;  %20479 = vmatprep.subr.mxu1 %v22155_v46 }
0x1320   :  { %20506 = vmatprep.mubr.msk.f32.mxu0 %vm22156_vm1, %v22155_v46  ;;  %20509 = vmatprep.subr.mxu0 %v22155_v46 }
0x1325   :  { %20477 = vmatmul.mubr.f32.vlgmr.msra.gmra.mrb[24].mxu1 %v11209_v58  ;;  %20507 = vmatmul.mubr.f32.vlgmr.msra.gmra.mrb[22].mxu0 %v11663_v49 }
0x1326   :  { %20480 = vmatpush3.msra.mxu1 %v11220_v54  ;;  %20510 = vmatpush3.xpose.msra.mxu0 %v11674_v56 }
0x1327   :  { %20481 = vmatprep.mubr.msk.f32.mxu1 %vm22156_vm1, %v22155_v46  ;;  %20484 = vmatprep.subr.mxu1 %v22155_v46 }
0x1328   :  { %20511 = vmatprep.mubr.msk.f32.mxu0 %vm22156_vm1, %v22155_v46  ;;  %20514 = vmatprep.subr.mxu0 %v22155_v46 }
0x132d   :  { %20482 = vmatmul.mubr.f32.vlgmr.msra.gmra.mrb[24].mxu1 %v23178_v52  ;;  %20512 = vmatmul.mubr.f32.vlgmr.msra.gmra.mrb[22].mxu0 %v23163_v38 }
0x132e   :  { %20485 = vmatpush3.msra.mxu1 %v23159_v27  ;;  %20515 = vmatpush3.xpose.msra.mxu0 %v23169_v41 }
0x132f   :  { %20486 = vmatprep.mubr.msk.f32.mxu1 %vm22156_vm1, %v22155_v46  ;;  %20516 = vmatprep.mubr.msk.f32.mxu0 %vm22156_vm1, %v22155_v46 }
0x1330   :  { %20519 = vmatprep.subr.mxu1 %v22155_v46  ;;  %20549 = vmatprep.subr.mxu0 %v22155_v46 }
0x1335   :  { %20487 = vmatmul.mubr.f32.vlgmr.msra.gmra.mrb[24].mxu1 %v23178_v52  ;;  %20517 = vmatmul.mubr.f32.vlgmr.msra.gmra.mrb[22].mxu0 %v23163_v38 }
0x1336   :  { %20520 = vmatpush3.xpose.msra.mxu1 %v12050_v10  ;;  %20521 = vmatprep.mubr.msk.f32.mxu1 %vm22156_vm1, %v22155_v46 }
0x1337   :  { %20524 = vmatprep.subr.mxu1 %v22155_v46  ;;  %20551 = vmatprep.mubr.msk.f32.mxu0 %vm22156_vm1, %v22155_v46 }
0x1339   :  { %20522 = vmatmul.mubr.f32.vlgmr.msra.gmra.mrb[26].mxu1 %v12119_v19 }
0x133a   :  { %20525 = vmatpush3.xpose.msra.mxu1 %v12130_v20  ;;  %20526 = vmatprep.mubr.msk.f32.mxu1 %vm22156_vm1, %v22155_v46 }
0x133b   :  { %20529 = vmatprep.subr.mxu1 %v22155_v46 }
0x1341   :  { %20527 = vmatmul.mubr.f32.vlgmr.msra.gmra.mrb[26].mxu1 %v12115_v12 }
0x1342   :  { %20530 = vmatpush3.xpose.msra.mxu1 %v12127_v14  ;;  %20531 = vmatprep.mubr.msk.f32.mxu1 %vm22156_vm1, %v22155_v46 }
0x1343   :  { %20534 = vmatprep.subr.mxu1 %v22155_v46 }
0x1349   :  { %20532 = vmatmul.mubr.f32.vlgmr.msra.gmra.mrb[26].mxu1 %v12116_v13 }
0x134a   :  { %20535 = vmatpush3.xpose.msra.mxu1 %v12050_v10  ;;  %20536 = vmatprep.mubr.msk.f32.mxu1 %vm22156_vm1, %v22155_v46 }
0x134b   :  { %20539 = vmatprep.subr.mxu1 %v22155_v46 }
0x1351   :  { %20537 = vmatmul.mubr.f32.vlgmr.msra.gmra.mrb[26].mxu1 %v12117_v16 }
0x1352   :  { %20540 = vmatpush3.xpose.msra.mxu1 %v12128_v17  ;;  %20541 = vmatprep.mubr.msk.f32.mxu1 %vm22156_vm1, %v22155_v46 }
0x1353   :  { %20544 = vmatprep.subr.mxu1 %v22155_v46 }
0x1359   :  { %20542 = vmatmul.mubr.f32.vlgmr.msra.gmra.mrb[26].mxu1 %v12115_v12 }
0x135a   :  { %20545 = vmatpush3.xpose.msra.mxu1 %v12050_v10  ;;  %20546 = vmatprep.mubr.msk.f32.mxu1 %vm22156_vm1, %v22155_v46 }
0x135b   :  { %20579 = vmatprep.subr.mxu1 %v22155_v46 }
0x1361   :  { %20547 = vmatmul.mubr.f32.vlgmr.msra.gmra.mrb[26].mxu1 %v12115_v12 }
0x1362   :  { %20581 = vmatprep.mubr.msk.f32.mxu1 %vm22156_vm1, %v22155_v46 }
0x13dc   :  { %v23249_v21 = vpop.f32.mrb[20].mxu0 }
0x13dd   :  { %v20458_v22 = vpop.f32.mrb[21].mxu0 }
0x1408   :  { %v23251_v23 = vpop.f32.mrb[24].mxu1  ;;  %v12037_v28 = vpop.f32.mrb[22].mxu0 }
0x1409   :  { %v12495_v25 = vmul.f32 0.35355338, %v12037_v28  ;;  %v20488_v30 = vpop.f32.mrb[25].mxu1  ;;  %v20518_v26 = vpop.f32.mrb[23].mxu0 }
0x140b   :  { %v12497_v32 = vsel %vm685_vm2, %v12495_v25, -inf }
0x140c   :  { %12498 = vmax.xlane.f32.xlu0 %v12497_v32 }
0x1434   :  { %v12491_v7 = vpop.f32.mrb[26].mxu1 }
0x1435   :  { %v12496_v50 = vmul.f32 0.35355338, %v12491_v7  ;;  %v20548_v33 = vpop.f32.mrb[27].mxu1 }
0x1437   :  { %v12500_v53 = vsel %vm685_vm2, %v12496_v50, -inf }
0x1438   :  { %12501 = vmax.xlane.f32.xlu1 %v12500_v53 }
0x1449   :  { %12519 = vrot.lane.b32.xlu1 %v23078_v6, %s22159_s27 }
0x144d   :  { %13423 = vrot.lane.b32.xlu1 %v23086_v34, %s22163_s8 }
0x1451   :  { %13877 = vrot.lane.b32.xlu1 %v23099_v43, %s22163_s8 }
0x1455   :  { %13879 = vrot.lane.b32.xlu1 %v23076_v24, %s22163_s8 }
0x1499   :  { %v12499_v55 = vpop.xlane.xlu0 %12498 }
0x149a   :  { %v12503_v35 = vsub.f32 %v12495_v25, %v12499_v55 }
0x149c   :  { %v12505_v36 = vmul.f32 1.442695, %v12503_v35 }
0x149e   :  { %21958 = vpow2.f32 %v12505_v36 }
0x14a8   :  { %v21959_v37 = vpop.eup %21958 }
0x14a9   :  { %v12509_v27 = vsel %vm685_vm2, %v21959_v37, 0.0 }
0x14aa   :  { %12510 = vadd.xlane.f32.xlu0 %v12509_v27 }
0x14c5   :  { %v12502_v38 = vpop.xlane.xlu1 %12501 }
0x14c6   :  { %v12504_v39 = vsub.f32 %v12496_v50, %v12502_v38 }
0x14c8   :  { %v12507_v40 = vmul.f32 1.442695, %v12504_v39 }
0x14c9   :  { %v12520_v41 = vpop.permute.xlu1 %12519 }
0x14ca   :  { %21960 = vpow2.f32 %v12507_v40  ;;  %v12526_v42 = vand.u32 4294901760, %v12520_v41 }
0x14cc   :  { %20550 = vmatpush3.msra.mxu0 %v12526_v42  ;;  %v12603_v51 = vsub.f32 %v12520_v41, %v12526_v42 }
0x14cd   :  { %20554 = vmatprep.subr.mxu0 %v22155_v46  ;;  %v13424_v0 = vpop.permute.xlu1 %13423 }
0x14ce   :  { %v12604_v56 = vand.u32 4294901760, %v12603_v51  ;;  %v13427_v31 = vsel %vm685_vm2, %v13424_v0, 0 }
0x14cf   :  { %v23285_v4 = vand.u32 4294901760, %v13427_v31 }
0x14d0   :  { %v12605_v58 = vsub.f32 %v12603_v51, %v12604_v56 }
0x14d1   :  { %v13498_v13 = vsub.f32 %v13427_v31, %v23285_v4  ;;  %v13878_v35 = vpop.permute.xlu1 %13877 }
0x14d2   :  { %v12606_v61 = vand.u32 4294901760, %v12605_v58 }
0x14d3   :  { %v13499_v11 = vand.u32 4294901760, %v13498_v13 }
0x14d4   :  { %v21961_v44 = vpop.eup %21960 }
0x14d5   :  { %v12512_v45 = vsel %vm685_vm2, %v21961_v44, 0.0  ;;  %v13500_v25 = vsub.f32 %v13498_v13, %v13499_v11  ;;  %v13880_v36 = vpop.permute.xlu1 %13879 }
0x14d6   :  { %12513 = vadd.xlane.f32.xlu0 %v12512_v45  ;;  %v13883_v27 = vsel %vm685_vm2, %v13880_v36, 0 }
0x14d7   :  { %v13501_v50 = vand.u32 4294901760, %v13500_v25  ;;  %v13886_v39 = vand.u32 4294901760, %v13883_v27 }
0x14d9   :  { %v13963_v41 = vsub.f32 %v13883_v27, %v13886_v39 }
0x14ec   :  { %12971 = vrot.lane.b32.xlu0 %v23076_v24, %s22159_s27 }
0x14f0   :  { %13425 = vrot.lane.b32.xlu0 %v23078_v6, %s22163_s8 }
0x1537   :  { %v12511_v47 = vpop.xlane.xlu0 %12510 }
0x1538   :  { %21962 = vrcp.f32 %v12511_v47 }
0x1542   :  { %v21963_v48 = vpop.eup %21962 }
0x1543   :  { %v12517_v49 = vmul.f32 %v21963_v48, %v21959_v37  ;;  %v13881_v37 = vsel %vm685_vm2, %v13878_v35, 0 }
0x1544   :  { %v13951_v38 = vand.u32 4294901760, %v13881_v37 }
0x1545   :  { %v12523_v52 = vsel %vm685_vm2, %v12517_v49, 0 }
0x1546   :  { %v12591_v54 = vand.u32 4294901760, %v12523_v52  ;;  %v13952_v40 = vsub.f32 %v13881_v37, %v13951_v38 }
0x1548   :  { %v12592_v29 = vsub.f32 %v12523_v52, %v12591_v54 }
0x154a   :  { %v12593_v57 = vand.u32 4294901760, %v12592_v29 }
0x154c   :  { %v12594_v59 = vsub.f32 %v12592_v29, %v12593_v57 }
0x154e   :  { %v12595_v60 = vand.u32 4294901760, %v12594_v59 }
0x1550   :  { %20552 = vmatmul.mubr.f32.vlgmr.msra.gmra.mrb[24].mxu0 %v12595_v60 }
0x1551   :  { %20555 = vmatpush3.msra.mxu0 %v12606_v61  ;;  %20556 = vmatprep.mubr.msk.f32.mxu0 %vm22156_vm1, %v22155_v46 }
0x1552   :  { %20559 = vmatprep.subr.mxu0 %v22155_v46 }
0x1558   :  { %20557 = vmatmul.mubr.f32.vlgmr.msra.gmra.mrb[24].mxu0 %v12591_v54 }
0x1559   :  { %20560 = vmatpush3.msra.mxu0 %v12603_v51  ;;  %20561 = vmatprep.mubr.msk.f32.mxu0 %vm22156_vm1, %v22155_v46 }
0x155a   :  { %20564 = vmatprep.subr.mxu0 %v22155_v46 }
0x1560   :  { %20562 = vmatmul.mubr.f32.vlgmr.msra.gmra.mrb[24].mxu0 %v12592_v29 }
0x1561   :  { %20565 = vmatpush3.msra.mxu0 %v12526_v42  ;;  %20566 = vmatprep.mubr.msk.f32.mxu0 %vm22156_vm1, %v22155_v46 }
0x1562   :  { %20569 = vmatprep.subr.mxu0 %v22155_v46 }
0x1563   :  { %v12514_v62 = vpop.xlane.xlu0 %12513 }
0x1564   :  { %21964 = vrcp.f32 %v12514_v62 }
0x1567   :  { %v12972_v1 = vpop.permute.xlu0 %12971 }
0x1568   :  { %v23281_v3 = vand.u32 4294901760, %v12972_v1  ;;  %20567 = vmatmul.mubr.f32.vlgmr.msra.gmra.mrb[24].mxu0 %v12593_v57 }
0x1569   :  { %20570 = vmatpush3.msra.mxu0 %v12604_v56  ;;  %20571 = vmatprep.mubr.msk.f32.mxu0 %vm22156_vm1, %v22155_v46 }
0x156a   :  { %20580 = vmatpush3.msra.mxu1 %v23281_v3  ;;  %20574 = vmatprep.subr.mxu0 %v22155_v46  ;;  %v13055_v16 = vsub.f32 %v12972_v1, %v23281_v3 }
0x156b   :  { %v13426_v5 = vpop.permute.xlu0 %13425  ;;  %20584 = vmatprep.subr.mxu1 %v22155_v46 }
0x156c   :  { %v13429_v9 = vsel %vm685_vm2, %v13426_v5, 0  ;;  %v13056_v20 = vand.u32 4294901760, %v13055_v16 }
0x156d   :  { %v23291_v12 = vand.u32 4294901760, %v13429_v9 }
0x156e   :  { %v21965_v10 = vpop.eup %21964  ;;  %v13057_v26 = vsub.f32 %v13055_v16, %v13056_v20 }
0x156f   :  { %v12518_v14 = vmul.f32 %v21965_v10, %v21961_v44  ;;  %v13509_v17 = vsub.f32 %v13429_v9, %v23291_v12  ;;  %v13964_v44 = vand.u32 4294901760, %v13963_v41 }
0x1570   :  { %20572 = vmatmul.mubr.f32.vlgmr.msra.gmra.mrb[24].mxu0 %v12591_v54  ;;  %v13058_v53 = vand.u32 4294901760, %v13057_v26 }
0x1571   :  { %20575 = vmatpush3.msra.mxu0 %v12526_v42  ;;  %20576 = vmatprep.mubr.msk.f32.mxu0 %vm22156_vm1, %v22155_v46  ;;  %v12975_v18 = vsel %vm685_vm2, %v12518_v14, 0  ;;  %v13510_v22 = vand.u32 4294901760, %v13509_v17  ;;  %v13953_v42 = vand.u32 4294901760, %v13952_v40  ;;  %v13965_v47 = vsub.f32 %v13963_v41, %v13964_v44 }
0x1572   :  { %20609 = vmatprep.subr.mxu0 %v22155_v46  ;;  %v23300_v19 = vand.u32 4294901760, %v12975_v18 }
0x1573   :  { %v13511_v32 = vsub.f32 %v13509_v17, %v13510_v22  ;;  %v13954_v45 = vsub.f32 %v13952_v40, %v13953_v42  ;;  %v13966_v51 = vand.u32 4294901760, %v13965_v47 }
0x1574   :  { %v13044_v28 = vsub.f32 %v12975_v18, %v23300_v19 }
0x1575   :  { %v13512_v55 = vand.u32 4294901760, %v13511_v32  ;;  %v13955_v48 = vand.u32 4294901760, %v13954_v45 }
0x1576   :  { %v13045_v30 = vand.u32 4294901760, %v13044_v28 }
0x1578   :  { %20577 = vmatmul.mubr.f32.vlgmr.msra.gmra.mrb[24].mxu0 %v12591_v54  ;;  %v13046_v7 = vsub.f32 %v13044_v28, %v13045_v30 }
0x1579   :  { %20610 = vmatpush3.xpose.msra.mxu0 %v23291_v12  ;;  %20611 = vmatprep.mubr.msk.f32.mxu0 %vm22156_vm1, %v22155_v46 }
0x157a   :  { %20614 = vmatprep.subr.mxu0 %v22155_v46  ;;  %v13047_v33 = vand.u32 4294901760, %v13046_v7 }
0x157c   :  { %20582 = vmatmul.mubr.f32.vlgmr.msra.gmra.mrb[28].mxu1 %v13047_v33  ;;  %20612 = vmatmul.mubr.f32.vlgmr.msra.gmra.mrb[26].mxu0 %v13501_v50 }
0x157d   :  { %20585 = vmatpush3.msra.mxu1 %v13058_v53  ;;  %20615 = vmatpush3.xpose.msra.mxu0 %v13512_v55 }
0x157e   :  { %20586 = vmatprep.mubr.msk.f32.mxu1 %vm22156_vm1, %v22155_v46  ;;  %20589 = vmatprep.subr.mxu1 %v22155_v46 }
0x157f   :  { %20616 = vmatprep.mubr.msk.f32.mxu0 %vm22156_vm1, %v22155_v46  ;;  %20619 = vmatprep.subr.mxu0 %v22155_v46 }
0x1584   :  { %20587 = vmatmul.mubr.f32.vlgmr.msra.gmra.mrb[28].mxu1 %v23300_v19  ;;  %20617 = vmatmul.mubr.f32.vlgmr.msra.gmra.mrb[26].mxu0 %v23285_v4 }
0x1585   :  { %20590 = vmatpush3.msra.mxu1 %v13055_v16  ;;  %20620 = vmatpush3.xpose.msra.mxu0 %v13509_v17 }
0x1586   :  { %20591 = vmatprep.mubr.msk.f32.mxu1 %vm22156_vm1, %v22155_v46  ;;  %20594 = vmatprep.subr.mxu1 %v22155_v46 }
0x1587   :  { %20621 = vmatprep.mubr.msk.f32.mxu0 %vm22156_vm1, %v22155_v46  ;;  %20624 = vmatprep.subr.mxu0 %v22155_v46 }
0x158c   :  { %20592 = vmatmul.mubr.f32.vlgmr.msra.gmra.mrb[28].mxu1 %v13044_v28  ;;  %20622 = vmatmul.mubr.f32.vlgmr.msra.gmra.mrb[26].mxu0 %v13498_v13 }
0x158d   :  { %20595 = vmatpush3.msra.mxu1 %v23281_v3  ;;  %20625 = vmatpush3.xpose.msra.mxu0 %v23291_v12 }
0x158e   :  { %20596 = vmatprep.mubr.msk.f32.mxu1 %vm22156_vm1, %v22155_v46  ;;  %20599 = vmatprep.subr.mxu1 %v22155_v46 }
0x158f   :  { %20626 = vmatprep.mubr.msk.f32.mxu0 %vm22156_vm1, %v22155_v46  ;;  %20629 = vmatprep.subr.mxu0 %v22155_v46 }
0x1594   :  { %20597 = vmatmul.mubr.f32.vlgmr.msra.gmra.mrb[28].mxu1 %v13045_v30  ;;  %20627 = vmatmul.mubr.f32.vlgmr.msra.gmra.mrb[26].mxu0 %v13499_v11 }
0x1595   :  { %20600 = vmatpush3.msra.mxu1 %v13056_v20  ;;  %20630 = vmatpush3.xpose.msra.mxu0 %v13510_v22 }
0x1596   :  { %20601 = vmatprep.mubr.msk.f32.mxu1 %vm22156_vm1, %v22155_v46  ;;  %20604 = vmatprep.subr.mxu1 %v22155_v46 }
0x1597   :  { %20631 = vmatprep.mubr.msk.f32.mxu0 %vm22156_vm1, %v22155_v46  ;;  %20634 = vmatprep.subr.mxu0 %v22155_v46 }
0x159c   :  { %20602 = vmatmul.mubr.f32.vlgmr.msra.gmra.mrb[28].mxu1 %v23300_v19  ;;  %20632 = vmatmul.mubr.f32.vlgmr.msra.gmra.mrb[26].mxu0 %v23285_v4 }
0x159d   :  { %20605 = vmatpush3.msra.mxu1 %v23281_v3  ;;  %20635 = vmatpush3.xpose.msra.mxu0 %v23291_v12 }
0x159e   :  { %20606 = vmatprep.mubr.msk.f32.mxu1 %vm22156_vm1, %v22155_v46  ;;  %20636 = vmatprep.mubr.msk.f32.mxu0 %vm22156_vm1, %v22155_v46 }
0x159f   :  { %20639 = vmatprep.subr.mxu1 %v22155_v46  ;;  %20669 = vmatprep.subr.mxu0 %v22155_v46 }
0x15a4   :  { %20607 = vmatmul.mubr.f32.vlgmr.msra.gmra.mrb[28].mxu1 %v23300_v19  ;;  %20637 = vmatmul.mubr.f32.vlgmr.msra.gmra.mrb[26].mxu0 %v23285_v4 }
0x15a5   :  { %20640 = vmatpush3.xpose.msra.mxu1 %v13886_v39  ;;  %20641 = vmatprep.mubr.msk.f32.mxu1 %vm22156_vm1, %v22155_v46 }
0x15a6   :  { %20644 = vmatprep.subr.mxu1 %v22155_v46  ;;  %20671 = vmatprep.mubr.msk.f32.mxu0 %vm22156_vm1, %v22155_v46 }
0x15a8   :  { %20642 = vmatmul.mubr.f32.vlgmr.msra.gmra.mrb[30].mxu1 %v13955_v48 }
0x15a9   :  { %20645 = vmatpush3.xpose.msra.mxu1 %v13966_v51  ;;  %20646 = vmatprep.mubr.msk.f32.mxu1 %vm22156_vm1, %v22155_v46 }
0x15aa   :  { %20649 = vmatprep.subr.mxu1 %v22155_v46 }
0x15b0   :  { %20647 = vmatmul.mubr.f32.vlgmr.msra.gmra.mrb[30].mxu1 %v13951_v38 }
0x15b1   :  { %20650 = vmatpush3.xpose.msra.mxu1 %v13963_v41  ;;  %20651 = vmatprep.mubr.msk.f32.mxu1 %vm22156_vm1, %v22155_v46 }
0x15b2   :  { %20654 = vmatprep.subr.mxu1 %v22155_v46 }
0x15b8   :  { %20652 = vmatmul.mubr.f32.vlgmr.msra.gmra.mrb[30].mxu1 %v13952_v40 }
0x15b9   :  { %20655 = vmatpush3.xpose.msra.mxu1 %v13886_v39  ;;  %20656 = vmatprep.mubr.msk.f32.mxu1 %vm22156_vm1, %v22155_v46 }
0x15ba   :  { %20659 = vmatprep.subr.mxu1 %v22155_v46 }
0x15c0   :  { %20657 = vmatmul.mubr.f32.vlgmr.msra.gmra.mrb[30].mxu1 %v13953_v42 }
0x15c1   :  { %20660 = vmatpush3.xpose.msra.mxu1 %v13964_v44  ;;  %20661 = vmatprep.mubr.msk.f32.mxu1 %vm22156_vm1, %v22155_v46 }
0x15c2   :  { %20664 = vmatprep.subr.mxu1 %v22155_v46 }
0x15c8   :  { %20662 = vmatmul.mubr.f32.vlgmr.msra.gmra.mrb[30].mxu1 %v13951_v38 }
0x15c9   :  { %20665 = vmatpush3.xpose.msra.mxu1 %v13886_v39  ;;  %20666 = vmatprep.mubr.msk.f32.mxu1 %vm22156_vm1, %v22155_v46 }
0x15ca   :  { %20699 = vmatprep.subr.mxu1 %v22155_v46 }
0x15d0   :  { %20667 = vmatmul.mubr.f32.vlgmr.msra.gmra.mrb[30].mxu1 %v13951_v38 }
0x15d1   :  { %20701 = vmatprep.mubr.msk.f32.mxu1 %vm22156_vm1, %v22155_v46 }
0x164b   :  { %v23371_v49 = vpop.f32.mrb[24].mxu0 }
0x164c   :  { %v20578_v52 = vpop.f32.mrb[25].mxu0 }
0x1677   :  { %v23373_v54 = vpop.f32.mrb[28].mxu1  ;;  %v13873_v56 = vpop.f32.mrb[26].mxu0 }
0x1678   :  { %v14331_v29 = vmul.f32 0.35355338, %v13873_v56  ;;  %v20608_v57 = vpop.f32.mrb[29].mxu1  ;;  %v20638_v58 = vpop.f32.mrb[27].mxu0 }
0x167a   :  { %v14333_v59 = vsel %vm685_vm2, %v14331_v29, -inf }
0x167b   :  { %14334 = vmax.xlane.f32.xlu0 %v14333_v59 }
0x16a3   :  { %v14327_v60 = vpop.f32.mrb[30].mxu1 }
0x16a4   :  { %v14332_v61 = vmul.f32 0.35355338, %v14327_v60  ;;  %v20668_v62 = vpop.f32.mrb[31].mxu1 }
0x16a6   :  { %v14336_v0 = vsel %vm685_vm2, %v14332_v61, -inf }
0x16a7   :  { %14337 = vmax.xlane.f32.xlu1 %v14336_v0 }
0x16b8   :  { %14355 = vrot.lane.b32.xlu1 %v23078_v6, %s22162_s0 }
0x16bc   :  { %15259 = vrot.lane.b32.xlu1 %v23086_v34, %s22165_s20 }
0x16c0   :  { %15713 = vrot.lane.b32.xlu1 %v23099_v43, %s22165_s20 }
0x16c4   :  { %15715 = vrot.lane.b32.xlu1 %v23076_v24, %s22165_s20 }
0x1708   :  { %v14335_v31 = vpop.xlane.xlu0 %14334 }
0x1709   :  { %v14339_v1 = vsub.f32 %v14331_v29, %v14335_v31 }
0x170b   :  { %v14341_v3 = vmul.f32 1.442695, %v14339_v1 }
0x170d   :  { %21966 = vpow2.f32 %v14341_v3 }
0x1717   :  { %v21967_v4 = vpop.eup %21966 }
0x1718   :  { %v14345_v5 = vsel %vm685_vm2, %v21967_v4, 0.0 }
0x1719   :  { %14346 = vadd.xlane.f32.xlu0 %v14345_v5 }
0x1734   :  { %v14338_v9 = vpop.xlane.xlu1 %14337 }
0x1735   :  { %v14340_v12 = vsub.f32 %v14332_v61, %v14338_v9 }
0x1737   :  { %v14343_v10 = vmul.f32 1.442695, %v14340_v12 }
0x1738   :  { %v14356_v13 = vpop.permute.xlu1 %14355 }
0x1739   :  { %21968 = vpow2.f32 %v14343_v10  ;;  %v14362_v34 = vand.u32 4294901760, %v14356_v13 }
0x173b   :  { %20670 = vmatpush3.msra.mxu0 %v14362_v34  ;;  %v14439_v18 = vsub.f32 %v14356_v13, %v14362_v34 }
0x173c   :  { %20674 = vmatprep.subr.mxu0 %v22155_v46  ;;  %v15260_v33 = vpop.permute.xlu1 %15259 }
0x173d   :  { %v14440_v22 = vand.u32 4294901760, %v14439_v18  ;;  %v15263_v53 = vsel %vm685_vm2, %v15260_v33, 0 }
0x173e   :  { %v23407_v36 = vand.u32 4294901760, %v15263_v53 }
0x173f   :  { %v14441_v30 = vsub.f32 %v14439_v18, %v14440_v22 }
0x1740   :  { %v15334_v40 = vsub.f32 %v15263_v53, %v23407_v36  ;;  %v15714_v1 = vpop.permute.xlu1 %15713 }
0x1741   :  { %v14442_v7 = vand.u32 4294901760, %v14441_v30 }
0x1742   :  { %v15335_v47 = vand.u32 4294901760, %v15334_v40 }
0x1743   :  { %v21969_v43 = vpop.eup %21968 }
0x1744   :  { %v14348_v14 = vsel %vm685_vm2, %v21969_v43, 0.0  ;;  %v15336_v29 = vsub.f32 %v15334_v40, %v15335_v47  ;;  %v15716_v3 = vpop.permute.xlu1 %15715 }
0x1745   :  { %14349 = vadd.xlane.f32.xlu0 %v14348_v14  ;;  %v15719_v5 = vsel %vm685_vm2, %v15716_v3, 0 }
0x1746   :  { %v15337_v61 = vand.u32 4294901760, %v15336_v29  ;;  %v15722_v12 = vand.u32 4294901760, %v15719_v5 }
0x1748   :  { %v15799_v13 = vsub.f32 %v15719_v5, %v15722_v12 }
0x175b   :  { %14807 = vrot.lane.b32.xlu0 %v23076_v24, %s22162_s0 }
0x175f   :  { %15261 = vrot.lane.b32.xlu0 %v23078_v6, %s22165_s20 }
0x17a6   :  { %v14347_v16 = vpop.xlane.xlu0 %14346 }
0x17a7   :  { %21970 = vrcp.f32 %v14347_v16 }
0x17b1   :  { %v21971_v17 = vpop.eup %21970 }
0x17b2   :  { %v14353_v11 = vmul.f32 %v21971_v17, %v21967_v4  ;;  %v15717_v4 = vsel %vm685_vm2, %v15714_v1, 0 }
0x17b3   :  { %v15787_v9 = vand.u32 4294901760, %v15717_v4 }
0x17b4   :  { %v14359_v19 = vsel %vm685_vm2, %v14353_v11, 0 }
0x17b5   :  { %v14427_v20 = vand.u32 4294901760, %v14359_v19  ;;  %v15788_v10 = vsub.f32 %v15717_v4, %v15787_v9 }
0x17b7   :  { %v14428_v28 = vsub.f32 %v14359_v19, %v14427_v20 }
0x17b9   :  { %v14429_v25 = vand.u32 4294901760, %v14428_v28 }
0x17bb   :  { %v14430_v26 = vsub.f32 %v14428_v28, %v14429_v25 }
0x17bd   :  { %v14431_v32 = vand.u32 4294901760, %v14430_v26 }
0x17bf   :  { %20672 = vmatmul.mubr.f32.vlgmr.msra.gmra.mrb[28].mxu0 %v14431_v32 }
0x17c0   :  { %20675 = vmatpush3.msra.mxu0 %v14442_v7  ;;  %20676 = vmatprep.mubr.msk.f32.mxu0 %vm22156_vm1, %v22155_v46 }
0x17c1   :  { %20679 = vmatprep.subr.mxu0 %v22155_v46 }
0x17c7   :  { %20677 = vmatmul.mubr.f32.vlgmr.msra.gmra.mrb[28].mxu0 %v14427_v20 }
0x17c8   :  { %20680 = vmatpush3.msra.mxu0 %v14439_v18  ;;  %20681 = vmatprep.mubr.msk.f32.mxu0 %vm22156_vm1, %v22155_v46 }
0x17c9   :  { %20684 = vmatprep.subr.mxu0 %v22155_v46 }
0x17cf   :  { %20682 = vmatmul.mubr.f32.vlgmr.msra.gmra.mrb[28].mxu0 %v14428_v28 }
0x17d0   :  { %20685 = vmatpush3.msra.mxu0 %v14362_v34  ;;  %20686 = vmatprep.mubr.msk.f32.mxu0 %vm22156_vm1, %v22155_v46 }
0x17d1   :  { %20689 = vmatprep.subr.mxu0 %v22155_v46 }
0x17d2   :  { %v14350_v50 = vpop.xlane.xlu0 %14349 }
0x17d3   :  { %21972 = vrcp.f32 %v14350_v50 }
0x17d6   :  { %v14808_v55 = vpop.permute.xlu0 %14807 }
0x17d7   :  { %v23403_v35 = vand.u32 4294901760, %v14808_v55  ;;  %20687 = vmatmul.mubr.f32.vlgmr.msra.gmra.mrb[28].mxu0 %v14429_v25 }
0x17d8   :  { %20690 = vmatpush3.msra.mxu0 %v14440_v22  ;;  %20691 = vmatprep.mubr.msk.f32.mxu0 %vm22156_vm1, %v22155_v46 }
0x17d9   :  { %20700 = vmatpush3.msra.mxu1 %v23403_v35  ;;  %20694 = vmatprep.subr.mxu0 %v22155_v46  ;;  %v14891_v42 = vsub.f32 %v14808_v55, %v23403_v35 }
0x17da   :  { %v15262_v37 = vpop.permute.xlu0 %15261  ;;  %20704 = vmatprep.subr.mxu1 %v22155_v46 }
0x17db   :  { %v15265_v27 = vsel %vm685_vm2, %v15262_v37, 0  ;;  %v14892_v51 = vand.u32 4294901760, %v14891_v42 }
0x17dc   :  { %v23413_v38 = vand.u32 4294901760, %v15265_v27 }
0x17dd   :  { %v21973_v39 = vpop.eup %21972  ;;  %v14893_v58 = vsub.f32 %v14891_v42, %v14892_v51 }
0x17de   :  { %v14354_v41 = vmul.f32 %v21973_v39, %v21969_v43  ;;  %v15345_v44 = vsub.f32 %v15265_v27, %v23413_v38  ;;  %v15800_v43 = vand.u32 4294901760, %v15799_v13 }
0x17df   :  { %20692 = vmatmul.mubr.f32.vlgmr.msra.gmra.mrb[28].mxu0 %v14427_v20  ;;  %v14894_v0 = vand.u32 4294901760, %v14893_v58 }
0x17e0   :  { %20695 = vmatpush3.msra.mxu0 %v14362_v34  ;;  %20696 = vmatprep.mubr.msk.f32.mxu0 %vm22156_vm1, %v22155_v46  ;;  %v14811_v45 = vsel %vm685_vm2, %v14354_v41, 0  ;;  %v15346_v52 = vand.u32 4294901760, %v15345_v44  ;;  %v15789_v34 = vand.u32 4294901760, %v15788_v10  ;;  %v15801_v16 = vsub.f32 %v15799_v13, %v15800_v43 }
0x17e1   :  { %20729 = vmatprep.subr.mxu0 %v22155_v46  ;;  %v23422_v48 = vand.u32 4294901760, %v14811_v45 }
0x17e2   :  { %v15347_v59 = vsub.f32 %v15345_v44, %v15346_v52  ;;  %v15790_v14 = vsub.f32 %v15788_v10, %v15789_v34  ;;  %v15802_v18 = vand.u32 4294901760, %v15801_v16  ;;  %v17125_v16 = vld [vmem:[#allocation10] sm:$0xff] }
0x17e3   :  { %v14880_v56 = vsub.f32 %v14811_v45, %v23422_v48 }
0x17e4   :  { %v15348_v31 = vand.u32 4294901760, %v15347_v59  ;;  %v15791_v17 = vand.u32 4294901760, %v15790_v14 }
0x17e5   :  { %v14881_v57 = vand.u32 4294901760, %v14880_v56 }
0x17e7   :  { %20697 = vmatmul.mubr.f32.vlgmr.msra.gmra.mrb[28].mxu0 %v14427_v20  ;;  %v14882_v60 = vsub.f32 %v14880_v56, %v14881_v57 }
0x17e8   :  { %20730 = vmatpush3.xpose.msra.mxu0 %v23413_v38  ;;  %20731 = vmatprep.mubr.msk.f32.mxu0 %vm22156_vm1, %v22155_v46 }
0x17e9   :  { %20734 = vmatprep.subr.mxu0 %v22155_v46  ;;  %v14883_v62 = vand.u32 4294901760, %v14882_v60 }
0x17eb   :  { %20702 = vmatmul.mubr.f32.vlgmr.msra.gmra.mrb[32].mxu1 %v14883_v62  ;;  %20732 = vmatmul.mubr.f32.vlgmr.msra.gmra.mrb[30].mxu0 %v15337_v61 }
0x17ec   :  { %20705 = vmatpush3.msra.mxu1 %v14894_v0  ;;  %20735 = vmatpush3.xpose.msra.mxu0 %v15348_v31 }
0x17ed   :  { %20706 = vmatprep.mubr.msk.f32.mxu1 %vm22156_vm1, %v22155_v46  ;;  %20709 = vmatprep.subr.mxu1 %v22155_v46 }
0x17ee   :  { %20736 = vmatprep.mubr.msk.f32.mxu0 %vm22156_vm1, %v22155_v46  ;;  %20739 = vmatprep.subr.mxu0 %v22155_v46 }
0x17f3   :  { %20707 = vmatmul.mubr.f32.vlgmr.msra.gmra.mrb[32].mxu1 %v23422_v48  ;;  %20737 = vmatmul.mubr.f32.vlgmr.msra.gmra.mrb[30].mxu0 %v23407_v36 }
0x17f4   :  { %20710 = vmatpush3.msra.mxu1 %v14891_v42  ;;  %20740 = vmatpush3.xpose.msra.mxu0 %v15345_v44 }
0x17f5   :  { %20711 = vmatprep.mubr.msk.f32.mxu1 %vm22156_vm1, %v22155_v46  ;;  %20714 = vmatprep.subr.mxu1 %v22155_v46 }
0x17f6   :  { %20741 = vmatprep.mubr.msk.f32.mxu0 %vm22156_vm1, %v22155_v46  ;;  %20744 = vmatprep.subr.mxu0 %v22155_v46 }
0x17fb   :  { %20712 = vmatmul.mubr.f32.vlgmr.msra.gmra.mrb[32].mxu1 %v14880_v56  ;;  %20742 = vmatmul.mubr.f32.vlgmr.msra.gmra.mrb[30].mxu0 %v15334_v40 }
0x17fc   :  { %20715 = vmatpush3.msra.mxu1 %v23403_v35  ;;  %20745 = vmatpush3.xpose.msra.mxu0 %v23413_v38 }
0x17fd   :  { %20716 = vmatprep.mubr.msk.f32.mxu1 %vm22156_vm1, %v22155_v46  ;;  %20719 = vmatprep.subr.mxu1 %v22155_v46 }
0x17fe   :  { %20746 = vmatprep.mubr.msk.f32.mxu0 %vm22156_vm1, %v22155_v46  ;;  %20749 = vmatprep.subr.mxu0 %v22155_v46 }
0x1803   :  { %20717 = vmatmul.mubr.f32.vlgmr.msra.gmra.mrb[32].mxu1 %v14881_v57  ;;  %20747 = vmatmul.mubr.f32.vlgmr.msra.gmra.mrb[30].mxu0 %v15335_v47 }
0x1804   :  { %20720 = vmatpush3.msra.mxu1 %v14892_v51  ;;  %20750 = vmatpush3.xpose.msra.mxu0 %v15346_v52 }
0x1805   :  { %20721 = vmatprep.mubr.msk.f32.mxu1 %vm22156_vm1, %v22155_v46  ;;  %20724 = vmatprep.subr.mxu1 %v22155_v46 }
0x1806   :  { %20751 = vmatprep.mubr.msk.f32.mxu0 %vm22156_vm1, %v22155_v46  ;;  %20754 = vmatprep.subr.mxu0 %v22155_v46 }
0x180b   :  { %20722 = vmatmul.mubr.f32.vlgmr.msra.gmra.mrb[32].mxu1 %v23422_v48  ;;  %20752 = vmatmul.mubr.f32.vlgmr.msra.gmra.mrb[30].mxu0 %v23407_v36 }
0x180c   :  { %20725 = vmatpush3.msra.mxu1 %v23403_v35  ;;  %20755 = vmatpush3.xpose.msra.mxu0 %v23413_v38 }
0x180d   :  { %20726 = vmatprep.mubr.msk.f32.mxu1 %vm22156_vm1, %v22155_v46  ;;  %20756 = vmatprep.mubr.msk.f32.mxu0 %vm22156_vm1, %v22155_v46 }
0x180e   :  { %20759 = vmatprep.subr.mxu1 %v22155_v46  ;;  %20789 = vmatprep.subr.mxu0 %v22155_v46 }
0x1813   :  { %20727 = vmatmul.mubr.f32.vlgmr.msra.gmra.mrb[32].mxu1 %v23422_v48  ;;  %20757 = vmatmul.mubr.f32.vlgmr.msra.gmra.mrb[30].mxu0 %v23407_v36 }
0x1814   :  { %20760 = vmatpush3.xpose.msra.mxu1 %v15722_v12  ;;  %20761 = vmatprep.mubr.msk.f32.mxu1 %vm22156_vm1, %v22155_v46 }
0x1815   :  { %20764 = vmatprep.subr.mxu1 %v22155_v46  ;;  %20791 = vmatprep.mubr.msk.f32.mxu0 %vm22156_vm1, %v22155_v46 }
0x1817   :  { %20762 = vmatmul.mubr.f32.vlgmr.msra.gmra.mrb[34].mxu1 %v15791_v17  ;;  %v17126_v17 = vld [vmem:[#allocation10 + $0x8] sm:$0xff] }
0x1818   :  { %20765 = vmatpush3.xpose.msra.mxu1 %v15802_v18  ;;  %20766 = vmatprep.mubr.msk.f32.mxu1 %vm22156_vm1, %v22155_v46  ;;  %v17143_v18 = vand.u32 4294901760, %v17125_v16 }
0x1819   :  { %20769 = vmatprep.subr.mxu1 %v22155_v46 }
0x181f   :  { %20767 = vmatmul.mubr.f32.vlgmr.msra.gmra.mrb[34].mxu1 %v15787_v9 }
0x1820   :  { %20770 = vmatpush3.xpose.msra.mxu1 %v15799_v13  ;;  %20771 = vmatprep.mubr.msk.f32.mxu1 %vm22156_vm1, %v22155_v46 }
0x1821   :  { %20774 = vmatprep.subr.mxu1 %v22155_v46 }
0x1827   :  { %20772 = vmatmul.mubr.f32.vlgmr.msra.gmra.mrb[34].mxu1 %v15788_v10 }
0x1828   :  { %20775 = vmatpush3.xpose.msra.mxu1 %v15722_v12  ;;  %20776 = vmatprep.mubr.msk.f32.mxu1 %vm22156_vm1, %v22155_v46 }
0x1829   :  { %20779 = vmatprep.subr.mxu1 %v22155_v46 }
0x182f   :  { %20777 = vmatmul.mubr.f32.vlgmr.msra.gmra.mrb[34].mxu1 %v15789_v34 }
0x1830   :  { %20780 = vmatpush3.xpose.msra.mxu1 %v15800_v43  ;;  %20781 = vmatprep.mubr.msk.f32.mxu1 %vm22156_vm1, %v22155_v46 }
0x1831   :  { %20784 = vmatprep.subr.mxu1 %v22155_v46 }
0x1837   :  { %20782 = vmatmul.mubr.f32.vlgmr.msra.gmra.mrb[34].mxu1 %v15787_v9 }
0x1838   :  { %20785 = vmatpush3.xpose.msra.mxu1 %v15722_v12  ;;  %20786 = vmatprep.mubr.msk.f32.mxu1 %vm22156_vm1, %v22155_v46 }
0x1839   :  { %20819 = vmatprep.subr.mxu1 %v22155_v46 }
0x183f   :  { %20787 = vmatmul.mubr.f32.vlgmr.msra.gmra.mrb[34].mxu1 %v15787_v9 }
0x1840   :  { %20821 = vmatprep.mubr.msk.f32.mxu1 %vm22156_vm1, %v22155_v46 }
0x18ba   :  { %v14803_v11 = vpop.f32.mrb[28].mxu0 }
0x18bb   :  { %v20698_v19 = vpop.f32.mrb[29].mxu0 }
0x18e6   :  { %v15255_v20 = vpop.f32.mrb[32].mxu1  ;;  %v15709_v22 = vpop.f32.mrb[30].mxu0 }
0x18e7   :  { %v16167_v28 = vmul.f32 0.35355338, %v15709_v22  ;;  %v20728_v25 = vpop.f32.mrb[33].mxu1  ;;  %v20758_v30 = vpop.f32.mrb[31].mxu0 }
0x18e8   :  { %v17128_v25 = vld [vmem:[#allocation10 + $0x18] sm:$0xff] }
0x18e9   :  { %v16169_v26 = vsel %vm685_vm2, %v16167_v28, -inf }
0x18ea   :  { %16170 = vmax.xlane.f32.xlu0 %v16169_v26  ;;  %v17152_v26 = vand.u32 4294901760, %v17128_v25 }
0x1912   :  { %v16163_v32 = vpop.f32.mrb[34].mxu1 }
0x1913   :  { %v16168_v7 = vmul.f32 0.35355338, %v16163_v32  ;;  %v20788_v50 = vpop.f32.mrb[35].mxu1 }
0x1915   :  { %v16172_v33 = vsel %vm685_vm2, %v16168_v7, -inf }
0x1916   :  { %16173 = vmax.xlane.f32.xlu1 %v16172_v33 }
0x1927   :  { %16191 = vrot.lane.b32.xlu1 %v23078_v6, %s22166_s21 }
0x192b   :  { %17097 = vrot.lane.b32.xlu1 %v23371_v49, %s22151_s26 }
0x192f   :  { %17099 = vrot.lane.b32.xlu1 %v23373_v54, %s22151_s26 }
0x1933   :  { %17107 = vrot.lane.b32.xlu1 %v15255_v20, %s22168_s29  ;;  %v17233_v20 = vsub.f32 %v17125_v16, %v17143_v18 }
0x1977   :  { %v16171_v53 = vpop.xlane.xlu0 %16170 }
0x1978   :  { %v16175_v55 = vsub.f32 %v16167_v28, %v16171_v53  ;;  %v17127_v28 = vld [vmem:[#allocation10 + $0x10] sm:$0xff] }
0x1979   :  { %v17149_v30 = vand.u32 4294901760, %v17127_v28 }
0x197a   :  { %v16177_v35 = vmul.f32 1.442695, %v16175_v55  ;;  %v17254_v55 = vsub.f32 %v17128_v25, %v17152_v26 }
0x197b   :  { %v17247_v53 = vsub.f32 %v17127_v28, %v17149_v30 }
0x197c   :  { %21974 = vpow2.f32 %v16177_v35 }
0x1986   :  { %v21975_v36 = vpop.eup %21974 }
0x1987   :  { %v16181_v37 = vsel %vm685_vm2, %v21975_v36, 0.0 }
0x1988   :  { %16182 = vadd.xlane.f32.xlu0 %v16181_v37  ;;  %v17248_v37 = vand.u32 4294901760, %v17247_v53 }
0x19a3   :  { %v16174_v27 = vpop.xlane.xlu1 %16173 }
0x19a4   :  { %v16176_v38 = vsub.f32 %v16168_v7, %v16174_v27  ;;  %v23544_v7 = vpack.c.bf16 %v17152_v26, %v17149_v30  ;;  %v17255_v27 = vand.u32 4294901760, %v17254_v55 }
0x19a6   :  { %v16179_v39 = vmul.f32 1.442695, %v16176_v38 }
0x19a7   :  { %v16192_v6 = vpop.permute.xlu1 %16191 }
0x19a8   :  { %21976 = vpow2.f32 %v16179_v39  ;;  %v16198_v40 = vand.u32 4294901760, %v16192_v6  ;;  %v17249_v39 = vsub.f32 %v17247_v53, %v17248_v37 }
0x19aa   :  { %20790 = vmatpush3.msra.mxu0 %v16198_v40  ;;  %v16275_v44 = vsub.f32 %v16192_v6, %v16198_v40 }
0x19ab   :  { %20794 = vmatprep.subr.mxu0 %v22155_v46 }
0x19ac   :  { %v16276_v51 = vand.u32 4294901760, %v16275_v44 }
0x19ae   :  { %v16277_v29 = vsub.f32 %v16275_v44, %v16276_v51 }
0x19b0   :  { %v16278_v59 = vand.u32 4294901760, %v16277_v29 }
0x19b2   :  { %v21977_v49 = vpop.eup %21976 }
0x19b3   :  { %v16184_v54 = vsel %vm685_vm2, %v21977_v49, 0.0 }
0x19b4   :  { %16185 = vadd.xlane.f32.xlu0 %v16184_v54  ;;  %v17250_v54 = vand.u32 4294901760, %v17249_v39 }
0x19ca   :  { %16643 = vrot.lane.b32.xlu0 %v23076_v24, %s22166_s21 }
0x19ce   :  { %17105 = vrot.lane.b32.xlu0 %v14803_v11, %s22168_s29  ;;  %v17146_v11 = vand.u32 4294901760, %v17126_v17 }
0x19d0   :  { %v23540_v19 = vpack.c.bf16 %v17146_v11, %v17143_v18  ;;  %v17240_v22 = vsub.f32 %v17126_v17, %v17146_v11 }
0x19d2   :  { %v17241_v32 = vand.u32 4294901760, %v17240_v22 }
0x19d4   :  { %v17242_v33 = vsub.f32 %v17240_v22, %v17241_v32 }
0x1a15   :  { %v16183_v41 = vpop.xlane.xlu0 %16182 }
0x1a16   :  { %21978 = vrcp.f32 %v16183_v41 }
0x1a20   :  { %v21979_v42 = vpop.eup %21978 }
0x1a21   :  { %v16189_v45 = vmul.f32 %v21979_v42, %v21975_v36  ;;  %v17243_v36 = vand.u32 4294901760, %v17242_v33  ;;  %v17730_v33 = vld [vmem:[#allocation12] sm:$0xff] }
0x1a23   :  { %v16195_v47 = vsel %vm685_vm2, %v16189_v45, 0  ;;  %v21307_v45 = vpack.c.bf16 %v17254_v55, %v17247_v53  ;;  %v17731_v53 = vld [vmem:[#allocation12 + $0x8] sm:$0xff] }
0x1a24   :  { %v16263_v48 = vand.u32 4294901760, %v16195_v47 }
0x1a26   :  { %v16264_v52 = vsub.f32 %v16195_v47, %v16263_v48 }
0x1a28   :  { %v16265_v56 = vand.u32 4294901760, %v16264_v52 }
0x1a2a   :  { %v16266_v57 = vsub.f32 %v16264_v52, %v16265_v56 }
0x1a2c   :  { %v16267_v58 = vand.u32 4294901760, %v16266_v57 }
0x1a2e   :  { %20792 = vmatmul.mubr.f32.vlgmr.msra.gmra.mrb[32].mxu0 %v16267_v58 }
0x1a2f   :  { %20795 = vmatpush3.msra.mxu0 %v16278_v59  ;;  %20796 = vmatprep.mubr.msk.f32.mxu0 %vm22156_vm1, %v22155_v46 }
0x1a30   :  { %20799 = vmatprep.subr.mxu0 %v22155_v46 }
0x1a36   :  { %20797 = vmatmul.mubr.f32.vlgmr.msra.gmra.mrb[32].mxu0 %v16263_v48 }
0x1a37   :  { %20800 = vmatpush3.msra.mxu0 %v16275_v44  ;;  %20801 = vmatprep.mubr.msk.f32.mxu0 %vm22156_vm1, %v22155_v46  ;;  %v21303_v44 = vpack.c.bf16 %v17240_v22, %v17233_v20 }
0x1a38   :  { %20804 = vmatprep.subr.mxu0 %v22155_v46 }
0x1a3e   :  { %20802 = vmatmul.mubr.f32.vlgmr.msra.gmra.mrb[32].mxu0 %v16264_v52 }
0x1a3f   :  { %20805 = vmatpush3.msra.mxu0 %v16198_v40  ;;  %20806 = vmatprep.mubr.msk.f32.mxu0 %vm22156_vm1, %v22155_v46 }
0x1a40   :  { %20809 = vmatprep.subr.mxu0 %v22155_v46 }
0x1a41   :  { %v16186_v24 = vpop.xlane.xlu0 %16185 }
0x1a42   :  { %21980 = vrcp.f32 %v16186_v24 }
0x1a45   :  { %v16644_v60 = vpop.permute.xlu0 %16643 }
0x1a46   :  { %v16650_v61 = vand.u32 4294901760, %v16644_v60  ;;  %20807 = vmatmul.mubr.f32.vlgmr.msra.gmra.mrb[32].mxu0 %v16265_v56 }
0x1a47   :  { %20810 = vmatpush3.msra.mxu0 %v16276_v51  ;;  %20811 = vmatprep.mubr.msk.f32.mxu0 %vm22156_vm1, %v22155_v46  ;;  %v17098_v51 = vpop.permute.xlu1 %17097 }
0x1a48   :  { %20820 = vmatpush3.msra.mxu1 %v16650_v61  ;;  %20814 = vmatprep.subr.mxu0 %v22155_v46  ;;  %v16727_v31 = vsub.f32 %v16644_v60, %v16650_v61  ;;  %v17119_v56 = vsel %vm685_vm2, %v23249_v21, %v17098_v51 }
0x1a49   :  { %20824 = vmatprep.subr.mxu1 %v22155_v46  ;;  %v17106_v52 = vpop.permute.xlu0 %17105 }
0x1a4a   :  { %v16728_v4 = vand.u32 4294901760, %v16727_v31  ;;  %v17121_v29 = vsel %vm8051_vm4, %v17119_v56, %v17106_v52 }
0x1a4c   :  { %v21981_v62 = vpop.eup %21980  ;;  %v16729_v12 = vsub.f32 %v16727_v31, %v16728_v4 }
0x1a4d   :  { %v16190_v0 = vmul.f32 %v21981_v62, %v21977_v49 }
0x1a4e   :  { %20812 = vmatmul.mubr.f32.vlgmr.msra.gmra.mrb[32].mxu0 %v16263_v48  ;;  %v16730_v34 = vand.u32 4294901760, %v16729_v12 }
0x1a4f   :  { %20815 = vmatpush3.msra.mxu0 %v16198_v40  ;;  %20816 = vmatprep.mubr.msk.f32.mxu0 %vm22156_vm1, %v22155_v46  ;;  %v16647_v1 = vsel %vm685_vm2, %v16190_v0, 0  ;;  %v17256_v40 = vsub.f32 %v17254_v55, %v17255_v27  ;;  %v17732_v55 = vld [vmem:[#allocation12 + $0x10] sm:$0xff] }
0x1a50   :  { %v16715_v3 = vand.u32 4294901760, %v16647_v1  ;;  %21288 = vmatprep.subr.bf16.mxu0 %v23540_v19 }
0x1a51   :  { %v17257_v41 = vand.u32 4294901760, %v17256_v40 }
0x1a52   :  { %v16716_v5 = vsub.f32 %v16647_v1, %v16715_v3 }
0x1a53   :  { %v21299_v42 = vpack.c.bf16 %v17257_v41, %v17250_v54 }
0x1a54   :  { %v16717_v9 = vand.u32 4294901760, %v16716_v5 }
0x1a56   :  { %20817 = vmatmul.mubr.f32.vlgmr.msra.gmra.mrb[32].mxu0 %v16263_v48  ;;  %v16718_v10 = vsub.f32 %v16716_v5, %v16717_v9  ;;  %v21323_v48 = vpack.c.bf16 %v17255_v27, %v17248_v37  ;;  %v17733_v37 = vld [vmem:[#allocation12 + $0x18] sm:$0xff]  ;;  %v17754_v27 = vand.u32 4294901760, %v17732_v55 }
0x1a57   :  { %21290 = vmatpush3.bf16.msra.mxu0 %v23540_v19 }
0x1a58   :  { %v16719_v13 = vand.u32 4294901760, %v16718_v10  ;;  %21292 = vmatprep.subr.bf16.mxu0 %v23544_v7 }
0x1a5a   :  { %20822 = vmatmul.mubr.f32.vlgmr.msra.gmra.mrb[36].mxu1 %v16719_v13 }
0x1a5b   :  { %20825 = vmatpush3.msra.mxu1 %v16730_v34  ;;  %20826 = vmatprep.mubr.msk.f32.mxu1 %vm22156_vm1, %v22155_v46 }
0x1a5c   :  { %20829 = vmatprep.subr.mxu1 %v22155_v46  ;;  %21294 = vmatpush3.bf16.msra.mxu0 %v23544_v7 }
0x1a62   :  { %20827 = vmatmul.mubr.f32.vlgmr.msra.gmra.mrb[36].mxu1 %v16715_v3 }
0x1a63   :  { %20830 = vmatpush3.msra.mxu1 %v16727_v31  ;;  %20831 = vmatprep.mubr.msk.f32.mxu1 %vm22156_vm1, %v22155_v46  ;;  %v17100_v31 = vpop.permute.xlu1 %17099 }
0x1a64   :  { %20834 = vmatprep.subr.mxu1 %v22155_v46 }
0x1a67   :  { %v17108_v1 = vpop.permute.xlu1 %17107 }
0x1a6a   :  { %20832 = vmatmul.mubr.f32.vlgmr.msra.gmra.mrb[36].mxu1 %v16716_v5 }
0x1a6b   :  { %20835 = vmatpush3.msra.mxu1 %v16650_v61  ;;  %20836 = vmatprep.mubr.msk.f32.mxu1 %vm22156_vm1, %v22155_v46 }
0x1a6c   :  { %20839 = vmatprep.subr.mxu1 %v22155_v46 }
0x1a72   :  { %20837 = vmatmul.mubr.f32.vlgmr.msra.gmra.mrb[36].mxu1 %v16717_v9 }
0x1a73   :  { %20840 = vmatpush3.msra.mxu1 %v16728_v4  ;;  %20841 = vmatprep.mubr.msk.f32.mxu1 %vm22156_vm1, %v22155_v46 }
0x1a74   :  { %20844 = vmatprep.subr.mxu1 %v22155_v46 }
0x1a7a   :  { %20842 = vmatmul.mubr.f32.vlgmr.msra.gmra.mrb[36].mxu1 %v16715_v3 }
0x1a7b   :  { %20845 = vmatpush3.msra.mxu1 %v16650_v61  ;;  %20846 = vmatprep.mubr.msk.f32.mxu1 %vm22156_vm1, %v22155_v46  ;;  %v17234_v46 = vand.u32 4294901760, %v17233_v20 }
0x1a7d   :  { %v17235_v50 = vsub.f32 %v17233_v20, %v17234_v46  ;;  %v21319_v47 = vpack.c.bf16 %v17241_v32, %v17234_v46 }
0x1a7f   :  { %v17236_v35 = vand.u32 4294901760, %v17235_v50 }
0x1a81   :  { %v21295_v38 = vpack.c.bf16 %v17243_v36, %v17236_v35  ;;  %v17748_v35 = vand.u32 4294901760, %v17730_v33  ;;  %v17751_v36 = vand.u32 4294901760, %v17731_v53 }
0x1a82   :  { %20847 = vmatmul.mubr.f32.vlgmr.msra.gmra.mrb[36].mxu1 %v16715_v3  ;;  %v17120_v3 = vsel %vm685_vm2, %v23251_v23, %v17100_v31  ;;  %v18962_v23 = vld [vmem:[%s23778_s11] ss:$0 sm:$0xff] }
0x1a83   :  { %21296 = vmatprep.subr.bf16.mxu0 %v21295_v38  ;;  %v17122_v21 = vsel %vm8051_vm4, %v17120_v3, %v17108_v1  ;;  %v23582_v39 = vpack.c.bf16 %v17751_v36, %v17748_v35  ;;  %v17838_v40 = vsub.f32 %v17730_v33, %v17748_v35  ;;  %v23606_v1 = vld [vmem:[%s23781_s14] sm:$0xff]  ;;  %v23611_v3 = vld [vmem:[%s23781_s14 + $0x8] sm:$0xff] }
0x1a85   :  { %21336 = vmatprep.subr.bf16.mxu1 %v23582_v39  ;;  %v17839_v54 = vand.u32 4294901760, %v17838_v40 }
0x1a86   :  { %21338 = vmatpush3.bf16.msra.mxu1 %v23582_v39 }
0x1b29   :  { %v16639_v43 = vpop.f32.mrb[32].mxu0 }
0x1b2a   :  { %17113 = vrot.lane.b32.xlu0 %v16639_v43, %s22169_s22  ;;  %v20818_v14 = vpop.f32.mrb[33].mxu0 }
0x1b55   :  { %v17091_v6 = vpop.f32.mrb[36].mxu1 }
0x1b56   :  { %17115 = vrot.lane.b32.xlu1 %v17091_v6, %s22169_s22  ;;  %v20848_v49 = vpop.f32.mrb[37].mxu1 }
0x1b57   :  { %v17845_v49 = vsub.f32 %v17731_v53, %v17751_v36 }
0x1b59   :  { %v17846_v41 = vand.u32 4294901760, %v17845_v49 }
0x1b9c   :  { %v17114_v57 = vpop.permute.xlu0 %17113 }
0x1b9d   :  { %v17123_v58 = vsel %vm8054_vm3, %v17121_v29, %v17114_v57 }
0x1b9e   :  { %v17137_v59 = vsel %vm147_vm0, %v17123_v58, 0 }
0x1b9f   :  { %v17211_v24 = vand.u32 4294901760, %v17137_v59 }
0x1ba1   :  { %v17212_v60 = vsub.f32 %v17137_v59, %v17211_v24 }
0x1ba3   :  { %v17213_v61 = vand.u32 4294901760, %v17212_v60 }
0x1ba5   :  { %v17214_v62 = vsub.f32 %v17212_v60, %v17213_v61 }
0x1ba7   :  { %v17215_v0 = vand.u32 4294901760, %v17214_v62 }
0x1ba9   :  { %20857 = vmatprep.mubr.f32.mxu0 %v17215_v0  ;;  %v23599_v0 = vpack.c.bf16 %v17846_v41, %v17839_v54 }
0x1bc8   :  { %v17116_v4 = vpop.permute.xlu1 %17115 }
0x1bc9   :  { %v17124_v5 = vsel %vm8054_vm3, %v17122_v21, %v17116_v4  ;;  %v23616_v21 = vld [vmem:[%s23781_s14 + $0x10] sm:$0xff]  ;;  %v18298_v4 = vand.u32 4294901760, %v23606_v1 }
0x1bca   :  { %v17140_v9 = vsel %vm147_vm0, %v17124_v5, 0  ;;  %v18301_v5 = vand.u32 4294901760, %v23611_v3 }
0x1bcb   :  { %v17221_v12 = vand.u32 4294901760, %v17140_v9 }
0x1bcd   :  { %v17222_v10 = vsub.f32 %v17140_v9, %v17221_v12  ;;  %v23623_v9 = vld [vmem:[%s23781_s14 + $0x18] sm:$0xff] }
0x1bcf   :  { %v17223_v13 = vand.u32 4294901760, %v17222_v10 }
0x1bd1   :  { %v17224_v34 = vsub.f32 %v17222_v10, %v17223_v13 }
0x1bd3   :  { %v17225_v43 = vand.u32 4294901760, %v17224_v34 }
0x1bd5   :  { %20858 = vmatmul.mubr.f32.vlgmr.msra.gmra.mrb[34].mxu0 %v17225_v43 }
0x1bd6   :  { %21298 = vmatpush3.bf16.msra.mxu0 %v21295_v38  ;;  %20868 = vmatprep.mubr.f32.mxu0 %v17211_v24  ;;  %v17757_v38 = vand.u32 4294901760, %v17733_v37 }
0x1bd7   :  { %21300 = vmatprep.subr.bf16.mxu0 %v21299_v42 }
0x1bd8   :  { %v23584_v6 = vpack.c.bf16 %v17757_v38, %v17754_v27 }
0x1bda   :  { %21302 = vmatpush3.bf16.msra.mxu0 %v21299_v42  ;;  %21340 = vmatprep.subr.bf16.mxu1 %v23584_v6  ;;  %v17840_v42 = vsub.f32 %v17838_v40, %v17839_v54 }
0x1bdb   :  { %21304 = vmatprep.subr.bf16.mxu0 %v21303_v44  ;;  %21342 = vmatpush3.bf16.msra.mxu1 %v23584_v6 }
0x1bdd   :  { %20869 = vmatmul.mubr.f32.vlgmr.msra.gmra.mrb[34].mxu0 %v17221_v12 }
0x1bde   :  { %21306 = vmatpush3.bf16.msra.mxu0 %v21303_v44  ;;  %20879 = vmatprep.mubr.f32.mxu0 %v17212_v60  ;;  %v17847_v44 = vsub.f32 %v17845_v49, %v17846_v41 }
0x1bdf   :  { %21308 = vmatprep.subr.bf16.mxu0 %v21307_v45 }
0x1be0   :  { %v17848_v51 = vand.u32 4294901760, %v17847_v44 }
0x1be2   :  { %21310 = vmatpush3.bf16.msra.mxu0 %v21307_v45  ;;  %v17852_v45 = vsub.f32 %v17732_v55, %v17754_v27 }
0x1be3   :  { %21312 = vmatprep.subr.bf16.mxu0 %v23540_v19 }
0x1be4   :  { %v17853_v52 = vand.u32 4294901760, %v17852_v45 }
0x1be5   :  { %20880 = vmatmul.mubr.f32.vlgmr.msra.gmra.mrb[34].mxu0 %v17222_v10  ;;  %v18307_v10 = vand.u32 4294901760, %v23623_v9 }
0x1be6   :  { %21314 = vmatpush3.bf16.msra.mxu0 %v23540_v19  ;;  %20890 = vmatprep.mubr.f32.mxu0 %v17213_v61  ;;  %v17854_v57 = vsub.f32 %v17852_v45, %v17853_v52  ;;  %v23595_v61 = vpack.c.bf16 %v17845_v49, %v17838_v40 }
0x1be7   :  { %21316 = vmatprep.subr.bf16.mxu0 %v23544_v7 }
0x1be8   :  { %v17855_v59 = vand.u32 4294901760, %v17854_v57 }
0x1bea   :  { %21318 = vmatpush3.bf16.msra.mxu0 %v23544_v7 }
0x1beb   :  { %21320 = vmatprep.subr.bf16.mxu0 %v21319_v47 }
0x1bed   :  { %20891 = vmatmul.mubr.f32.vlgmr.msra.gmra.mrb[34].mxu0 %v17223_v13  ;;  %v23631_v13 = vpack.c.bf16 %v18301_v5, %v18298_v4 }
0x1bee   :  { %21322 = vmatpush3.bf16.msra.mxu0 %v21319_v47  ;;  %20901 = vmatprep.mubr.f32.mxu0 %v17211_v24  ;;  %v17859_v47 = vsub.f32 %v17733_v37, %v17757_v38 }
0x1bef   :  { %21324 = vmatprep.subr.bf16.mxu0 %v21323_v48 }
0x1bf0   :  { %v17860_v56 = vand.u32 4294901760, %v17859_v47  ;;  %v23597_v62 = vpack.c.bf16 %v17859_v47, %v17852_v45 }
0x1bf2   :  { %21326 = vmatpush3.bf16.msra.mxu0 %v21323_v48  ;;  %v17841_v48 = vand.u32 4294901760, %v17840_v42  ;;  %v17861_v58 = vsub.f32 %v17859_v47, %v17860_v56  ;;  %v23601_v31 = vpack.c.bf16 %v17860_v56, %v17853_v52 }
0x1bf3   :  { %21328 = vmatprep.subr.bf16.mxu0 %v23540_v19 }
0x1bf4   :  { %v23590_v29 = vpack.c.bf16 %v17848_v51, %v17841_v48 }
0x1bf5   :  { %20902 = vmatmul.mubr.f32.vlgmr.msra.gmra.mrb[34].mxu0 %v17221_v12 }
0x1bf6   :  { %21330 = vmatpush3.bf16.msra.mxu0 %v23540_v19  ;;  %20912 = vmatprep.mubr.f32.mxu0 %v17211_v24  ;;  %v17862_v24 = vand.u32 4294901760, %v17861_v58 }
0x1bf7   :  { %21332 = vmatprep.subr.bf16.mxu0 %v23544_v7  ;;  %21344 = vmatprep.subr.bf16.mxu1 %v23590_v29 }
0x1bf8   :  { %v23593_v60 = vpack.c.bf16 %v17862_v24, %v17855_v59 }
0x1bfa   :  { %21334 = vmatpush3.bf16.msra.mxu0 %v23544_v7 }
0x1bfb   :  { %21432 = vmatprep.subr.bf16.mxu0 %v23631_v13 }
0x1bfd   :  { %20913 = vmatmul.mubr.f32.vlgmr.msra.gmra.mrb[34].mxu0 %v17221_v12  ;;  %v18304_v12 = vand.u32 4294901760, %v23616_v21 }
0x1bfe   :  { %21434 = vmatpush3.bf16.msra.mxu0 %v23631_v13 }
0x1bff   :  { %v23637_v34 = vpack.c.bf16 %v18307_v10, %v18304_v12 }
0x1c01   :  { %21436 = vmatprep.subr.bf16.mxu0 %v23637_v34 }
0x1c02   :  { %21438 = vmatpush3.bf16.msra.mxu0 %v23637_v34 }
0x1cd0   :  { %v20914_v14 = vpop.f32.mrb[34].mxu0 }
0x1cd1   :  { %v21487_v16 = vadd.f32 %v20914_v14, %v18962_v23  ;;  %v17660_v17 = vpop.f32.mrb[35].mxu0 }
0x1cd2   :  { %v21488_v18 = vadd.f32 %v18962_v23, %v17660_v17 }
0x1cd3   :  { %v17673_v11 = vsel %vm147_vm0, %v21487_v16, 0.0 }
0x1cd4   :  { %17674 = vadd.xlane.f32.xlu1 %v17673_v11  ;;  %v17670_v20 = vsel %vm147_vm0, %v21488_v18, 0.0 }
0x1cd5   :  { %17671 = vadd.xlane.f32.xlu0 %v17670_v20 }
0x1d61   :  { %v17675_v19 = vpop.xlane.xlu1 %17674 }
0x1d62   :  { %v17677_v22 = vmul.f32 0.03125, %v17675_v19  ;;  %v17672_v28 = vpop.xlane.xlu0 %17671 }
0x1d63   :  { %v17676_v25 = vmul.f32 0.03125, %v17672_v28 }
0x1d64   :  { %v23572_v30 = vsub.f32 %v21487_v16, %v17677_v22 }
0x1d65   :  { %v23574_v26 = vsub.f32 %v21488_v18, %v17676_v25 }
0x1d66   :  { %v17681_v7 = vmul.f32 %v23572_v30, %v23572_v30 }
0x1d67   :  { %v17680_v46 = vmul.f32 %v23574_v26, %v23574_v26 }
0x1d68   :  { %v17685_v50 = vsel %vm147_vm0, %v17681_v7, 0.0 }
0x1d69   :  { %v17682_v32 = vsel %vm147_vm0, %v17680_v46, 0.0 }
0x1d6a   :  { %17683 = vadd.xlane.f32.xlu0 %v17682_v32 }
0x1d6e   :  { %17686 = vadd.xlane.f32.xlu0 %v17685_v50 }
0x1df7   :  { %v17684_v43 = vpop.xlane.xlu0 %17683 }
0x1df8   :  { %v17688_v23 = vmul.f32 0.032258064, %v17684_v43 }
0x1dfa   :  { %21982 = vrsqrt.f32 %v17688_v23  ;;  %vm17692_vm13 = vcmp.eq.f32.partialorder %v17688_v23, inf  ;;  %v17695_v11 = vand.u32 2147483648, %v17688_v23  ;;  %vm17694_vm14 = vcmp.eq.f32.partialorder %v17688_v23, 0.0 }
0x1dfb   :  { %v17687_v14 = vpop.xlane.xlu0 %17686 }
0x1dfc   :  { %v17689_v16 = vmul.f32 0.032258064, %v17687_v14 }
0x1dfe   :  { %21984 = vrsqrt.f32 %v17689_v16  ;;  %vm17699_vm15 = vcmp.eq.f32.partialorder %v17689_v16, inf  ;;  %v17702_v46 = vand.u32 2147483648, %v17689_v16  ;;  %vm17701_vm1 = vcmp.eq.f32.partialorder %v17689_v16, 0.0 }
0x1e04   :  { %v21983_v17 = vpop.eup %21982 }
0x1e05   :  { %v17691_v18 = vmul.f32 %v21983_v17, %v17688_v23 }
0x1e07   :  { %v17693_v20 = vsel %vm17692_vm13, %v17688_v23, %v17691_v18 }
0x1e08   :  { %v21985_v19 = vpop.eup %21984  ;;  %v17696_v22 = vsel %vm17694_vm14, %v17695_v11, %v17693_v20  ;;  %v18392_v11 = vsub.f32 %v23606_v1, %v18298_v4  ;;  %v18399_v20 = vsub.f32 %v23611_v3, %v18301_v5 }
0x1e09   :  { %v17704_v28 = vadd.f32 1e-06, %v17696_v22  ;;  %v17698_v25 = vmul.f32 %v21985_v19, %v17689_v16 }
0x1e0a   :  { %v18393_v19 = vand.u32 4294901760, %v18392_v11  ;;  %v18400_v22 = vand.u32 4294901760, %v18399_v20 }
0x1e0b   :  { %21986 = vrsqrt.f32 %v17704_v28  ;;  %v17700_v32 = vsel %vm17699_vm15, %v17689_v16, %v17698_v25  ;;  %vm17708_vm2 = vcmp.eq.f32.partialorder %v17704_v28, inf  ;;  %v17711_v55 = vand.u32 2147483648, %v17704_v28 }
0x1e0c   :  { %v17703_v7 = vsel %vm17701_vm1, %v17702_v46, %v17700_v32  ;;  %vm17710_vm3 = vcmp.eq.f32.partialorder %v17704_v28, 0.0  ;;  %v18394_v25 = vsub.f32 %v18392_v11, %v18393_v19  ;;  %v18401_v46 = vsub.f32 %v18399_v20, %v18400_v22 }
0x1e0d   :  { %v17705_v50 = vadd.f32 1e-06, %v17703_v7 }
0x1e0e   :  { %v18395_v32 = vand.u32 4294901760, %v18394_v25  ;;  %v18402_v1 = vand.u32 4294901760, %v18401_v46 }
0x1e0f   :  { %21988 = vrsqrt.f32 %v17705_v50  ;;  %vm17715_vm4 = vcmp.eq.f32.partialorder %v17705_v50, inf  ;;  %v17718_v38 = vand.u32 2147483648, %v17705_v50  ;;  %vm17717_vm5 = vcmp.eq.f32.partialorder %v17705_v50, 0.0 }
0x1e10   :  { %v21399_v4 = vpack.c.bf16 %v18402_v1, %v18395_v32 }
0x1e15   :  { %v21987_v33 = vpop.eup %21986 }
0x1e16   :  { %v17707_v53 = vmul.f32 %v21987_v33, %v17704_v28 }
0x1e18   :  { %v17709_v35 = vsel %vm17708_vm2, %v17704_v28, %v17707_v53  ;;  %v21447_v28 = vpack.c.bf16 %v18400_v22, %v18393_v19 }
0x1e19   :  { %v21989_v36 = vpop.eup %21988  ;;  %v17712_v37 = vsel %vm17710_vm3, %v17711_v55, %v17709_v35 }
0x1e1a   :  { %v17714_v27 = vmul.f32 %v21989_v36, %v17705_v50  ;;  %21990 = vrcp.f32 %v17712_v37 }
0x1e1c   :  { %v17716_v40 = vsel %vm17715_vm4, %v17705_v50, %v17714_v27 }
0x1e1d   :  { %v17719_v49 = vsel %vm17717_vm5, %v17718_v38, %v17716_v40 }
0x1e1e   :  { %21992 = vrcp.f32 %v17719_v49 }
0x1e24   :  { %v21991_v54 = vpop.eup %21990 }
0x1e25   :  { %v17722_v41 = vmul.f32 %v21991_v54, %v23574_v26 }
0x1e27   :  { %v17724_v42 = vmul.f32 %v17722_v41, %v23030_v63 }
0x1e28   :  { %v21993_v44 = vpop.eup %21992 }
0x1e29   :  { %v17726_v45 = vadd.f32 %v17724_v42, %v23041_v8  ;;  %v17723_v47 = vmul.f32 %v21993_v44, %v23572_v30 }
0x1e2b   :  { %v23648_v48 = vadd.f32 %v17726_v45, %v23037_v2  ;;  %v17725_v51 = vmul.f32 %v17723_v47, %v23030_v63 }
0x1e2d   :  { %v17742_v52 = vsel %vm147_vm0, %v23648_v48, 0  ;;  %v17727_v56 = vadd.f32 %v17725_v51, %v23047_v15  ;;  %v18279_v15 = vld [vmem:[%s23781_s14 + $0x20] sm:$0xff]  ;;  %v21415_v51 = vpack.c.bf16 %v18399_v20, %v18392_v11 }
0x1e2e   :  { %v17816_v57 = vand.u32 4294901760, %v17742_v52 }
0x1e2f   :  { %v23655_v26 = vadd.f32 %v17727_v56, %v23037_v2 }
0x1e30   :  { %v17817_v58 = vsub.f32 %v17742_v52, %v17816_v57 }
0x1e31   :  { %v17745_v8 = vsel %vm147_vm0, %v23655_v26, 0 }
0x1e32   :  { %v17818_v59 = vand.u32 4294901760, %v17817_v58  ;;  %v17826_v30 = vand.u32 4294901760, %v17745_v8 }
0x1e34   :  { %v17819_v24 = vsub.f32 %v17817_v58, %v17818_v59  ;;  %v17827_v43 = vsub.f32 %v17745_v8, %v17826_v30  ;;  %v18413_v8 = vsub.f32 %v23623_v9, %v18307_v10 }
0x1e36   :  { %v17820_v23 = vand.u32 4294901760, %v17819_v24  ;;  %v17828_v14 = vand.u32 4294901760, %v17827_v43 }
0x1e38   :  { %20923 = vmatprep.mubr.f32.mxu1 %v17820_v23  ;;  %v17829_v16 = vsub.f32 %v17827_v43, %v17828_v14 }
0x1e3a   :  { %v17830_v17 = vand.u32 4294901760, %v17829_v16 }
0x1e3c   :  { %20924 = vmatmul.mubr.f32.vlgmr.msra.gmra.mrb[38].mxu1 %v17830_v17 }
0x1e3d   :  { %21346 = vmatpush3.bf16.msra.mxu1 %v23590_v29  ;;  %20934 = vmatprep.mubr.f32.mxu1 %v17816_v57  ;;  %v18310_v29 = vand.u32 4294901760, %v18279_v15 }
0x1e3e   :  { %21348 = vmatprep.subr.bf16.mxu1 %v23593_v60 }
0x1e3f   :  { %v18420_v7 = vsub.f32 %v18279_v15, %v18310_v29 }
0x1e41   :  { %21350 = vmatpush3.bf16.msra.mxu1 %v23593_v60  ;;  %v18421_v3 = vand.u32 4294901760, %v18420_v7 }
0x1e42   :  { %21352 = vmatprep.subr.bf16.mxu1 %v23595_v61 }
0x1e43   :  { %v18422_v53 = vsub.f32 %v18420_v7, %v18421_v3 }
0x1e44   :  { %20935 = vmatmul.mubr.f32.vlgmr.msra.gmra.mrb[38].mxu1 %v17826_v30 }
0x1e45   :  { %21354 = vmatpush3.bf16.msra.mxu1 %v23595_v61  ;;  %20945 = vmatprep.mubr.f32.mxu1 %v17817_v58  ;;  %v18281_v61 = vld [vmem:[%s23781_s14 + $0x30] sm:$0xff]  ;;  %v18423_v37 = vand.u32 4294901760, %v18422_v53  ;;  %v18406_v58 = vsub.f32 %v23616_v21, %v18304_v12 }
0x1e46   :  { %21356 = vmatprep.subr.bf16.mxu1 %v23597_v62 }
0x1e47   :  { %v18407_v23 = vand.u32 4294901760, %v18406_v58 }
0x1e49   :  { %21358 = vmatpush3.bf16.msra.mxu1 %v23597_v62  ;;  %v18282_v62 = vld [vmem:[%s23781_s14 + $0x38] sm:$0xff] }
0x1e4a   :  { %21360 = vmatprep.subr.bf16.mxu1 %v23582_v39 }
0x1e4c   :  { %20946 = vmatmul.mubr.f32.vlgmr.msra.gmra.mrb[38].mxu1 %v17827_v43 }
0x1e4d   :  { %21362 = vmatpush3.bf16.msra.mxu1 %v23582_v39  ;;  %20956 = vmatprep.mubr.f32.mxu1 %v17818_v59 }
0x1e4e   :  { %21364 = vmatprep.subr.bf16.mxu1 %v23584_v6 }
0x1e51   :  { %21366 = vmatpush3.bf16.msra.mxu1 %v23584_v6 }
0x1e52   :  { %21368 = vmatprep.subr.bf16.mxu1 %v23599_v0 }
0x1e54   :  { %20957 = vmatmul.mubr.f32.vlgmr.msra.gmra.mrb[38].mxu1 %v17828_v14  ;;  %v18414_v14 = vand.u32 4294901760, %v18413_v8 }
0x1e55   :  { %21370 = vmatpush3.bf16.msra.mxu1 %v23599_v0  ;;  %20967 = vmatprep.mubr.f32.mxu1 %v17816_v57  ;;  %v18316_v0 = vand.u32 4294901760, %v18281_v61 }
0x1e56   :  { %21372 = vmatprep.subr.bf16.mxu1 %v23601_v31 }
0x1e57   :  { %v18434_v35 = vsub.f32 %v18281_v61, %v18316_v0  ;;  %v18415_v61 = vsub.f32 %v18413_v8, %v18414_v14 }
0x1e59   :  { %21374 = vmatpush3.bf16.msra.mxu1 %v23601_v31  ;;  %v18319_v31 = vand.u32 4294901760, %v18282_v62  ;;  %v18435_v38 = vand.u32 4294901760, %v18434_v35  ;;  %v18416_v10 = vand.u32 4294901760, %v18415_v61 }
0x1e5a   :  { %21376 = vmatprep.subr.bf16.mxu1 %v23582_v39 }
0x1e5b   :  { %v23700_v18 = vpack.c.bf16 %v18319_v31, %v18316_v0  ;;  %v18441_v36 = vsub.f32 %v18282_v62, %v18319_v31  ;;  %v18436_v54 = vsub.f32 %v18434_v35, %v18435_v38  ;;  %v21451_v0 = vpack.c.bf16 %v18414_v14, %v18407_v23 }
0x1e5c   :  { %20968 = vmatmul.mubr.f32.vlgmr.msra.gmra.mrb[38].mxu1 %v17826_v30 }
0x1e5d   :  { %21378 = vmatpush3.bf16.msra.mxu1 %v23582_v39  ;;  %20978 = vmatprep.mubr.f32.mxu1 %v17816_v57  ;;  %v18280_v39 = vld [vmem:[%s23781_s14 + $0x28] sm:$0xff]  ;;  %v18442_v40 = vand.u32 4294901760, %v18441_v36  ;;  %v18437_v44 = vand.u32 4294901760, %v18436_v54  ;;  %v23714_v56 = vpack.c.bf16 %v18441_v36, %v18434_v35  ;;  %v18963_v57 = vld [vmem:[%s23780_s13] ss:$0 sm:$0xff] }
0x1e5e   :  { %21380 = vmatprep.subr.bf16.mxu1 %v23584_v6  ;;  %v18313_v60 = vand.u32 4294901760, %v18280_v39 }
0x1e5f   :  { %v21459_v41 = vpack.c.bf16 %v18442_v40, %v18435_v38  ;;  %v18443_v42 = vsub.f32 %v18441_v36, %v18442_v40 }
0x1e60   :  { %v18427_v50 = vsub.f32 %v18280_v39, %v18313_v60 }
0x1e61   :  { %21382 = vmatpush3.bf16.msra.mxu1 %v23584_v6  ;;  %v23688_v6 = vpack.c.bf16 %v18313_v60, %v18310_v29  ;;  %v18444_v45 = vand.u32 4294901760, %v18443_v42  ;;  %v18408_v60 = vsub.f32 %v18406_v58, %v18407_v23 }
0x1e62   :  { %21384 = vmatprep.subr.bf16.mxu1 %v23631_v13  ;;  %v18428_v5 = vand.u32 4294901760, %v18427_v50  ;;  %v23712_v52 = vpack.c.bf16 %v18427_v50, %v18420_v7 }
0x1e63   :  { %21440 = vmatprep.subr.bf16.mxu0 %v23688_v6  ;;  %v21411_v47 = vpack.c.bf16 %v18444_v45, %v18437_v44  ;;  %v18409_v9 = vand.u32 4294901760, %v18408_v60 }
0x1e64   :  { %20979 = vmatmul.mubr.f32.vlgmr.msra.gmra.mrb[38].mxu1 %v17826_v30  ;;  %21442 = vmatpush3.bf16.msra.mxu0 %v23688_v6  ;;  %v21455_v33 = vpack.c.bf16 %v18428_v5, %v18421_v3  ;;  %v18429_v55 = vsub.f32 %v18427_v50, %v18428_v5 }
0x1e65   :  { %21386 = vmatpush3.bf16.msra.mxu1 %v23631_v13  ;;  %21444 = vmatprep.subr.bf16.mxu0 %v23700_v18  ;;  %v21403_v22 = vpack.c.bf16 %v18416_v10, %v18409_v9 }
0x1e66   :  { %21388 = vmatprep.subr.bf16.mxu1 %v23637_v34  ;;  %v18430_v27 = vand.u32 4294901760, %v18429_v55 }
0x1e68   :  { %21446 = vmatpush3.bf16.msra.mxu0 %v23700_v18  ;;  %v21407_v49 = vpack.c.bf16 %v18430_v27, %v18423_v37 }
0x1e69   :  { %21390 = vmatpush3.bf16.msra.mxu1 %v23637_v34  ;;  %21448 = vmatprep.subr.bf16.mxu0 %v21447_v28 }
0x1e6a   :  { %21392 = vmatprep.subr.bf16.mxu1 %v23688_v6 }
0x1e6d   :  { %21394 = vmatpush3.bf16.msra.mxu1 %v23688_v6 }
0x1e6e   :  { %21396 = vmatprep.subr.bf16.mxu1 %v23700_v18 }
0x1e71   :  { %21398 = vmatpush3.bf16.msra.mxu1 %v23700_v18 }
0x1e72   :  { %21400 = vmatprep.subr.bf16.mxu1 %v21399_v4 }
0x1f37   :  { %v20980_v59 = vpop.f32.mrb[38].mxu1 }
0x1f38   :  { %v21489_v30 = vadd.f32 %v20980_v59, %v18963_v57  ;;  %v18265_v24 = vpop.f32.mrb[39].mxu1 }
0x1f39   :  { %v21490_v43 = vadd.f32 %v18963_v57, %v18265_v24 }
0x1f3a   :  { %v18295_v16 = vsel %vm18290_vm6, %v21489_v30, 0 }
0x1f3b   :  { %v18380_v17 = vand.u32 4294901760, %v18295_v16  ;;  %v18292_v15 = vsel %vm18290_vm6, %v21490_v43, 0 }
0x1f3c   :  { %v18370_v39 = vand.u32 4294901760, %v18292_v15 }
0x1f3d   :  { %v18381_v29 = vsub.f32 %v18295_v16, %v18380_v17 }
0x1f3e   :  { %v18371_v62 = vsub.f32 %v18292_v15, %v18370_v39 }
0x1f3f   :  { %v18382_v21 = vand.u32 4294901760, %v18381_v29 }
0x1f40   :  { %v18372_v12 = vand.u32 4294901760, %v18371_v62 }
0x1f41   :  { %v18383_v31 = vsub.f32 %v18381_v29, %v18382_v21 }
0x1f42   :  { %21054 = vmatprep.mubr.f32.mxu0 %v18372_v12  ;;  %v18373_v11 = vsub.f32 %v18371_v62, %v18372_v12 }
0x1f43   :  { %21055 = vmatmul.mubr.f32.vlgmr.msra.gmra.mrb[36].mxu0 %v18382_v21  ;;  %v18384_v19 = vand.u32 4294901760, %v18383_v31 }
0x1f44   :  { %21450 = vmatpush3.bf16.msra.mxu0 %v21447_v28  ;;  %21073 = vmatprep.mubr.f32.mxu0 %v18370_v39  ;;  %v18374_v20 = vand.u32 4294901760, %v18373_v11  ;;  %v21419_v28 = vpack.c.bf16 %v18413_v8, %v18406_v58 }
0x1f45   :  { %21452 = vmatprep.subr.bf16.mxu0 %v21451_v0 }
0x1f46   :  { %20997 = vmatprep.mubr.f32.mxu1 %v18374_v20 }
0x1f47   :  { %20998 = vmatmul.mubr.f32.vlgmr.msra.gmra.mrb[40].mxu1 %v18384_v19 }
0x1f48   :  { %21402 = vmatpush3.bf16.msra.mxu1 %v21399_v4  ;;  %21454 = vmatpush3.bf16.msra.mxu0 %v21451_v0 }
0x1f49   :  { %21016 = vmatprep.mubr.f32.mxu1 %v18370_v39  ;;  %21404 = vmatprep.subr.bf16.mxu1 %v21403_v22 }
0x1f4a   :  { %21456 = vmatprep.subr.bf16.mxu0 %v21455_v33 }
0x1f4c   :  { %21406 = vmatpush3.bf16.msra.mxu1 %v21403_v22  ;;  %21458 = vmatpush3.bf16.msra.mxu0 %v21455_v33 }
0x1f4d   :  { %21408 = vmatprep.subr.bf16.mxu1 %v21407_v49  ;;  %21460 = vmatprep.subr.bf16.mxu0 %v21459_v41 }
0x1f50   :  { %21410 = vmatpush3.bf16.msra.mxu1 %v21407_v49  ;;  %21462 = vmatpush3.bf16.msra.mxu0 %v21459_v41 }
0x1f51   :  { %21412 = vmatprep.subr.bf16.mxu1 %v21411_v47  ;;  %21464 = vmatprep.subr.bf16.mxu0 %v23631_v13 }
0x1f53   :  { %21074 = vmatmul.mubr.f32.vlgmr.msra.gmra.mrb[36].mxu0 %v18380_v17 }
0x1f54   :  { %21414 = vmatpush3.bf16.msra.mxu1 %v21411_v47  ;;  %21466 = vmatpush3.bf16.msra.mxu0 %v23631_v13 }
0x1f55   :  { %21092 = vmatprep.mubr.f32.mxu0 %v18370_v39  ;;  %21416 = vmatprep.subr.bf16.mxu1 %v21415_v51 }
0x1f56   :  { %21468 = vmatprep.subr.bf16.mxu0 %v23637_v34 }
0x1f57   :  { %21017 = vmatmul.mubr.f32.vlgmr.msra.gmra.mrb[40].mxu1 %v18380_v17 }
0x1f58   :  { %21418 = vmatpush3.bf16.msra.mxu1 %v21415_v51  ;;  %21035 = vmatprep.mubr.f32.mxu1 %v18371_v62 }
0x1f59   :  { %21470 = vmatpush3.bf16.msra.mxu0 %v23637_v34  ;;  %21420 = vmatprep.subr.bf16.mxu1 %v21419_v28 }
0x1f5a   :  { %21472 = vmatprep.subr.bf16.mxu0 %v23688_v6 }
0x1f5c   :  { %21422 = vmatpush3.bf16.msra.mxu1 %v21419_v28 }
0x1f5d   :  { %21474 = vmatpush3.bf16.msra.mxu0 %v23688_v6  ;;  %21424 = vmatprep.subr.bf16.mxu1 %v23712_v52  ;;  %v18964_v6 = vld [vmem:[%s23798_s3] ss:$0 sm:$0xff] }
0x1f5e   :  { %21476 = vmatprep.subr.bf16.mxu0 %v23700_v18 }
0x1f60   :  { %21426 = vmatpush3.bf16.msra.mxu1 %v23712_v52 }
0x1f61   :  { %21478 = vmatpush3.bf16.msra.mxu0 %v23700_v18  ;;  %21428 = vmatprep.subr.bf16.mxu1 %v23714_v56 }
0x1f64   :  { %21093 = vmatmul.mubr.f32.vlgmr.msra.gmra.mrb[36].mxu0 %v18380_v17  ;;  %21430 = vmatpush3.bf16.msra.mxu1 %v23714_v56 }
0x1f67   :  { %21036 = vmatmul.mubr.f32.vlgmr.msra.gmra.mrb[40].mxu1 %v18381_v29 }
0x2037   :  { %v21094_v13 = vpop.f32.mrb[36].mxu0 }
0x2038   :  { %v18867_v34 = vpop.f32.mrb[37].mxu0 }
0x203a   :  { %v21037_v25 = vpop.f32.mrb[40].mxu1 }
0x203b   :  { %v21491_v46 = vadd.f32 %v21037_v25, %v18964_v6  ;;  %v18591_v32 = vpop.f32.mrb[41].mxu1 }
0x203c   :  { %v21493_v1 = vadd.f32 %v18964_v6, %v18591_v32 }
0x203d   :  { %v21492_v4 = vadd.f32 %v21491_v46, %v21094_v13 }
0x203e   :  { %v21494_v7 = vadd.f32 %v21493_v1, %v18867_v34 }
0x203f   :  { %v18880_v18 = vsel %vm147_vm0, %v21492_v4, 0.0 }
0x2040   :  { %18881 = vadd.xlane.f32.xlu0 %v18880_v18  ;;  %v18877_v50 = vsel %vm147_vm0, %v21494_v7, 0.0 }
0x2041   :  { %18878 = vadd.xlane.f32.xlu1 %v18877_v50 }
0x20cd   :  { %v18882_v3 = vpop.xlane.xlu0 %18881 }
0x20ce   :  { %v18884_v5 = vmul.f32 0.03125, %v18882_v3  ;;  %v18879_v33 = vpop.xlane.xlu1 %18878 }
0x20cf   :  { %v18883_v53 = vmul.f32 0.03125, %v18879_v33 }
0x20d0   :  { %v18886_v55 = vsub.f32 %v21492_v4, %v18884_v5 }
0x20d1   :  { %v18885_v35 = vsub.f32 %v21494_v7, %v18883_v53 }
0x20d2   :  { %v18888_v36 = vmul.f32 %v18886_v55, %v18886_v55 }
0x20d3   :  { %v18887_v37 = vmul.f32 %v18885_v35, %v18885_v35 }
0x20d4   :  { %v18892_v27 = vsel %vm147_vm0, %v18888_v36, 0.0 }
0x20d5   :  { %18893 = vadd.xlane.f32.xlu0 %v18892_v27  ;;  %v18889_v38 = vsel %vm147_vm0, %v18887_v37, 0.0 }
0x20d6   :  { %18890 = vadd.xlane.f32.xlu1 %v18889_v38 }
0x2162   :  { %v18894_v40 = vpop.xlane.xlu0 %18893 }
0x2163   :  { %v18896_v49 = vmul.f32 0.032258064, %v18894_v40  ;;  %v18891_v54 = vpop.xlane.xlu1 %18890 }
0x2164   :  { %v18895_v41 = vmul.f32 0.032258064, %v18891_v54 }
0x2165   :  { %21994 = vrsqrt.f32 %v18896_v49  ;;  %vm18906_vm7 = vcmp.eq.f32.partialorder %v18896_v49, inf  ;;  %v18909_v47 = vand.u32 2147483648, %v18896_v49  ;;  %vm18908_vm8 = vcmp.eq.f32.partialorder %v18896_v49, 0.0 }
0x2166   :  { %21996 = vrsqrt.f32 %v18895_v41  ;;  %vm18899_vm9 = vcmp.eq.f32.partialorder %v18895_v41, inf  ;;  %v18902_v56 = vand.u32 2147483648, %v18895_v41  ;;  %vm18901_vm10 = vcmp.eq.f32.partialorder %v18895_v41, 0.0 }
0x216f   :  { %v21995_v42 = vpop.eup %21994 }
0x2170   :  { %v21997_v44 = vpop.eup %21996  ;;  %v18905_v45 = vmul.f32 %v21995_v42, %v18896_v49 }
0x2171   :  { %v18898_v51 = vmul.f32 %v21997_v44, %v18895_v41 }
0x2172   :  { %v18907_v52 = vsel %vm18906_vm7, %v18896_v49, %v18905_v45 }
0x2173   :  { %v18910_v57 = vsel %vm18908_vm8, %v18909_v47, %v18907_v52  ;;  %v18900_v58 = vsel %vm18899_vm9, %v18895_v41, %v18898_v51 }
0x2174   :  { %v18912_v8 = vadd.f32 1e-06, %v18910_v57  ;;  %v18903_v59 = vsel %vm18901_vm10, %v18902_v56, %v18900_v58 }
0x2175   :  { %v18911_v30 = vadd.f32 1e-06, %v18903_v59 }
0x2176   :  { %21998 = vrsqrt.f32 %v18912_v8  ;;  %vm18922_vm11 = vcmp.eq.f32.partialorder %v18912_v8, inf  ;;  %v18925_v16 = vand.u32 2147483648, %v18912_v8  ;;  %vm18924_vm13 = vcmp.eq.f32.partialorder %v18912_v8, 0.0 }
0x2177   :  { %22000 = vrsqrt.f32 %v18911_v30  ;;  %vm18915_vm12 = vcmp.eq.f32.partialorder %v18911_v30, inf  ;;  %v18918_v17 = vand.u32 2147483648, %v18911_v30  ;;  %vm18917_vm14 = vcmp.eq.f32.partialorder %v18911_v30, 0.0 }
0x2180   :  { %v21999_v24 = vpop.eup %21998 }
0x2181   :  { %v22001_v43 = vpop.eup %22000  ;;  %v18921_v23 = vmul.f32 %v21999_v24, %v18912_v8 }
0x2182   :  { %v18914_v14 = vmul.f32 %v22001_v43, %v18911_v30 }
0x2183   :  { %v18923_v15 = vsel %vm18922_vm11, %v18912_v8, %v18921_v23 }
0x2184   :  { %v18916_v39 = vsel %vm18915_vm12, %v18911_v30, %v18914_v14  ;;  %v18926_v29 = vsel %vm18924_vm13, %v18925_v16, %v18923_v15 }
0x2185   :  { %v18919_v60 = vsel %vm18917_vm14, %v18918_v17, %v18916_v39  ;;  %22002 = vrcp.f32 %v18926_v29 }
0x2186   :  { %22004 = vrcp.f32 %v18919_v60 }
0x218f   :  { %v22003_v61 = vpop.eup %22002 }
0x2190   :  { %v22005_v62 = vpop.eup %22004  ;;  %v18930_v21 = vmul.f32 %v22003_v61, %v18886_v55 }
0x2191   :  { %v18929_v12 = vmul.f32 %v22005_v62, %v18885_v35 }
0x2192   :  { %v18932_v0 = vmul.f32 %v18930_v21, %v23030_v63 }
0x2193   :  { %v18931_v31 = vmul.f32 %v18929_v12, %v23030_v63 }
0x2194   :  { %v18934_v9 = vadd.f32 %v18932_v0, %v23655_v26 }
0x2195   :  { %v18933_v10 = vadd.f32 %v18931_v31, %v23648_v48 }
0x2196   :  { %v18936_v11 = vadd.f32 %v18934_v9, %v23037_v2 }
0x2197   :  { %v18935_v20 = vadd.f32 %v18933_v10, %v23037_v2 }
0x2198   :  { %18938 = vst.msk [vmem:[#allocation13 + $0x8] sm:$0xff] %vm147_vm0, %v18936_v11 }
0x2199   :  { %18937 = vst.msk [vmem:[#allocation13] sm:$0xff] %vm147_vm0, %v18935_v20 }
0x219a   :  { %22129 = shalt.err (!%p22126_p2)
}
0x219b   :  { %s23799_s5 = sld [smem:[#allocation22_spill]] }
0x21a1   :  { %s22130_s7 = scalar_lea.hbm %s23799_s5, 256 }
0x21a2   :  { %p22131_p3 = scmp.ne.s32.totalorder %s23799_s5, %s22130_s7  ;;  %p22134_p4 = scmp.lt.u32.totalorder %s22130_s7, %s23799_s5 }
0x21a4   :  { %p22136_p5 = pnand %p22134_p4, %p22131_p3 }
0x21a6   :  { %22139 = shalt.err (!%p22136_p5)
}
0x21a7   :  { %18950 = dma.vmem_to_hbm [thread:$0]  %s18945_s4, 256, %s23799_s5, [#allocation6], %s22150_s25, %s22150_s25, %s22151_s26  }
0x21a8   :  { %22146 = dma.done.wait [#allocation6], 256  }
0x21a9   :  { %22147 = vsyncadd [#allocation6], 4294967040 }
0x21aa   :  { %18954 = vsyncpa [#allocation5], 1 }
0x21ab   :  { %18955 = vsyncpa [#allocation8], 1 }
0x21ac   :  { %18956 = vsyncpa [#allocation11], 1 }
0x21ad   :  { %18957 = vsyncpa [#allocation6], 1 }

</bundles_post_ra>
